<compile_context>
chip_gen: v7x
topology: tpu7x:2x2x1
jax: 0.10.0
libtpu: 0.0.40
codegen_flags: <defaults>
</compile_context>

<pallas_src>
import functools
import math

import jax
import jax.numpy as jnp
from jax.experimental import pallas as pl
from jax.experimental.pallas import tpu as pltpu


# ----------------------------------------------------------------------------
# helpers
# ----------------------------------------------------------------------------
def _choose_tile(dim, multiple, cap):
    """Largest tile <= cap that divides `dim` and is a multiple of `multiple`;
    falls back to the full dimension (always a legal Pallas block)."""
    if dim <= cap:
        return dim
    t = (cap // multiple) * multiple
    while t >= multiple:
        if dim % t == 0:
            return t
        t -= multiple
    return dim


def _apply_act(x, act):
    if act == "gelu":
        # tanh-approx GELU (exact-erf GELU in HF ViT; difference is negligible
        # and this keeps the kernel on tanh, which lowers to the EUP).
        c = math.sqrt(2.0 / math.pi)
        return 0.5 * x * (1.0 + jnp.tanh(c * (x + 0.044715 * x * x * x)))
    if act == "relu":
        return jnp.maximum(x, 0.0)
    if act == "tanh":
        return jnp.tanh(x)
    return x


# ----------------------------------------------------------------------------
# fused matmul + bias (+ residual) + activation, tiled over (M, N, K)
# ----------------------------------------------------------------------------
def _mm_kernel(x_ref, w_ref, b_ref, o_ref, acc_ref, *, act):
    k = pl.program_id(2)

    @pl.when(k == 0)
    def _():
        acc_ref[...] = jnp.zeros_like(acc_ref)

    acc_ref[...] += jnp.dot(x_ref[...], w_ref[...],
                            preferred_element_type=jnp.float32)

    @pl.when(k == pl.num_programs(2) - 1)
    def _():
        y = acc_ref[...] + b_ref[...].astype(jnp.float32)
        o_ref[...] = _apply_act(y, act).astype(o_ref.dtype)


def _mm_res_kernel(x_ref, w_ref, b_ref, r_ref, o_ref, acc_ref, *, act):
    k = pl.program_id(2)

    @pl.when(k == 0)
    def _():
        acc_ref[...] = jnp.zeros_like(acc_ref)

    acc_ref[...] += jnp.dot(x_ref[...], w_ref[...],
                            preferred_element_type=jnp.float32)

    @pl.when(k == pl.num_programs(2) - 1)
    def _():
        y = acc_ref[...] + b_ref[...].astype(jnp.float32) \
            + r_ref[...].astype(jnp.float32)
        o_ref[...] = _apply_act(y, act).astype(o_ref.dtype)


def matmul_bias_act(x, w, b, act="linear", residual=None,
                    out_dtype=jnp.bfloat16,
                    tm_cap=1024, tn_cap=512, tk_cap=512):
    """(M,K)@(K,N) + bias (+ residual) + activation, bf16 MXU, f32 accumulate."""
    M, K = x.shape
    K2, N = w.shape
    assert K == K2, (K, K2)

    TM = _choose_tile(M, 8, tm_cap)     # second-to-last dims: multiple of 8 or full
    TN = _choose_tile(N, 128, tn_cap)   # last dims: multiple of 128 or full
    TK = _choose_tile(K, 128, tk_cap)

    x = x.astype(jnp.bfloat16)
    w = w.astype(jnp.bfloat16)
    b2 = b.reshape(1, N).astype(jnp.float32)

    grid = (M // TM, N // TN, K // TK)
    in_specs = [
        pl.BlockSpec((TM, TK), lambda i, j, k: (i, k)),
        pl.BlockSpec((TK, TN), lambda i, j, k: (k, j)),
        pl.BlockSpec((1, TN), lambda i, j, k: (0, j)),
    ]
    args = [x, w, b2]
    if residual is not None:
        in_specs.append(pl.BlockSpec((TM, TN), lambda i, j, k: (i, j)))
        args.append(residual.astype(jnp.bfloat16))
        kern = functools.partial(_mm_res_kernel, act=act)
    else:
        kern = functools.partial(_mm_kernel, act=act)

    return pl.pallas_call(
        kern,
        out_shape=jax.ShapeDtypeStruct((M, N), out_dtype),
        grid=grid,
        in_specs=in_specs,
        out_specs=pl.BlockSpec((TM, TN), lambda i, j, k: (i, j)),
        scratch_shapes=[pltpu.VMEM((TM, TN), jnp.float32)],
        compiler_params=pltpu.CompilerParams(
            dimension_semantics=("parallel", "parallel", "arbitrary")),
    )(*args)


# ----------------------------------------------------------------------------
# LayerNorm (row-wise, f32 math, tiled over rows)
# ----------------------------------------------------------------------------
def _ln_kernel(x_ref, g_ref, b_ref, o_ref, *, eps):
    x = x_ref[...].astype(jnp.float32)
    mu = jnp.mean(x, axis=-1, keepdims=True)
    xc = x - mu
    var = jnp.mean(xc * xc, axis=-1, keepdims=True)
    y = xc * jax.lax.rsqrt(var + eps)
    y = y * g_ref[...].astype(jnp.float32) + b_ref[...].astype(jnp.float32)
    o_ref[...] = y.astype(o_ref.dtype)


def layer_norm(x, gamma, beta, eps=1e-12, out_dtype=jnp.bfloat16, tm_cap=1024):
    M, D = x.shape
    TM = _choose_tile(M, 8, tm_cap)
    return pl.pallas_call(
        functools.partial(_ln_kernel, eps=eps),
        out_shape=jax.ShapeDtypeStruct((M, D), out_dtype),
        grid=(M // TM,),
        in_specs=[pl.BlockSpec((TM, D), lambda i: (i, 0)),
                  pl.BlockSpec((1, D), lambda i: (0, 0)),
                  pl.BlockSpec((1, D), lambda i: (0, 0))],
        out_specs=pl.BlockSpec((TM, D), lambda i: (i, 0)),
        compiler_params=pltpu.CompilerParams(
            dimension_semantics=("parallel",)),
    )(x, gamma.reshape(1, D).astype(jnp.float32),
      beta.reshape(1, D).astype(jnp.float32))


# ----------------------------------------------------------------------------
# Self-attention: one grid point per (batch, head); full (S, Dh) blocks
# ----------------------------------------------------------------------------
def _attn_kernel(q_ref, k_ref, v_ref, o_ref, *, scale):
    q = q_ref[...]                                           # (S, Dh) bf16
    k = k_ref[...]
    v = v_ref[...]
    s = jax.lax.dot_general(q, k, (((1,), (1,)), ((), ())),
                            preferred_element_type=jnp.float32) * scale  # (S, S)
    m = jnp.max(s, axis=-1, keepdims=True)
    p = jnp.exp(s - m)
    denom = jnp.sum(p, axis=-1, keepdims=True)
    ctx = jnp.dot(p.astype(v.dtype), v, preferred_element_type=jnp.float32)
    ctx = ctx * pl.reciprocal(denom, approx=True)
    o_ref[...] = ctx.astype(o_ref.dtype)


def attention(q, k, v):
    """q,k,v: (B, nh, S, Dh) bf16 -> context (B, nh, S, Dh) bf16."""
    B, nh, S, Dh = q.shape
    scale = 1.0 / math.sqrt(Dh)
    spec = pl.BlockSpec((None, None, S, Dh), lambda b, h: (b, h, 0, 0))
    return pl.pallas_call(
        functools.partial(_attn_kernel, scale=scale),
        out_shape=jax.ShapeDtypeStruct((B, nh, S, Dh), jnp.bfloat16),
        grid=(B, nh),
        in_specs=[spec, spec, spec],
        out_specs=spec,
        compiler_params=pltpu.CompilerParams(
            dimension_semantics=("parallel", "parallel")),
    )(q, k, v)


# ----------------------------------------------------------------------------
# parameter init (deterministic; bf16 weights, f32 biases / LN params)
# ----------------------------------------------------------------------------
def init_linear(key, fin, fout, std=0.02):
    kw, _ = jax.random.split(key)
    w = (std * jax.random.normal(kw, (fin, fout), jnp.float32)).astype(jnp.bfloat16)
    b = jnp.zeros((fout,), jnp.float32)
    return w, b


def init_block(key, hidden, mlp):
    ks = jax.random.split(key, 4)
    return dict(
        ln1_g=jnp.ones((hidden,), jnp.float32),
        ln1_b=jnp.zeros((hidden,), jnp.float32),
        qkv=init_linear(ks[0], hidden, 3 * hidden),
        proj=init_linear(ks[1], hidden, hidden),
        ln2_g=jnp.ones((hidden,), jnp.float32),
        ln2_b=jnp.zeros((hidden,), jnp.float32),
        fc1=init_linear(ks[2], hidden, mlp),
        fc2=init_linear(ks[3], mlp, hidden),
    )


# ----------------------------------------------------------------------------
# Encoder (ViT backbone, CLS feature)
# ----------------------------------------------------------------------------
class EncoderPallas:
    """Pallas/JAX port of `Encoder` (ViT, returns last_hidden_state[:, 0, :]).

    Full ViT-base config is hidden=768, layers=12, heads=12, mlp=3072, patch=16.
    """

    def __init__(self, key, input_shape, hidden=768, layers=12, heads=12,
                 mlp=3072, patch=16):
        C, H, W = input_shape
        assert H % patch == 0 and W % patch == 0
        assert hidden % heads == 0
        self.hidden, self.layers, self.heads = hidden, layers, heads
        self.head_dim = hidden // heads
        self.mlp = mlp
        self.patch = patch
        self.num_patches = (H // patch) * (W // patch)
        self.seq = self.num_patches + 1

        ks = jax.random.split(key, layers + 3)
        self.params = dict(
            patch_embed=init_linear(ks[0], patch * patch * C, hidden),
            cls=(0.02 * jax.random.normal(ks[1], (1, 1, hidden),
                                          jnp.float32)).astype(jnp.bfloat16),
            pos=(0.02 * jax.random.normal(ks[2], (1, self.seq, hidden),
                                          jnp.float32)).astype(jnp.bfloat16),
            ln_f_g=jnp.ones((hidden,), jnp.float32),
            ln_f_b=jnp.zeros((hidden,), jnp.float32),
            blocks=[init_block(ks[3 + i], hidden, mlp) for i in range(layers)],
        )
        self._fwd = jax.jit(self._forward)

    # -- patch embedding + CLS token + positional embedding --
    def _embed(self, x_nchw, params):
        B, C, H, W = x_nchw.shape
        p = self.patch
        hp, wp = H // p, W // p
        x = jnp.transpose(x_nchw, (0, 2, 3, 1))                       # NHWC
        x = x.reshape(B, hp, p, wp, p, C)
        x = jnp.transpose(x, (0, 1, 3, 2, 4, 5)).reshape(B * hp * wp, p * p * C)
        tok = matmul_bias_act(x, *params["patch_embed"])              # (B*P, D) bf16
        tok = tok.reshape(B, hp * wp, self.hidden)
        cls = jnp.broadcast_to(params["cls"], (B, 1, self.hidden))
        return jnp.concatenate([cls, tok], axis=1) + params["pos"]    # (B, S, D)

    # -- one pre-LN transformer block --
    def _block(self, h2d, B, blk):
        D, nh, dh, S = self.hidden, self.heads, self.head_dim, self.seq
        ln1 = layer_norm(h2d, blk["ln1_g"], blk["ln1_b"])
        qkv = matmul_bias_act(ln1, *blk["qkv"])                       # (B*S, 3D)
        qkv = qkv.reshape(B, S, 3, nh, dh)
        qkv = jnp.transpose(qkv, (2, 0, 3, 1, 4))                     # (3, B, nh, S, dh)
        ctx = attention(qkv[0], qkv[1], qkv[2])                       # (B, nh, S, dh)
        ctx = jnp.transpose(ctx, (0, 2, 1, 3)).reshape(B * S, D)
        h2d = matmul_bias_act(ctx, *blk["proj"], residual=h2d)        # attn + skip
        ln2 = layer_norm(h2d, blk["ln2_g"], blk["ln2_b"])
        ff = matmul_bias_act(ln2, *blk["fc1"], act="gelu")
        h2d = matmul_bias_act(ff, *blk["fc2"], residual=h2d)          # mlp + skip
        return h2d

    def _forward(self, params, x):
        B = x.shape[0]
        h = self._embed(x, params).reshape(B * self.seq, self.hidden)
        for blk in params["blocks"]:
            h = self._block(h, B, blk)
        h = layer_norm(h, params["ln_f_g"], params["ln_f_b"],
                       out_dtype=jnp.float32)
        h = h.reshape(B, self.seq, self.hidden)
        return h[:, 0, :]                                             # CLS feature

    def __call__(self, x):
        return self._fwd(self.params, x)

    # -- pure-JAX (f32) reference of the same forward, for validation --
    def forward_reference(self, x):
        params = self.params
        D, nh, dh, S, p = self.hidden, self.heads, self.head_dim, self.seq, self.patch

        def lin(h, wb):
            w, b = wb
            return h @ w.astype(jnp.float32) + b

        def ln(h, g, b, eps=1e-12):
            mu = h.mean(-1, keepdims=True)
            var = ((h - mu) ** 2).mean(-1, keepdims=True)
            return (h - mu) * jax.lax.rsqrt(var + eps) * g + b

        def gelu(h):
            c = math.sqrt(2.0 / math.pi)
            return 0.5 * h * (1.0 + jnp.tanh(c * (h + 0.044715 * h ** 3)))

        B, C, H, W = x.shape
        hp, wp = H // p, W // p
        xx = jnp.transpose(x, (0, 2, 3, 1)).reshape(B, hp, p, wp, p, C)
        xx = jnp.transpose(xx, (0, 1, 3, 2, 4, 5)).reshape(B * hp * wp, p * p * C)
        tok = lin(xx, params["patch_embed"]).reshape(B, hp * wp, D)
        cls = jnp.broadcast_to(params["cls"].astype(jnp.float32), (B, 1, D))
        h = (jnp.concatenate([cls, tok], 1)
             + params["pos"].astype(jnp.float32)).reshape(B * S, D)
        for blk in params["blocks"]:
            x1 = ln(h, blk["ln1_g"], blk["ln1_b"])
            qkv = lin(x1, blk["qkv"]).reshape(B, S, 3, nh, dh)
            q, k, v = [jnp.transpose(qkv[:, :, i], (0, 2, 1, 3)) for i in range(3)]
            s = jnp.einsum("bhqd,bhkd->bhqk", q, k) / math.sqrt(dh)
            a = jax.nn.softmax(s, axis=-1)
            ctx = jnp.einsum("bhqk,bhkd->bhqd", a, v)
            ctx = jnp.transpose(ctx, (0, 2, 1, 3)).reshape(B * S, D)
            h = lin(ctx, blk["proj"]) + h
            x2 = ln(h, blk["ln2_g"], blk["ln2_b"])
            h = lin(gelu(lin(x2, blk["fc1"])), blk["fc2"]) + h
        h = ln(h, params["ln_f_g"], params["ln_f_b"]).reshape(B, S, D)
        return h[:, 0, :]


# ----------------------------------------------------------------------------
if __name__ == "__main__":
    key = jax.random.PRNGKey(0)
    k_params, k_x = jax.random.split(key)

    # Small smoke-test config (same dataflow as ViT-base; defaults above are
    # the full hidden=768 / layers=12 / heads=12 / mlp=3072 configuration).
    input_shape = (3, 32, 32)
    batch = 2
    enc = EncoderPallas(k_params, input_shape,
                        hidden=256, layers=2, heads=4, mlp=512, patch=16)

    x = jax.random.normal(k_x, (batch, *input_shape), jnp.float32)

    feats = enc(x)
    jax.block_until_ready(feats)

    assert feats.shape == (batch, 256), feats.shape
    assert bool(jnp.all(jnp.isfinite(feats)))

    # numerical sanity check vs. a pure-JAX f32 reference (bf16 kernels -> loose tol)
    ref = enc.forward_reference(x)
    rel_err = float(jnp.linalg.norm(feats - ref) / (jnp.linalg.norm(ref) + 1e-6))
    assert rel_err < 0.1, rel_err

    print("KERNEL_OK")
</pallas_src>

<mosaic_0001>
module attributes {stable_mosaic.version = 11 : i64} {
  func.func @_mm_kernel(%arg0: i32, %arg1: i32, %arg2: i32, %arg3: memref<8x384xbf16, #tpu.memory_space<vmem>>, %arg4: memref<384x256xbf16, #tpu.memory_space<vmem>>, %arg5: memref<1x256xf32, #tpu.memory_space<vmem>>, %arg6: memref<8x256xbf16, #tpu.memory_space<vmem>>, %arg7: memref<8x256xf32, #tpu.memory_space<vmem>>) attributes {dimension_semantics = [#tpu.dimension_semantics<parallel>, #tpu.dimension_semantics<parallel>, #tpu.dimension_semantics<arbitrary>], iteration_bounds = array<i64: 1, 1, 2>, scalar_prefetch = 0 : i64, scratch_operands = 1 : i64, tpu.core_type = #tpu.core_type<tc>, window_params = [{transform_indices = @transform_0, window_bounds = array<i64: 8, 384>}, {transform_indices = @transform_1, window_bounds = array<i64: 384, 256>}, {transform_indices = @transform_2, window_bounds = array<i64: 1, 256>}, {transform_indices = @transform_3, window_bounds = array<i64: 8, 256>}]} {
    %c0_i32 = arith.constant 0 : i32
    %0 = arith.cmpi eq, %arg2, %c0_i32 : i32
    %1 = arith.extui %0 : i1 to i32
    %c0_i32_0 = arith.constant 0 : i32
    %2 = arith.cmpi ne, %1, %c0_i32_0 : i32
    scf.if %2 {
      %cst_9 = arith.constant 0.000000e+00 : f32
      %12 = vector.broadcast %cst_9 : f32 to vector<8x256xf32>
      %c0_10 = arith.constant 0 : index
      %c0_11 = arith.constant 0 : index
      %13 = vector.load %arg7[%c0_10, %c0_11] : memref<8x256xf32, #tpu.memory_space<vmem>>, vector<8x256xf32>
      tpu.vector_store %arg7[%c0_10, %c0_11], %12 {strides = array<i32>} : memref<8x256xf32, #tpu.memory_space<vmem>>, vector<8x256xf32>,
    } else {
    }
    %c0 = arith.constant 0 : index
    %c0_1 = arith.constant 0 : index
    %3 = vector.load %arg7[%c0, %c0_1] : memref<8x256xf32, #tpu.memory_space<vmem>>, vector<8x256xf32>
    %c0_2 = arith.constant 0 : index
    %c0_3 = arith.constant 0 : index
    %4 = vector.load %arg3[%c0_2, %c0_3] : memref<8x384xbf16, #tpu.memory_space<vmem>>, vector<8x384xbf16>
    %c0_4 = arith.constant 0 : index
    %c0_5 = arith.constant 0 : index
    %5 = vector.load %arg4[%c0_4, %c0_5] : memref<384x256xbf16, #tpu.memory_space<vmem>>, vector<384x256xbf16>
    %cst = arith.constant dense<0.000000e+00> : vector<8x256xf32>
    %6 = tpu.matmul %4, %5, %cst {dimension_numbers = #tpu.dot_dimension_numbers<[1], [0], [0], [1], [0, 0, 1, 1], [], []>} : vector<8x384xbf16>, vector<384x256xbf16>, vector<8x256xf32> -> vector<8x256xf32>
    %7 = arith.addf %3, %6 : vector<8x256xf32>
    %c0_6 = arith.constant 0 : index
    %c0_7 = arith.constant 0 : index
    %8 = vector.load %arg7[%c0_6, %c0_7] : memref<8x256xf32, #tpu.memory_space<vmem>>, vector<8x256xf32>
    tpu.vector_store %arg7[%c0_6, %c0_7], %7 {strides = array<i32>} : memref<8x256xf32, #tpu.memory_space<vmem>>, vector<8x256xf32>,
    %c1_i32 = arith.constant 1 : i32
    %9 = arith.cmpi eq, %arg2, %c1_i32 : i32
    %10 = arith.extui %9 : i1 to i32
    %c0_i32_8 = arith.constant 0 : i32
    %11 = arith.cmpi ne, %10, %c0_i32_8 : i32
    scf.if %11 {
      %c0_9 = arith.constant 0 : index
      %c0_10 = arith.constant 0 : index
      %12 = vector.load %arg7[%c0_9, %c0_10] : memref<8x256xf32, #tpu.memory_space<vmem>>, vector<8x256xf32>
      %c0_11 = arith.constant 0 : index
      %c0_12 = arith.constant 0 : index
      %13 = vector.load %arg5[%c0_11, %c0_12] : memref<1x256xf32, #tpu.memory_space<vmem>>, vector<1x256xf32>
      %14 = vector.broadcast %13 : vector<1x256xf32> to vector<8x256xf32>
      %15 = arith.addf %12, %14 : vector<8x256xf32>
      %16 = arith.truncf %15 : vector<8x256xf32> to vector<8x256xbf16>
      %c0_13 = arith.constant 0 : index
      %c0_14 = arith.constant 0 : index
      %17 = vector.load %arg6[%c0_13, %c0_14] : memref<8x256xbf16, #tpu.memory_space<vmem>>, vector<8x256xbf16>
      tpu.vector_store %arg6[%c0_13, %c0_14], %16 {strides = array<i32>} : memref<8x256xbf16, #tpu.memory_space<vmem>>, vector<8x256xbf16>,
    } else {
    }
    return
  }
  func.func @transform_0(%arg0: i32, %arg1: i32, %arg2: i32) -> (i32, i32) {
    %c0_i32 = arith.constant 0 : i32
    return %arg0, %arg2 : i32, i32
  }
  func.func @transform_1(%arg0: i32, %arg1: i32, %arg2: i32) -> (i32, i32) {
    %c0_i32 = arith.constant 0 : i32
    return %arg2, %arg1 : i32, i32
  }
  func.func @transform_2(%arg0: i32, %arg1: i32, %arg2: i32) -> (i32, i32) {
    %c0_i32 = arith.constant 0 : i32
    %c0_i32_0 = arith.constant 0 : i32
    return %c0_i32, %arg1 : i32, i32
  }
  func.func @transform_3(%arg0: i32, %arg1: i32, %arg2: i32) -> (i32, i32) {
    %c0_i32 = arith.constant 0 : i32
    return %arg0, %arg1 : i32, i32
  }
}

module attributes {stable_mosaic.version = 11 : i64} {
  func.func @_ln_kernel(%arg0: i32, %arg1: memref<10x256xbf16, #tpu.memory_space<vmem>>, %arg2: memref<1x256xf32, #tpu.memory_space<vmem>>, %arg3: memref<1x256xf32, #tpu.memory_space<vmem>>, %arg4: memref<10x256xbf16, #tpu.memory_space<vmem>>) attributes {dimension_semantics = [#tpu.dimension_semantics<parallel>], iteration_bounds = array<i64: 1>, scalar_prefetch = 0 : i64, scratch_operands = 0 : i64, tpu.core_type = #tpu.core_type<tc>, window_params = [{transform_indices = @transform_0, window_bounds = array<i64: 10, 256>}, {pipeline_mode = #tpu.pipeline_mode<synchronous>, transform_indices = @transform_1, window_bounds = array<i64: 1, 256>}, {pipeline_mode = #tpu.pipeline_mode<synchronous>, transform_indices = @transform_2, window_bounds = array<i64: 1, 256>}, {transform_indices = @transform_3, window_bounds = array<i64: 10, 256>}]} {
    %c0 = arith.constant 0 : index
    %c0_0 = arith.constant 0 : index
    %0 = vector.load %arg1[%c0, %c0_0] : memref<10x256xbf16, #tpu.memory_space<vmem>>, vector<10x256xbf16>
    %1 = arith.extf %0 : vector<10x256xbf16> to vector<10x256xf32>
    %cst = arith.constant dense<0.000000e+00> : vector<10xf32>
    %2 = vector.multi_reduction <add>, %1, %cst [1] : vector<10x256xf32> to vector<10xf32>
    %3 = vector.shape_cast %2 : vector<10xf32> to vector<10x1xf32>
    %cst_1 = arith.constant 2.560000e+02 : f32
    %4 = vector.broadcast %cst_1 : f32 to vector<10x1xf32>
    %5 = arith.divf %3, %4 : vector<10x1xf32>
    %6 = vector.broadcast %5 : vector<10x1xf32> to vector<10x256xf32>
    %7 = arith.subf %1, %6 : vector<10x256xf32>
    %8 = arith.mulf %7, %7 : vector<10x256xf32>
    %cst_2 = arith.constant dense<0.000000e+00> : vector<10xf32>
    %9 = vector.multi_reduction <add>, %8, %cst_2 [1] : vector<10x256xf32> to vector<10xf32>
    %10 = vector.shape_cast %9 : vector<10xf32> to vector<10x1xf32>
    %cst_3 = arith.constant 2.560000e+02 : f32
    %11 = vector.broadcast %cst_3 : f32 to vector<10x1xf32>
    %12 = arith.divf %10, %11 : vector<10x1xf32>
    %cst_4 = arith.constant 9.99999996E-13 : f32
    %13 = vector.broadcast %cst_4 : f32 to vector<10x1xf32>
    %14 = arith.addf %12, %13 : vector<10x1xf32>
    %15 = math.rsqrt %14 : vector<10x1xf32>
    %16 = vector.broadcast %15 : vector<10x1xf32> to vector<10x256xf32>
    %17 = arith.mulf %7, %16 : vector<10x256xf32>
    %c0_5 = arith.constant 0 : index
    %c0_6 = arith.constant 0 : index
    %18 = vector.load %arg2[%c0_5, %c0_6] : memref<1x256xf32, #tpu.memory_space<vmem>>, vector<1x256xf32>
    %19 = vector.broadcast %18 : vector<1x256xf32> to vector<10x256xf32>
    %20 = arith.mulf %17, %19 : vector<10x256xf32>
    %c0_7 = arith.constant 0 : index
    %c0_8 = arith.constant 0 : index
    %21 = vector.load %arg3[%c0_7, %c0_8] : memref<1x256xf32, #tpu.memory_space<vmem>>, vector<1x256xf32>
    %22 = vector.broadcast %21 : vector<1x256xf32> to vector<10x256xf32>
    %23 = arith.addf %20, %22 : vector<10x256xf32>
    %24 = arith.truncf %23 : vector<10x256xf32> to vector<10x256xbf16>
    %c0_9 = arith.constant 0 : index
    %c0_10 = arith.constant 0 : index
    %25 = vector.load %arg4[%c0_9, %c0_10] : memref<10x256xbf16, #tpu.memory_space<vmem>>, vector<10x256xbf16>
    tpu.vector_store %arg4[%c0_9, %c0_10], %24 {strides = array<i32>} : memref<10x256xbf16, #tpu.memory_space<vmem>>, vector<10x256xbf16>,
    return
  }
  func.func @transform_0(%arg0: i32) -> (i32, i32) {
    %c0_i32 = arith.constant 0 : i32
    %c0_i32_0 = arith.constant 0 : i32
    return %arg0, %c0_i32 : i32, i32
  }
  func.func @transform_1(%arg0: i32) -> (i32, i32) {
    %c0_i32 = arith.constant 0 : i32
    %c0_i32_0 = arith.constant 0 : i32
    %c0_i32_1 = arith.constant 0 : i32
    return %c0_i32, %c0_i32_0 : i32, i32
  }
  func.func @transform_2(%arg0: i32) -> (i32, i32) {
    %c0_i32 = arith.constant 0 : i32
    %c0_i32_0 = arith.constant 0 : i32
    %c0_i32_1 = arith.constant 0 : i32
    return %c0_i32, %c0_i32_0 : i32, i32
  }
  func.func @transform_3(%arg0: i32) -> (i32, i32) {
    %c0_i32 = arith.constant 0 : i32
    %c0_i32_0 = arith.constant 0 : i32
    return %arg0, %c0_i32 : i32, i32
  }
}

module attributes {stable_mosaic.version = 11 : i64} {
  func.func @_mm_kernel(%arg0: i32, %arg1: i32, %arg2: i32, %arg3: memref<10x256xbf16, #tpu.memory_space<vmem>>, %arg4: memref<256x384xbf16, #tpu.memory_space<vmem>>, %arg5: memref<1x384xf32, #tpu.memory_space<vmem>>, %arg6: memref<10x384xbf16, #tpu.memory_space<vmem>>, %arg7: memref<10x384xf32, #tpu.memory_space<vmem>>) attributes {dimension_semantics = [#tpu.dimension_semantics<parallel>, #tpu.dimension_semantics<parallel>, #tpu.dimension_semantics<arbitrary>], iteration_bounds = array<i64: 1, 2, 1>, scalar_prefetch = 0 : i64, scratch_operands = 1 : i64, tpu.core_type = #tpu.core_type<tc>, window_params = [{transform_indices = @transform_0, window_bounds = array<i64: 10, 256>}, {transform_indices = @transform_1, window_bounds = array<i64: 256, 384>}, {transform_indices = @transform_2, window_bounds = array<i64: 1, 384>}, {transform_indices = @transform_3, window_bounds = array<i64: 10, 384>}]} {
    %c0_i32 = arith.constant 0 : i32
    %0 = arith.cmpi eq, %arg2, %c0_i32 : i32
    %1 = arith.extui %0 : i1 to i32
    %c0_i32_0 = arith.constant 0 : i32
    %2 = arith.cmpi ne, %1, %c0_i32_0 : i32
    scf.if %2 {
      %cst_10 = arith.constant 0.000000e+00 : f32
      %12 = vector.broadcast %cst_10 : f32 to vector<10x384xf32>
      %c0_11 = arith.constant 0 : index
      %c0_12 = arith.constant 0 : index
      %13 = vector.load %arg7[%c0_11, %c0_12] : memref<10x384xf32, #tpu.memory_space<vmem>>, vector<10x384xf32>
      tpu.vector_store %arg7[%c0_11, %c0_12], %12 {strides = array<i32>} : memref<10x384xf32, #tpu.memory_space<vmem>>, vector<10x384xf32>,
    } else {
    }
    %c0 = arith.constant 0 : index
    %c0_1 = arith.constant 0 : index
    %3 = vector.load %arg7[%c0, %c0_1] : memref<10x384xf32, #tpu.memory_space<vmem>>, vector<10x384xf32>
    %c0_2 = arith.constant 0 : index
    %c0_3 = arith.constant 0 : index
    %4 = vector.load %arg3[%c0_2, %c0_3] : memref<10x256xbf16, #tpu.memory_space<vmem>>, vector<10x256xbf16>
    %c0_4 = arith.constant 0 : index
    %c0_5 = arith.constant 0 : index
    %5 = vector.load %arg4[%c0_4, %c0_5] : memref<256x384xbf16, #tpu.memory_space<vmem>>, vector<256x384xbf16>
    %cst = arith.constant dense<0.000000e+00> : vector<10x384xf32>
    %6 = tpu.matmul %4, %5, %cst {dimension_numbers = #tpu.dot_dimension_numbers<[1], [0], [0], [1], [0, 0, 1, 1], [], []>} : vector<10x256xbf16>, vector<256x384xbf16>, vector<10x384xf32> -> vector<10x384xf32>
    %7 = arith.addf %3, %6 : vector<10x384xf32>
    %c0_6 = arith.constant 0 : index
    %c0_7 = arith.constant 0 : index
    %8 = vector.load %arg7[%c0_6, %c0_7] : memref<10x384xf32, #tpu.memory_space<vmem>>, vector<10x384xf32>
    tpu.vector_store %arg7[%c0_6, %c0_7], %7 {strides = array<i32>} : memref<10x384xf32, #tpu.memory_space<vmem>>, vector<10x384xf32>,
    %c0_i32_8 = arith.constant 0 : i32
    %9 = arith.cmpi eq, %arg2, %c0_i32_8 : i32
    %10 = arith.extui %9 : i1 to i32
    %c0_i32_9 = arith.constant 0 : i32
    %11 = arith.cmpi ne, %10, %c0_i32_9 : i32
    scf.if %11 {
      %c0_10 = arith.constant 0 : index
      %c0_11 = arith.constant 0 : index
      %12 = vector.load %arg7[%c0_10, %c0_11] : memref<10x384xf32, #tpu.memory_space<vmem>>, vector<10x384xf32>
      %c0_12 = arith.constant 0 : index
      %c0_13 = arith.constant 0 : index
      %13 = vector.load %arg5[%c0_12, %c0_13] : memref<1x384xf32, #tpu.memory_space<vmem>>, vector<1x384xf32>
      %14 = vector.broadcast %13 : vector<1x384xf32> to vector<10x384xf32>
      %15 = arith.addf %12, %14 : vector<10x384xf32>
      %16 = arith.truncf %15 : vector<10x384xf32> to vector<10x384xbf16>
      %c0_14 = arith.constant 0 : index
      %c0_15 = arith.constant 0 : index
      %17 = vector.load %arg6[%c0_14, %c0_15] : memref<10x384xbf16, #tpu.memory_space<vmem>>, vector<10x384xbf16>
      tpu.vector_store %arg6[%c0_14, %c0_15], %16 {strides = array<i32>} : memref<10x384xbf16, #tpu.memory_space<vmem>>, vector<10x384xbf16>,
    } else {
    }
    return
  }
  func.func @transform_0(%arg0: i32, %arg1: i32, %arg2: i32) -> (i32, i32) {
    %c0_i32 = arith.constant 0 : i32
    return %arg0, %arg2 : i32, i32
  }
  func.func @transform_1(%arg0: i32, %arg1: i32, %arg2: i32) -> (i32, i32) {
    %c0_i32 = arith.constant 0 : i32
    return %arg2, %arg1 : i32, i32
  }
  func.func @transform_2(%arg0: i32, %arg1: i32, %arg2: i32) -> (i32, i32) {
    %c0_i32 = arith.constant 0 : i32
    %c0_i32_0 = arith.constant 0 : i32
    return %c0_i32, %arg1 : i32, i32
  }
  func.func @transform_3(%arg0: i32, %arg1: i32, %arg2: i32) -> (i32, i32) {
    %c0_i32 = arith.constant 0 : i32
    return %arg0, %arg1 : i32, i32
  }
}

module attributes {stable_mosaic.version = 11 : i64} {
  func.func @_attn_kernel(%arg0: i32, %arg1: i32, %arg2: memref<1x1x5x64xbf16, #tpu.memory_space<vmem>>, %arg3: memref<1x1x5x64xbf16, #tpu.memory_space<vmem>>, %arg4: memref<1x1x5x64xbf16, #tpu.memory_space<vmem>>, %arg5: memref<1x1x5x64xbf16, #tpu.memory_space<vmem>>) attributes {dimension_semantics = [#tpu.dimension_semantics<parallel>, #tpu.dimension_semantics<parallel>], iteration_bounds = array<i64: 2, 4>, scalar_prefetch = 0 : i64, scratch_operands = 0 : i64, tpu.core_type = #tpu.core_type<tc>, window_params = [{transform_indices = @transform_0, window_bounds = array<i64: 1, 1, 5, 64>}, {transform_indices = @transform_1, window_bounds = array<i64: 1, 1, 5, 64>}, {transform_indices = @transform_2, window_bounds = array<i64: 1, 1, 5, 64>}, {transform_indices = @transform_3, window_bounds = array<i64: 1, 1, 5, 64>}]} {
    %c0 = arith.constant 0 : index
    %c0_0 = arith.constant 0 : index
    %c0_1 = arith.constant 0 : index
    %c0_2 = arith.constant 0 : index
    %0 = vector.load %arg2[%c0, %c0_0, %c0_1, %c0_2] : memref<1x1x5x64xbf16, #tpu.memory_space<vmem>>, vector<1x1x5x64xbf16>
    %1 = vector.shape_cast %0 : vector<1x1x5x64xbf16> to vector<5x64xbf16>
    %c0_3 = arith.constant 0 : index
    %c0_4 = arith.constant 0 : index
    %c0_5 = arith.constant 0 : index
    %c0_6 = arith.constant 0 : index
    %2 = vector.load %arg3[%c0_3, %c0_4, %c0_5, %c0_6] : memref<1x1x5x64xbf16, #tpu.memory_space<vmem>>, vector<1x1x5x64xbf16>
    %3 = vector.shape_cast %2 : vector<1x1x5x64xbf16> to vector<5x64xbf16>
    %c0_7 = arith.constant 0 : index
    %c0_8 = arith.constant 0 : index
    %c0_9 = arith.constant 0 : index
    %c0_10 = arith.constant 0 : index
    %4 = vector.load %arg4[%c0_7, %c0_8, %c0_9, %c0_10] : memref<1x1x5x64xbf16, #tpu.memory_space<vmem>>, vector<1x1x5x64xbf16>
    %5 = vector.shape_cast %4 : vector<1x1x5x64xbf16> to vector<5x64xbf16>
    %cst = arith.constant dense<0.000000e+00> : vector<5x5xf32>
    %6 = tpu.matmul %1, %3, %cst {dimension_numbers = #tpu.dot_dimension_numbers<[1], [1], [0], [0], [0, 0, 1, 0], [], []>} : vector<5x64xbf16>, vector<5x64xbf16>, vector<5x5xf32> -> vector<5x5xf32>
    %cst_11 = arith.constant 1.250000e-01 : f32
    %7 = vector.broadcast %cst_11 : f32 to vector<5x5xf32>
    %8 = arith.mulf %6, %7 : vector<5x5xf32>
    %cst_12 = arith.constant dense<0xFF800000> : vector<5xf32>
    %9 = vector.multi_reduction <maximumf>, %8, %cst_12 [1] : vector<5x5xf32> to vector<5xf32>
    %10 = vector.shape_cast %9 : vector<5xf32> to vector<5x1xf32>
    %11 = vector.broadcast %10 : vector<5x1xf32> to vector<5x5xf32>
    %12 = arith.subf %8, %11 : vector<5x5xf32>
    %13 = math.exp %12 : vector<5x5xf32>
    %cst_13 = arith.constant dense<0.000000e+00> : vector<5xf32>
    %14 = vector.multi_reduction <add>, %13, %cst_13 [1] : vector<5x5xf32> to vector<5xf32>
    %15 = vector.shape_cast %14 : vector<5xf32> to vector<5x1xf32>
    %16 = arith.truncf %13 : vector<5x5xf32> to vector<5x5xbf16>
    %cst_14 = arith.constant dense<0.000000e+00> : vector<5x64xf32>
    %17 = tpu.matmul %16, %5, %cst_14 {dimension_numbers = #tpu.dot_dimension_numbers<[1], [0], [0], [1], [0, 0, 1, 1], [], []>} : vector<5x5xbf16>, vector<5x64xbf16>, vector<5x64xf32> -> vector<5x64xf32>
    %18 = tpu.reciprocal %15 {approx = true} : vector<5x1xf32> -> vector<5x1xf32>
    %19 = vector.broadcast %18 : vector<5x1xf32> to vector<5x64xf32>
    %20 = arith.mulf %17, %19 : vector<5x64xf32>
    %21 = arith.truncf %20 : vector<5x64xf32> to vector<5x64xbf16>
    %c0_15 = arith.constant 0 : index
    %c0_16 = arith.constant 0 : index
    %c0_17 = arith.constant 0 : index
    %c0_18 = arith.constant 0 : index
    %22 = vector.load %arg5[%c0_15, %c0_16, %c0_17, %c0_18] : memref<1x1x5x64xbf16, #tpu.memory_space<vmem>>, vector<1x1x5x64xbf16>
    %23 = vector.shape_cast %22 : vector<1x1x5x64xbf16> to vector<5x64xbf16>
    %24 = vector.shape_cast %21 : vector<5x64xbf16> to vector<1x1x5x64xbf16>
    tpu.vector_store %arg5[%c0_15, %c0_16, %c0_17, %c0_18], %24 {strides = array<i32>} : memref<1x1x5x64xbf16, #tpu.memory_space<vmem>>, vector<1x1x5x64xbf16>,
    return
  }
  func.func @transform_0(%arg0: i32, %arg1: i32) -> (i32, i32, i32, i32) {
    %c0_i32 = arith.constant 0 : i32
    %c0_i32_0 = arith.constant 0 : i32
    %c0_i32_1 = arith.constant 0 : i32
    return %arg0, %arg1, %c0_i32, %c0_i32_0 : i32, i32, i32, i32
  }
  func.func @transform_1(%arg0: i32, %arg1: i32) -> (i32, i32, i32, i32) {
    %c0_i32 = arith.constant 0 : i32
    %c0_i32_0 = arith.constant 0 : i32
    %c0_i32_1 = arith.constant 0 : i32
    return %arg0, %arg1, %c0_i32, %c0_i32_0 : i32, i32, i32, i32
  }
  func.func @transform_2(%arg0: i32, %arg1: i32) -> (i32, i32, i32, i32) {
    %c0_i32 = arith.constant 0 : i32
    %c0_i32_0 = arith.constant 0 : i32
    %c0_i32_1 = arith.constant 0 : i32
    return %arg0, %arg1, %c0_i32, %c0_i32_0 : i32, i32, i32, i32
  }
  func.func @transform_3(%arg0: i32, %arg1: i32) -> (i32, i32, i32, i32) {
    %c0_i32 = arith.constant 0 : i32
    %c0_i32_0 = arith.constant 0 : i32
    %c0_i32_1 = arith.constant 0 : i32
    return %arg0, %arg1, %c0_i32, %c0_i32_0 : i32, i32, i32, i32
  }
}

module attributes {stable_mosaic.version = 11 : i64} {
  func.func @_mm_res_kernel(%arg0: i32, %arg1: i32, %arg2: i32, %arg3: memref<10x256xbf16, #tpu.memory_space<vmem>>, %arg4: memref<256x256xbf16, #tpu.memory_space<vmem>>, %arg5: memref<1x256xf32, #tpu.memory_space<vmem>>, %arg6: memref<10x256xbf16, #tpu.memory_space<vmem>>, %arg7: memref<10x256xbf16, #tpu.memory_space<vmem>>, %arg8: memref<10x256xf32, #tpu.memory_space<vmem>>) attributes {dimension_semantics = [#tpu.dimension_semantics<parallel>, #tpu.dimension_semantics<parallel>, #tpu.dimension_semantics<arbitrary>], iteration_bounds = array<i64: 1, 1, 1>, scalar_prefetch = 0 : i64, scratch_operands = 1 : i64, tpu.core_type = #tpu.core_type<tc>, window_params = [{transform_indices = @transform_0, window_bounds = array<i64: 10, 256>}, {transform_indices = @transform_1, window_bounds = array<i64: 256, 256>}, {transform_indices = @transform_2, window_bounds = array<i64: 1, 256>}, {transform_indices = @transform_3, window_bounds = array<i64: 10, 256>}, {transform_indices = @transform_4, window_bounds = array<i64: 10, 256>}]} {
    %c0_i32 = arith.constant 0 : i32
    %0 = arith.cmpi eq, %arg2, %c0_i32 : i32
    %1 = arith.extui %0 : i1 to i32
    %c0_i32_0 = arith.constant 0 : i32
    %2 = arith.cmpi ne, %1, %c0_i32_0 : i32
    scf.if %2 {
      %cst_10 = arith.constant 0.000000e+00 : f32
      %12 = vector.broadcast %cst_10 : f32 to vector<10x256xf32>
      %c0_11 = arith.constant 0 : index
      %c0_12 = arith.constant 0 : index
      %13 = vector.load %arg8[%c0_11, %c0_12] : memref<10x256xf32, #tpu.memory_space<vmem>>, vector<10x256xf32>
      tpu.vector_store %arg8[%c0_11, %c0_12], %12 {strides = array<i32>} : memref<10x256xf32, #tpu.memory_space<vmem>>, vector<10x256xf32>,
    } else {
    }
    %c0 = arith.constant 0 : index
    %c0_1 = arith.constant 0 : index
    %3 = vector.load %arg8[%c0, %c0_1] : memref<10x256xf32, #tpu.memory_space<vmem>>, vector<10x256xf32>
    %c0_2 = arith.constant 0 : index
    %c0_3 = arith.constant 0 : index
    %4 = vector.load %arg3[%c0_2, %c0_3] : memref<10x256xbf16, #tpu.memory_space<vmem>>, vector<10x256xbf16>
    %c0_4 = arith.constant 0 : index
    %c0_5 = arith.constant 0 : index
    %5 = vector.load %arg4[%c0_4, %c0_5] : memref<256x256xbf16, #tpu.memory_space<vmem>>, vector<256x256xbf16>
    %cst = arith.constant dense<0.000000e+00> : vector<10x256xf32>
    %6 = tpu.matmul %4, %5, %cst {dimension_numbers = #tpu.dot_dimension_numbers<[1], [0], [0], [1], [0, 0, 1, 1], [], []>} : vector<10x256xbf16>, vector<256x256xbf16>, vector<10x256xf32> -> vector<10x256xf32>
    %7 = arith.addf %3, %6 : vector<10x256xf32>
    %c0_6 = arith.constant 0 : index
    %c0_7 = arith.constant 0 : index
    %8 = vector.load %arg8[%c0_6, %c0_7] : memref<10x256xf32, #tpu.memory_space<vmem>>, vector<10x256xf32>
    tpu.vector_store %arg8[%c0_6, %c0_7], %7 {strides = array<i32>} : memref<10x256xf32, #tpu.memory_space<vmem>>, vector<10x256xf32>,
    %c0_i32_8 = arith.constant 0 : i32
    %9 = arith.cmpi eq, %arg2, %c0_i32_8 : i32
    %10 = arith.extui %9 : i1 to i32
    %c0_i32_9 = arith.constant 0 : i32
    %11 = arith.cmpi ne, %10, %c0_i32_9 : i32
    scf.if %11 {
      %c0_10 = arith.constant 0 : index
      %c0_11 = arith.constant 0 : index
      %12 = vector.load %arg8[%c0_10, %c0_11] : memref<10x256xf32, #tpu.memory_space<vmem>>, vector<10x256xf32>
      %c0_12 = arith.constant 0 : index
      %c0_13 = arith.constant 0 : index
      %13 = vector.load %arg5[%c0_12, %c0_13] : memref<1x256xf32, #tpu.memory_space<vmem>>, vector<1x256xf32>
      %14 = vector.broadcast %13 : vector<1x256xf32> to vector<10x256xf32>
      %15 = arith.addf %12, %14 : vector<10x256xf32>
      %c0_14 = arith.constant 0 : index
      %c0_15 = arith.constant 0 : index
      %16 = vector.load %arg6[%c0_14, %c0_15] : memref<10x256xbf16, #tpu.memory_space<vmem>>, vector<10x256xbf16>
      %17 = arith.extf %16 : vector<10x256xbf16> to vector<10x256xf32>
      %18 = arith.addf %15, %17 : vector<10x256xf32>
      %19 = arith.truncf %18 : vector<10x256xf32> to vector<10x256xbf16>
      %c0_16 = arith.constant 0 : index
      %c0_17 = arith.constant 0 : index
      %20 = vector.load %arg7[%c0_16, %c0_17] : memref<10x256xbf16, #tpu.memory_space<vmem>>, vector<10x256xbf16>
      tpu.vector_store %arg7[%c0_16, %c0_17], %19 {strides = array<i32>} : memref<10x256xbf16, #tpu.memory_space<vmem>>, vector<10x256xbf16>,
    } else {
    }
    return
  }
  func.func @transform_0(%arg0: i32, %arg1: i32, %arg2: i32) -> (i32, i32) {
    %c0_i32 = arith.constant 0 : i32
    return %arg0, %arg2 : i32, i32
  }
  func.func @transform_1(%arg0: i32, %arg1: i32, %arg2: i32) -> (i32, i32) {
    %c0_i32 = arith.constant 0 : i32
    return %arg2, %arg1 : i32, i32
  }
  func.func @transform_2(%arg0: i32, %arg1: i32, %arg2: i32) -> (i32, i32) {
    %c0_i32 = arith.constant 0 : i32
    %c0_i32_0 = arith.constant 0 : i32
    return %c0_i32, %arg1 : i32, i32
  }
  func.func @transform_3(%arg0: i32, %arg1: i32, %arg2: i32) -> (i32, i32) {
    %c0_i32 = arith.constant 0 : i32
    return %arg0, %arg1 : i32, i32
  }
  func.func @transform_4(%arg0: i32, %arg1: i32, %arg2: i32) -> (i32, i32) {
    %c0_i32 = arith.constant 0 : i32
    return %arg0, %arg1 : i32, i32
  }
}

module attributes {stable_mosaic.version = 11 : i64} {
  func.func @_mm_kernel(%arg0: i32, %arg1: i32, %arg2: i32, %arg3: memref<10x256xbf16, #tpu.memory_space<vmem>>, %arg4: memref<256x512xbf16, #tpu.memory_space<vmem>>, %arg5: memref<1x512xf32, #tpu.memory_space<vmem>>, %arg6: memref<10x512xbf16, #tpu.memory_space<vmem>>, %arg7: memref<10x512xf32, #tpu.memory_space<vmem>>) attributes {dimension_semantics = [#tpu.dimension_semantics<parallel>, #tpu.dimension_semantics<parallel>, #tpu.dimension_semantics<arbitrary>], iteration_bounds = array<i64: 1, 1, 1>, scalar_prefetch = 0 : i64, scratch_operands = 1 : i64, tpu.core_type = #tpu.core_type<tc>, window_params = [{transform_indices = @transform_0, window_bounds = array<i64: 10, 256>}, {transform_indices = @transform_1, window_bounds = array<i64: 256, 512>}, {transform_indices = @transform_2, window_bounds = array<i64: 1, 512>}, {transform_indices = @transform_3, window_bounds = array<i64: 10, 512>}]} {
    %c0_i32 = arith.constant 0 : i32
    %0 = arith.cmpi eq, %arg2, %c0_i32 : i32
    %1 = arith.extui %0 : i1 to i32
    %c0_i32_0 = arith.constant 0 : i32
    %2 = arith.cmpi ne, %1, %c0_i32_0 : i32
    scf.if %2 {
      %cst_10 = arith.constant 0.000000e+00 : f32
      %12 = vector.broadcast %cst_10 : f32 to vector<10x512xf32>
      %c0_11 = arith.constant 0 : index
      %c0_12 = arith.constant 0 : index
      %13 = vector.load %arg7[%c0_11, %c0_12] : memref<10x512xf32, #tpu.memory_space<vmem>>, vector<10x512xf32>
      tpu.vector_store %arg7[%c0_11, %c0_12], %12 {strides = array<i32>} : memref<10x512xf32, #tpu.memory_space<vmem>>, vector<10x512xf32>,
    } else {
    }
    %c0 = arith.constant 0 : index
    %c0_1 = arith.constant 0 : index
    %3 = vector.load %arg7[%c0, %c0_1] : memref<10x512xf32, #tpu.memory_space<vmem>>, vector<10x512xf32>
    %c0_2 = arith.constant 0 : index
    %c0_3 = arith.constant 0 : index
    %4 = vector.load %arg3[%c0_2, %c0_3] : memref<10x256xbf16, #tpu.memory_space<vmem>>, vector<10x256xbf16>
    %c0_4 = arith.constant 0 : index
    %c0_5 = arith.constant 0 : index
    %5 = vector.load %arg4[%c0_4, %c0_5] : memref<256x512xbf16, #tpu.memory_space<vmem>>, vector<256x512xbf16>
    %cst = arith.constant dense<0.000000e+00> : vector<10x512xf32>
    %6 = tpu.matmul %4, %5, %cst {dimension_numbers = #tpu.dot_dimension_numbers<[1], [0], [0], [1], [0, 0, 1, 1], [], []>} : vector<10x256xbf16>, vector<256x512xbf16>, vector<10x512xf32> -> vector<10x512xf32>
    %7 = arith.addf %3, %6 : vector<10x512xf32>
    %c0_6 = arith.constant 0 : index
    %c0_7 = arith.constant 0 : index
    %8 = vector.load %arg7[%c0_6, %c0_7] : memref<10x512xf32, #tpu.memory_space<vmem>>, vector<10x512xf32>
    tpu.vector_store %arg7[%c0_6, %c0_7], %7 {strides = array<i32>} : memref<10x512xf32, #tpu.memory_space<vmem>>, vector<10x512xf32>,
    %c0_i32_8 = arith.constant 0 : i32
    %9 = arith.cmpi eq, %arg2, %c0_i32_8 : i32
    %10 = arith.extui %9 : i1 to i32
    %c0_i32_9 = arith.constant 0 : i32
    %11 = arith.cmpi ne, %10, %c0_i32_9 : i32
    scf.if %11 {
      %c0_10 = arith.constant 0 : index
      %c0_11 = arith.constant 0 : index
      %12 = vector.load %arg7[%c0_10, %c0_11] : memref<10x512xf32, #tpu.memory_space<vmem>>, vector<10x512xf32>
      %c0_12 = arith.constant 0 : index
      %c0_13 = arith.constant 0 : index
      %13 = vector.load %arg5[%c0_12, %c0_13] : memref<1x512xf32, #tpu.memory_space<vmem>>, vector<1x512xf32>
      %14 = vector.broadcast %13 : vector<1x512xf32> to vector<10x512xf32>
      %15 = arith.addf %12, %14 : vector<10x512xf32>
      %cst_14 = arith.constant 5.000000e-01 : f32
      %16 = vector.broadcast %cst_14 : f32 to vector<10x512xf32>
      %17 = arith.mulf %16, %15 : vector<10x512xf32>
      %cst_15 = arith.constant 4.471500e-02 : f32
      %18 = vector.broadcast %cst_15 : f32 to vector<10x512xf32>
      %19 = arith.mulf %18, %15 : vector<10x512xf32>
      %20 = arith.mulf %19, %15 : vector<10x512xf32>
      %21 = arith.mulf %20, %15 : vector<10x512xf32>
      %22 = arith.addf %15, %21 : vector<10x512xf32>
      %cst_16 = arith.constant 0.797884583 : f32
      %23 = vector.broadcast %cst_16 : f32 to vector<10x512xf32>
      %24 = arith.mulf %23, %22 : vector<10x512xf32>
      %25 = math.tanh %24 : vector<10x512xf32>
      %cst_17 = arith.constant 1.000000e+00 : f32
      %26 = vector.broadcast %cst_17 : f32 to vector<10x512xf32>
      %27 = arith.addf %26, %25 : vector<10x512xf32>
      %28 = arith.mulf %17, %27 : vector<10x512xf32>
      %29 = arith.truncf %28 : vector<10x512xf32> to vector<10x512xbf16>
      %c0_18 = arith.constant 0 : index
      %c0_19 = arith.constant 0 : index
      %30 = vector.load %arg6[%c0_18, %c0_19] : memref<10x512xbf16, #tpu.memory_space<vmem>>, vector<10x512xbf16>
      tpu.vector_store %arg6[%c0_18, %c0_19], %29 {strides = array<i32>} : memref<10x512xbf16, #tpu.memory_space<vmem>>, vector<10x512xbf16>,
    } else {
    }
    return
  }
  func.func @transform_0(%arg0: i32, %arg1: i32, %arg2: i32) -> (i32, i32) {
    %c0_i32 = arith.constant 0 : i32
    return %arg0, %arg2 : i32, i32
  }
  func.func @transform_1(%arg0: i32, %arg1: i32, %arg2: i32) -> (i32, i32) {
    %c0_i32 = arith.constant 0 : i32
    return %arg2, %arg1 : i32, i32
  }
  func.func @transform_2(%arg0: i32, %arg1: i32, %arg2: i32) -> (i32, i32) {
    %c0_i32 = arith.constant 0 : i32
    %c0_i32_0 = arith.constant 0 : i32
    return %c0_i32, %arg1 : i32, i32
  }
  func.func @transform_3(%arg0: i32, %arg1: i32, %arg2: i32) -> (i32, i32) {
    %c0_i32 = arith.constant 0 : i32
    return %arg0, %arg1 : i32, i32
  }
}

module attributes {stable_mosaic.version = 11 : i64} {
  func.func @_mm_res_kernel(%arg0: i32, %arg1: i32, %arg2: i32, %arg3: memref<10x512xbf16, #tpu.memory_space<vmem>>, %arg4: memref<512x256xbf16, #tpu.memory_space<vmem>>, %arg5: memref<1x256xf32, #tpu.memory_space<vmem>>, %arg6: memref<10x256xbf16, #tpu.memory_space<vmem>>, %arg7: memref<10x256xbf16, #tpu.memory_space<vmem>>, %arg8: memref<10x256xf32, #tpu.memory_space<vmem>>) attributes {dimension_semantics = [#tpu.dimension_semantics<parallel>, #tpu.dimension_semantics<parallel>, #tpu.dimension_semantics<arbitrary>], iteration_bounds = array<i64: 1, 1, 1>, scalar_prefetch = 0 : i64, scratch_operands = 1 : i64, tpu.core_type = #tpu.core_type<tc>, window_params = [{transform_indices = @transform_0, window_bounds = array<i64: 10, 512>}, {transform_indices = @transform_1, window_bounds = array<i64: 512, 256>}, {transform_indices = @transform_2, window_bounds = array<i64: 1, 256>}, {transform_indices = @transform_3, window_bounds = array<i64: 10, 256>}, {transform_indices = @transform_4, window_bounds = array<i64: 10, 256>}]} {
    %c0_i32 = arith.constant 0 : i32
    %0 = arith.cmpi eq, %arg2, %c0_i32 : i32
    %1 = arith.extui %0 : i1 to i32
    %c0_i32_0 = arith.constant 0 : i32
    %2 = arith.cmpi ne, %1, %c0_i32_0 : i32
    scf.if %2 {
      %cst_10 = arith.constant 0.000000e+00 : f32
      %12 = vector.broadcast %cst_10 : f32 to vector<10x256xf32>
      %c0_11 = arith.constant 0 : index
      %c0_12 = arith.constant 0 : index
      %13 = vector.load %arg8[%c0_11, %c0_12] : memref<10x256xf32, #tpu.memory_space<vmem>>, vector<10x256xf32>
      tpu.vector_store %arg8[%c0_11, %c0_12], %12 {strides = array<i32>} : memref<10x256xf32, #tpu.memory_space<vmem>>, vector<10x256xf32>,
    } else {
    }
    %c0 = arith.constant 0 : index
    %c0_1 = arith.constant 0 : index
    %3 = vector.load %arg8[%c0, %c0_1] : memref<10x256xf32, #tpu.memory_space<vmem>>, vector<10x256xf32>
    %c0_2 = arith.constant 0 : index
    %c0_3 = arith.constant 0 : index
    %4 = vector.load %arg3[%c0_2, %c0_3] : memref<10x512xbf16, #tpu.memory_space<vmem>>, vector<10x512xbf16>
    %c0_4 = arith.constant 0 : index
    %c0_5 = arith.constant 0 : index
    %5 = vector.load %arg4[%c0_4, %c0_5] : memref<512x256xbf16, #tpu.memory_space<vmem>>, vector<512x256xbf16>
    %cst = arith.constant dense<0.000000e+00> : vector<10x256xf32>
    %6 = tpu.matmul %4, %5, %cst {dimension_numbers = #tpu.dot_dimension_numbers<[1], [0], [0], [1], [0, 0, 1, 1], [], []>} : vector<10x512xbf16>, vector<512x256xbf16>, vector<10x256xf32> -> vector<10x256xf32>
    %7 = arith.addf %3, %6 : vector<10x256xf32>
    %c0_6 = arith.constant 0 : index
    %c0_7 = arith.constant 0 : index
    %8 = vector.load %arg8[%c0_6, %c0_7] : memref<10x256xf32, #tpu.memory_space<vmem>>, vector<10x256xf32>
    tpu.vector_store %arg8[%c0_6, %c0_7], %7 {strides = array<i32>} : memref<10x256xf32, #tpu.memory_space<vmem>>, vector<10x256xf32>,
    %c0_i32_8 = arith.constant 0 : i32
    %9 = arith.cmpi eq, %arg2, %c0_i32_8 : i32
    %10 = arith.extui %9 : i1 to i32
    %c0_i32_9 = arith.constant 0 : i32
    %11 = arith.cmpi ne, %10, %c0_i32_9 : i32
    scf.if %11 {
      %c0_10 = arith.constant 0 : index
      %c0_11 = arith.constant 0 : index
      %12 = vector.load %arg8[%c0_10, %c0_11] : memref<10x256xf32, #tpu.memory_space<vmem>>, vector<10x256xf32>
      %c0_12 = arith.constant 0 : index
      %c0_13 = arith.constant 0 : index
      %13 = vector.load %arg5[%c0_12, %c0_13] : memref<1x256xf32, #tpu.memory_space<vmem>>, vector<1x256xf32>
      %14 = vector.broadcast %13 : vector<1x256xf32> to vector<10x256xf32>
      %15 = arith.addf %12, %14 : vector<10x256xf32>
      %c0_14 = arith.constant 0 : index
      %c0_15 = arith.constant 0 : index
      %16 = vector.load %arg6[%c0_14, %c0_15] : memref<10x256xbf16, #tpu.memory_space<vmem>>, vector<10x256xbf16>
      %17 = arith.extf %16 : vector<10x256xbf16> to vector<10x256xf32>
      %18 = arith.addf %15, %17 : vector<10x256xf32>
      %19 = arith.truncf %18 : vector<10x256xf32> to vector<10x256xbf16>
      %c0_16 = arith.constant 0 : index
      %c0_17 = arith.constant 0 : index
      %20 = vector.load %arg7[%c0_16, %c0_17] : memref<10x256xbf16, #tpu.memory_space<vmem>>, vector<10x256xbf16>
      tpu.vector_store %arg7[%c0_16, %c0_17], %19 {strides = array<i32>} : memref<10x256xbf16, #tpu.memory_space<vmem>>, vector<10x256xbf16>,
    } else {
    }
    return
  }
  func.func @transform_0(%arg0: i32, %arg1: i32, %arg2: i32) -> (i32, i32) {
    %c0_i32 = arith.constant 0 : i32
    return %arg0, %arg2 : i32, i32
  }
  func.func @transform_1(%arg0: i32, %arg1: i32, %arg2: i32) -> (i32, i32) {
    %c0_i32 = arith.constant 0 : i32
    return %arg2, %arg1 : i32, i32
  }
  func.func @transform_2(%arg0: i32, %arg1: i32, %arg2: i32) -> (i32, i32) {
    %c0_i32 = arith.constant 0 : i32
    %c0_i32_0 = arith.constant 0 : i32
    return %c0_i32, %arg1 : i32, i32
  }
  func.func @transform_3(%arg0: i32, %arg1: i32, %arg2: i32) -> (i32, i32) {
    %c0_i32 = arith.constant 0 : i32
    return %arg0, %arg1 : i32, i32
  }
  func.func @transform_4(%arg0: i32, %arg1: i32, %arg2: i32) -> (i32, i32) {
    %c0_i32 = arith.constant 0 : i32
    return %arg0, %arg1 : i32, i32
  }
}

module attributes {stable_mosaic.version = 11 : i64} {
  func.func @_ln_kernel(%arg0: i32, %arg1: memref<10x256xbf16, #tpu.memory_space<vmem>>, %arg2: memref<1x256xf32, #tpu.memory_space<vmem>>, %arg3: memref<1x256xf32, #tpu.memory_space<vmem>>, %arg4: memref<10x256xf32, #tpu.memory_space<vmem>>) attributes {dimension_semantics = [#tpu.dimension_semantics<parallel>], iteration_bounds = array<i64: 1>, scalar_prefetch = 0 : i64, scratch_operands = 0 : i64, tpu.core_type = #tpu.core_type<tc>, window_params = [{transform_indices = @transform_0, window_bounds = array<i64: 10, 256>}, {pipeline_mode = #tpu.pipeline_mode<synchronous>, transform_indices = @transform_1, window_bounds = array<i64: 1, 256>}, {pipeline_mode = #tpu.pipeline_mode<synchronous>, transform_indices = @transform_2, window_bounds = array<i64: 1, 256>}, {transform_indices = @transform_3, window_bounds = array<i64: 10, 256>}]} {
    %c0 = arith.constant 0 : index
    %c0_0 = arith.constant 0 : index
    %0 = vector.load %arg1[%c0, %c0_0] : memref<10x256xbf16, #tpu.memory_space<vmem>>, vector<10x256xbf16>
    %1 = arith.extf %0 : vector<10x256xbf16> to vector<10x256xf32>
    %cst = arith.constant dense<0.000000e+00> : vector<10xf32>
    %2 = vector.multi_reduction <add>, %1, %cst [1] : vector<10x256xf32> to vector<10xf32>
    %3 = vector.shape_cast %2 : vector<10xf32> to vector<10x1xf32>
    %cst_1 = arith.constant 2.560000e+02 : f32
    %4 = vector.broadcast %cst_1 : f32 to vector<10x1xf32>
    %5 = arith.divf %3, %4 : vector<10x1xf32>
    %6 = vector.broadcast %5 : vector<10x1xf32> to vector<10x256xf32>
    %7 = arith.subf %1, %6 : vector<10x256xf32>
    %8 = arith.mulf %7, %7 : vector<10x256xf32>
    %cst_2 = arith.constant dense<0.000000e+00> : vector<10xf32>
    %9 = vector.multi_reduction <add>, %8, %cst_2 [1] : vector<10x256xf32> to vector<10xf32>
    %10 = vector.shape_cast %9 : vector<10xf32> to vector<10x1xf32>
    %cst_3 = arith.constant 2.560000e+02 : f32
    %11 = vector.broadcast %cst_3 : f32 to vector<10x1xf32>
    %12 = arith.divf %10, %11 : vector<10x1xf32>
    %cst_4 = arith.constant 9.99999996E-13 : f32
    %13 = vector.broadcast %cst_4 : f32 to vector<10x1xf32>
    %14 = arith.addf %12, %13 : vector<10x1xf32>
    %15 = math.rsqrt %14 : vector<10x1xf32>
    %16 = vector.broadcast %15 : vector<10x1xf32> to vector<10x256xf32>
    %17 = arith.mulf %7, %16 : vector<10x256xf32>
    %c0_5 = arith.constant 0 : index
    %c0_6 = arith.constant 0 : index
    %18 = vector.load %arg2[%c0_5, %c0_6] : memref<1x256xf32, #tpu.memory_space<vmem>>, vector<1x256xf32>
    %19 = vector.broadcast %18 : vector<1x256xf32> to vector<10x256xf32>
    %20 = arith.mulf %17, %19 : vector<10x256xf32>
    %c0_7 = arith.constant 0 : index
    %c0_8 = arith.constant 0 : index
    %21 = vector.load %arg3[%c0_7, %c0_8] : memref<1x256xf32, #tpu.memory_space<vmem>>, vector<1x256xf32>
    %22 = vector.broadcast %21 : vector<1x256xf32> to vector<10x256xf32>
    %23 = arith.addf %20, %22 : vector<10x256xf32>
    %c0_9 = arith.constant 0 : index
    %c0_10 = arith.constant 0 : index
    %24 = vector.load %arg4[%c0_9, %c0_10] : memref<10x256xf32, #tpu.memory_space<vmem>>, vector<10x256xf32>
    tpu.vector_store %arg4[%c0_9, %c0_10], %23 {strides = array<i32>} : memref<10x256xf32, #tpu.memory_space<vmem>>, vector<10x256xf32>,
    return
  }
  func.func @transform_0(%arg0: i32) -> (i32, i32) {
    %c0_i32 = arith.constant 0 : i32
    %c0_i32_0 = arith.constant 0 : i32
    return %arg0, %c0_i32 : i32, i32
  }
  func.func @transform_1(%arg0: i32) -> (i32, i32) {
    %c0_i32 = arith.constant 0 : i32
    %c0_i32_0 = arith.constant 0 : i32
    %c0_i32_1 = arith.constant 0 : i32
    return %c0_i32, %c0_i32_0 : i32, i32
  }
  func.func @transform_2(%arg0: i32) -> (i32, i32) {
    %c0_i32 = arith.constant 0 : i32
    %c0_i32_0 = arith.constant 0 : i32
    %c0_i32_1 = arith.constant 0 : i32
    return %c0_i32, %c0_i32_0 : i32, i32
  }
  func.func @transform_3(%arg0: i32) -> (i32, i32) {
    %c0_i32 = arith.constant 0 : i32
    %c0_i32_0 = arith.constant 0 : i32
    return %arg0, %c0_i32 : i32, i32
  }
}

</mosaic_0001>

<bundles_post_ra>
// kernel: _forward.17
= control target key start
LH: loop header
LB: loop body
LE: loop exit
PB: predicated region body
PF: predicated region fallthrough
CT: control target
= control target key end

     0   :  { %vm23_vm0 = vcmask 1041408   ;;  %v60_v28 = vlaneseq  ;;  %s158_s0 = inlined_call_operand.vmem [shape: bf16[10,256], index: 0, kind: input, shape index: {}]   ;;  %s159_s1 = inlined_call_operand.vmem [shape: f32[1,256], index: 1, kind: input, shape index: {}]   ;;  %s160_s2 = inlined_call_operand.vmem [shape: f32[1,256], index: 2, kind: input, shape index: {}]   ;;  %s161_s3 = inlined_call_operand.vmem [shape: bf16[10,256], index: 3, kind: output, shape index: {}]  }
   0x1   :  { %v15_v0 = vld [vmem:[%s158_s0 + $0x8] sm:$0x11]  ;;  %v14_v1 = vld [vmem:[%s158_s0] sm:$0xff] }
   0x2   :  { %v18_v2 = vunpack.c.l.bf16 %v15_v0  ;;  %v19_v3 = vunpack.c.h.bf16 %v15_v0  ;;  %v16_v4 = vunpack.c.l.bf16 %v14_v1  ;;  %v17_v5 = vunpack.c.h.bf16 %v14_v1  ;;  %v58_v36 = vld [vmem:[%s159_s1] sm:$0x3] }
   0x3   :  { %v61_v32 = vshrl.u32 %v60_v28, 7  ;;  %v74_v37 = vld [vmem:[%s160_s2] sm:$0x3] }
   0x4   :  { %v24_v6 = vsel %vm23_vm0, %v18_v2, 0.0  ;;  %v25_v7 = vsel %vm23_vm0, %v19_v3, 0.0  ;;  %v20_v9 = vadd.f32 %v17_v5, %v16_v4 }
   0x5   :  { %v26_v8 = vadd.f32 %v25_v7, %v24_v6  ;;  %v62_v34 = vsub.s32 0, %v61_v32  ;;  %v66_v35 = vsub.s32 1, %v61_v32 }
   0x7   :  { %27 = vadd.xlane.f32.xlu0 %v26_v8  ;;  %v63_v38 = vrot.slane %v58_v36, %v62_v34  ;;  %v67_v39 = vrot.slane %v58_v36, %v66_v35  ;;  %v79_v41 = vrot.slane %v74_v37, %v62_v34  ;;  %v83_v42 = vrot.slane %v74_v37, %v66_v35 }
   0xb   :  { %21 = vadd.xlane.f32.xlu0 %v20_v9 }
  0x94   :  { %v28_v10 = vpop.xlane.xlu0 %27 }
  0x95   :  { %v31_v11 = vmul.f32 0.00390625, %v28_v10 }
  0x97   :  { %v34_v12 = vsub.f32 %v18_v2, %v31_v11  ;;  %v35_v13 = vsub.f32 %v19_v3, %v31_v11 }
  0x98   :  { %v22_v14 = vpop.xlane.xlu0 %21 }
  0x99   :  { %v30_v15 = vmul.f32 0.00390625, %v22_v14  ;;  %v38_v18 = vmul.f32 %v34_v12, %v34_v12  ;;  %v39_v19 = vmul.f32 %v35_v13, %v35_v13 }
  0x9b   :  { %v32_v16 = vsub.f32 %v16_v4, %v30_v15  ;;  %v33_v17 = vsub.f32 %v17_v5, %v30_v15  ;;  %v43_v23 = vsel %vm23_vm0, %v38_v18, 0.0  ;;  %v44_v24 = vsel %vm23_vm0, %v39_v19, 0.0 }
  0x9c   :  { %v45_v25 = vadd.f32 %v44_v24, %v43_v23 }
  0x9d   :  { %v36_v20 = vmul.f32 %v32_v16, %v32_v16  ;;  %v37_v21 = vmul.f32 %v33_v17, %v33_v17 }
  0x9f   :  { %v40_v22 = vadd.f32 %v37_v21, %v36_v20 }
  0xa1   :  { %41 = vadd.xlane.f32.xlu1 %v40_v22 }
  0xa5   :  { %46 = vadd.xlane.f32.xlu1 %v45_v25 }
 0x12e   :  { %v42_v26 = vpop.xlane.xlu1 %41 }
 0x12f   :  { %v48_v27 = vmul.f32 0.00390625, %v42_v26 }
 0x131   :  { %v50_v29 = vadd.f32 1e-12, %v48_v27 }
 0x132   :  { %v47_v30 = vpop.xlane.xlu1 %46 }
 0x133   :  { %112 = vrsqrt.f32 %v50_v29  ;;  %v49_v31 = vmul.f32 0.00390625, %v47_v30 }
 0x135   :  { %v51_v33 = vadd.f32 1e-12, %v49_v31 }
 0x137   :  { %114 = vrsqrt.f32 %v51_v33 }
 0x13d   :  { %v113_v40 = vpop.eup %112 }
 0x13e   :  { %v54_v43 = vmul.f32 %v113_v40, %v32_v16  ;;  %v55_v44 = vmul.f32 %v113_v40, %v33_v17 }
 0x140   :  { %v70_v45 = vmul.f32 %v63_v38, %v54_v43  ;;  %v71_v46 = vmul.f32 %v67_v39, %v55_v44 }
 0x141   :  { %v115_v47 = vpop.eup %114 }
 0x142   :  { %v86_v48 = vadd.f32 %v79_v41, %v70_v45  ;;  %v87_v49 = vadd.f32 %v83_v42, %v71_v46  ;;  %v56_v50 = vmul.f32 %v115_v47, %v34_v12  ;;  %v57_v51 = vmul.f32 %v115_v47, %v35_v13 }
 0x144   :  { %v110_v52 = vpack.c.bf16 %v87_v49, %v86_v48  ;;  %v72_v53 = vmul.f32 %v63_v38, %v56_v50  ;;  %v73_v54 = vmul.f32 %v67_v39, %v57_v51 }
 0x146   :  { %102 = vst [vmem:[%s161_s3] sm:$0xff] %v110_v52  ;;  %v88_v55 = vadd.f32 %v79_v41, %v72_v53  ;;  %v89_v56 = vadd.f32 %v83_v42, %v73_v54 }
 0x148   :  { %v111_v57 = vpack.c.bf16 %v89_v56, %v88_v55 }
 0x14a   :  { %103 = vst [vmem:[%s161_s3 + $0x8] sm:$0x11] %v111_v57 }

// kernel: _forward.16
= control target key start
LH: loop header
LB: loop body
LE: loop exit
PB: predicated region body
PF: predicated region fallthrough
CT: control target
= control target key end

     0   :  { %s1034_s12 = smov 0   ;;  %s1036_s13 = smov 0   ;;  %s1133_s0 = inlined_call_operand.vmem [shape: bf16[8,768], index: 0, kind: input, shape index: {}]   ;;  %s1134_s1 = inlined_call_operand.vmem [shape: bf16[768,256], index: 1, kind: input, shape index: {}]   ;;  %s1135_s2 = inlined_call_operand.vmem [shape: f32[1,256], index: 2, kind: input, shape index: {}]   ;;  %s1136_s3 = inlined_call_operand.vmem [shape: bf16[8,256], index: 3, kind: output, shape index: {}]  }
   0x1   :  { %s1038_s14 = smov 0  }
   0x2 LB: > { %s25_s15 = sadd.s32 1, %s1006_s13  ;;  %p823_p0 = scmp.ge.s32.totalorder %s1010_s14, 1  ;;  %s1010_s14 = sphi %s1038_s14, %s13_s14   ;;  %s1006_s13 = sphi %s1036_s13, %s1138_s13   ;;  %s1002_s12 = sphi %s1034_s12, %s1137_s12  }
   0x3   : > { %p26_p1 = scmp.ge.s32.totalorder %s25_s15, 2  ;;  %p194_p2 = scmp.lt.s32.totalorder %s1010_s14, 3 }
   0x5   : > { %s1140_s15 = smov (%p26_p1, %s25_s15), 0  ;;  %p195_p3 = pnand %p823_p0, %p194_p2 }
   0x6   : > { %s240_s16 = smul.u32 (!%p195_p3), 3, %s1002_s12  ;;  %p827_p6 = scmp.ne.s32.totalorder (!%p195_p3), %s1002_s12, 0 }
   0x7   : > { %198 = sbr.rel (%p195_p3) target bundleno = 319 (0x13f), region = 32 }
   0x8   : > { %s250_s17 = smul.u32 (!%p195_p3), 48, %s1002_s12  ;;  %p243_p4 = scmp.lt.s32.totalorder (!%p195_p3), %s240_s16, 5 }
   0xa   : > { %p252_p5 = scmp.lt.s32.totalorder (!%p195_p3), %s250_s17, 95 }
   0xe   : > { %s1142_s16 = smov (!%p243_p4, %s240_s16), 5  ;;  %s1144_s17 = smov (!%p252_p5, %s250_s17), 95 }
   0xf   : > { %s824_s18 = sshll.u32 %s1142_s16, 2  ;;  %s885_s22 = sshll.u32 %s1144_s17, 3  ;;  %v1012_v0 = vmov (!%p827_p6), 0.0  }
  0x10   : > { %s1059_s21 = scalar_lea.vmem %s1133_s0, %s824_s18  ;;  %s1064_s25 = scalar_lea.vmem %s1134_s1, %s885_s22  ;;  %282 = vst [vmem:[#allocation2] sm:$0xff] (!%p827_p6), %v1012_v0  ;;  %283 = vst [vmem:[#allocation2 + $0x8] sm:$0xff] (!%p827_p6), %v1012_v0 }
  0x11   : > { %281 = sbr.rel (%p827_p6) target bundleno = 24 (0x18), region = 36 }
  0x18 PF: > { %v913_v1 = vld [vmem:[%s1064_s25 + $0x4] ss:$8 sps:$4 sm:$0xff]   ;;  %v915_v2 = vld [vmem:[%s1064_s25] ss:$8 sps:$4 sm:$0xff]   ;;  %v1013_v3 = vmov 0   ;;  %p879_p7 = scmp.ne.s32.totalorder %s1002_s12, 1 }
  0x19   : > { %660 = vmatprep.mubr.bf16.mxu1 %v1013_v3  ;;  %587 = vmatprep.subr.bf16.mxu0 %v913_v1  ;;  %v916_v4 = vld [vmem:[%s1064_s25 + $0x14] ss:$8 sps:$4 sm:$0xff]   ;;  %v918_v5 = vld [vmem:[%s1064_s25 + $0x10] ss:$8 sps:$4 sm:$0xff]   ;;  %v919_v6 = vld [vmem:[%s1064_s25 + $0x24] ss:$8 sps:$4 sm:$0xff]  }
  0x1a   : > { %588 = vmatpush1.bf16.msra.mxu0 %v915_v2  ;;  %v921_v7 = vld [vmem:[%s1064_s25 + $0x20] ss:$8 sps:$4 sm:$0xff]   ;;  %v922_v8 = vld [vmem:[%s1064_s25 + $0x34] ss:$8 sps:$4 sm:$0xff]   ;;  %v924_v9 = vld [vmem:[%s1064_s25 + $0x30] ss:$8 sps:$4 sm:$0xff]  }
  0x1b   : > { %589 = vmatprep.subr.bf16.mxu0 %v916_v4  ;;  %v937_v10 = vld [vmem:[%s1064_s25 + $0x104] ss:$8 sps:$4 sm:$0xff]   ;;  %v939_v11 = vld [vmem:[%s1064_s25 + $0x100] ss:$8 sps:$4 sm:$0xff]   ;;  %v943_v13 = vld [vmem:[%s1064_s25 + $0x114] ss:$8 sps:$4 sm:$0xff]   ;;  %v681_v4 = vlaneseq (!%p879_p7) }
  0x1c   : > { %v925_v12 = vld [vmem:[%s1064_s25 + $0x44] ss:$8 sps:$4 sm:$0xff]   ;;  %628 = vmatprep.subr.bf16.mxu1 %v937_v10  ;;  %v945_v14 = vld [vmem:[%s1064_s25 + $0x110] ss:$8 sps:$4 sm:$0xff]   ;;  %v927_v15 = vld [vmem:[%s1064_s25 + $0x40] ss:$8 sps:$4 sm:$0xff]  }
  0x1d   : > { %629 = vmatpush1.bf16.msra.mxu1 %v939_v11  ;;  %v928_v16 = vld [vmem:[%s1064_s25 + $0x54] ss:$8 sps:$4 sm:$0xff]   ;;  %v949_v17 = vld [vmem:[%s1064_s25 + $0x124] ss:$8 sps:$4 sm:$0xff]   ;;  %v951_v18 = vld [vmem:[%s1064_s25 + $0x120] ss:$8 sps:$4 sm:$0xff]  }
  0x1e   : > { %590 = vmatpush1.bf16.msra.mxu0 %v918_v5  ;;  %630 = vmatprep.subr.bf16.mxu1 %v943_v13  ;;  %v930_v19 = vld [vmem:[%s1064_s25 + $0x50] ss:$8 sps:$4 sm:$0xff]   ;;  %v955_v20 = vld [vmem:[%s1064_s25 + $0x134] ss:$8 sps:$4 sm:$0xff]   ;;  %v931_v21 = vld [vmem:[%s1064_s25 + $0x64] ss:$8 sps:$4 sm:$0xff]  }
  0x1f   : > { %591 = vmatprep.subr.bf16.mxu0 %v919_v6  ;;  %v957_v22 = vld [vmem:[%s1064_s25 + $0x130] ss:$8 sps:$4 sm:$0xff]   ;;  %v933_v23 = vld [vmem:[%s1064_s25 + $0x60] ss:$8 sps:$4 sm:$0xff]   ;;  %v961_v24 = vld [vmem:[%s1064_s25 + $0x144] ss:$8 sps:$4 sm:$0xff]  }
  0x20   : > { %v934_v25 = vld [vmem:[%s1064_s25 + $0x74] ss:$8 sps:$4 sm:$0xff]   ;;  %v963_v26 = vld [vmem:[%s1064_s25 + $0x140] ss:$8 sps:$4 sm:$0xff]   ;;  %v936_v27 = vld [vmem:[%s1064_s25 + $0x70] ss:$8 sps:$4 sm:$0xff]  }
  0x21   : > { %631 = vmatpush1.bf16.msra.mxu1 %v945_v14  ;;  %v967_v28 = vld [vmem:[%s1064_s25 + $0x154] ss:$8 sps:$4 sm:$0xff]   ;;  %v940_v29 = vld [vmem:[%s1064_s25 + $0x84] ss:$8 sps:$4 sm:$0xff]   ;;  %v969_v30 = vld [vmem:[%s1064_s25 + $0x150] ss:$8 sps:$4 sm:$0xff]  }
  0x22   : > { %592 = vmatpush1.bf16.msra.mxu0 %v921_v7  ;;  %632 = vmatprep.subr.bf16.mxu1 %v949_v17  ;;  %v942_v31 = vld [vmem:[%s1064_s25 + $0x80] ss:$8 sps:$4 sm:$0xff]   ;;  %v973_v32 = vld [vmem:[%s1064_s25 + $0x164] ss:$8 sps:$4 sm:$0xff]   ;;  %v946_v33 = vld [vmem:[%s1064_s25 + $0x94] ss:$8 sps:$4 sm:$0xff]  }
  0x23   : > { %593 = vmatprep.subr.bf16.mxu0 %v922_v8  ;;  %v286_v34 = vld [vmem:[%s1059_s21] sm:$0xff]  ;;  %v948_v37 = vld [vmem:[%s1064_s25 + $0x90] ss:$8 sps:$4 sm:$0xff]   ;;  %v979_v38 = vld [vmem:[%s1064_s25 + $0x174] ss:$8 sps:$4 sm:$0xff]   ;;  %v682_v5 = vshrl.u32 (!%p879_p7), %v681_v4, 7 }
  0x24   : > { %v829_v35 = vcombine.high %v286_v34, %v286_v34  ;;  %v975_v36 = vld [vmem:[%s1064_s25 + $0x160] ss:$8 sps:$4 sm:$0xff]   ;;  %v952_v39 = vld [vmem:[%s1064_s25 + $0xa4] ss:$8 sps:$4 sm:$0xff]   ;;  %v981_v40 = vld [vmem:[%s1064_s25 + $0x170] ss:$8 sps:$4 sm:$0xff]   ;;  %v828_v53 = vcombine.low %v286_v34, %v286_v34 }
  0x25   : > { %633 = vmatpush1.bf16.msra.mxu1 %v951_v18  ;;  %v954_v41 = vld [vmem:[%s1064_s25 + $0xa0] ss:$8 sps:$4 sm:$0xff]   ;;  %v958_v42 = vld [vmem:[%s1064_s25 + $0xb4] ss:$8 sps:$4 sm:$0xff]   ;;  %v960_v44 = vld [vmem:[%s1064_s25 + $0xb0] ss:$8 sps:$4 sm:$0xff]  }
  0x26   : > { %594 = vmatpush1.bf16.msra.mxu0 %v924_v9  ;;  %634 = vmatprep.subr.bf16.mxu1 %v955_v20  ;;  %v985_v43 = vld [vmem:[%s1059_s21 + $0x8] ss:$0 sps:$4 sm:$0xff]   ;;  %v964_v45 = vld [vmem:[%s1064_s25 + $0xc4] ss:$8 sps:$4 sm:$0xff]   ;;  %v970_v47 = vld [vmem:[%s1064_s25 + $0xd4] ss:$8 sps:$4 sm:$0xff]  }
  0x27   : > { %595 = vmatprep.subr.bf16.mxu0 %v925_v12  ;;  %619 = vmatprep.mubr.bf16.mxu0 %v829_v35  ;;  %v966_v46 = vld [vmem:[%s1064_s25 + $0xc0] ss:$8 sps:$4 sm:$0xff]   ;;  %v972_v48 = vld [vmem:[%s1064_s25 + $0xd0] ss:$8 sps:$4 sm:$0xff]   ;;  %v976_v49 = vld [vmem:[%s1064_s25 + $0xe4] ss:$8 sps:$4 sm:$0xff]  }
  0x28   : > { %v978_v50 = vld [vmem:[%s1064_s25 + $0xe0] ss:$8 sps:$4 sm:$0xff]   ;;  %v982_v51 = vld [vmem:[%s1064_s25 + $0xf4] ss:$8 sps:$4 sm:$0xff]   ;;  %v984_v52 = vld [vmem:[%s1064_s25 + $0xf0] ss:$8 sps:$4 sm:$0xff]  }
  0x29   : > { %635 = vmatpush1.bf16.msra.mxu1 %v957_v22  ;;  %v284_v58 = vld [vmem:[#allocation2] sm:$0xff]  ;;  %v285_v61 = vld [vmem:[#allocation2 + $0x8] sm:$0xff]  ;;  %v683_v7 = vsub.s32 (!%p879_p7), 0, %v682_v5  ;;  %v687_v8 = vsub.s32 (!%p879_p7), 1, %v682_v5 }
  0x2a   : > { %596 = vmatpush1.bf16.msra.mxu0 %v927_v15  ;;  %636 = vmatprep.subr.bf16.mxu1 %v961_v24  ;;  %v679_v6 = vld [vmem:[%s1135_s2] sm:$0x3] (!%p879_p7) }
  0x2b   : > { %597 = vmatprep.subr.bf16.mxu0 %v928_v16  ;;  %v684_v11 = vrot.slane (!%p879_p7), %v679_v6, %v683_v7  ;;  %v688_v12 = vrot.slane (!%p879_p7), %v679_v6, %v687_v8 }
  0x2d   : > { %637 = vmatpush1.bf16.msra.mxu1 %v963_v26 }
  0x2e   : > { %598 = vmatpush1.bf16.msra.mxu0 %v930_v19  ;;  %638 = vmatprep.subr.bf16.mxu1 %v967_v28 }
  0x2f   : > { %599 = vmatprep.subr.bf16.mxu0 %v931_v21 }
  0x31   : > { %639 = vmatpush1.bf16.msra.mxu1 %v969_v30 }
  0x32   : > { %600 = vmatpush1.bf16.msra.mxu0 %v933_v23  ;;  %640 = vmatprep.subr.bf16.mxu1 %v973_v32 }
  0x33   : > { %601 = vmatprep.subr.bf16.mxu0 %v934_v25 }
  0x35   : > { %641 = vmatpush1.bf16.msra.mxu1 %v975_v36 }
  0x36   : > { %602 = vmatpush1.bf16.msra.mxu0 %v936_v27  ;;  %642 = vmatprep.subr.bf16.mxu1 %v979_v38 }
  0x37   : > { %603 = vmatprep.subr.bf16.mxu0 %v940_v29 }
  0x39   : > { %643 = vmatpush1.bf16.msra.mxu1 %v981_v40 }
  0x3a   : > { %604 = vmatpush1.bf16.msra.mxu0 %v942_v31 }
  0x3b   : > { %605 = vmatprep.subr.bf16.mxu0 %v946_v33 }
  0x3c   : > { %661 = vmatmul.mubr.bf16.vlgmr.msra.gmra.mrb[0].mxu1 %v985_v43 }
  0x3e   : > { %606 = vmatpush1.bf16.msra.mxu0 %v948_v37 }
  0x3f   : > { %607 = vmatprep.subr.bf16.mxu0 %v952_v39 }
  0x42   : > { %608 = vmatpush1.bf16.msra.mxu0 %v954_v41 }
  0x43   : > { %609 = vmatprep.subr.bf16.mxu0 %v958_v42 }
  0x46   : > { %610 = vmatpush1.bf16.msra.mxu0 %v960_v44 }
  0x47   : > { %611 = vmatprep.subr.bf16.mxu0 %v964_v45 }
  0x4a   : > { %612 = vmatpush1.bf16.msra.mxu0 %v966_v46 }
  0x4b   : > { %613 = vmatprep.subr.bf16.mxu0 %v970_v47 }
  0x4e   : > { %614 = vmatpush1.bf16.msra.mxu0 %v972_v48 }
  0x4f   : > { %615 = vmatprep.subr.bf16.mxu0 %v976_v49 }
  0x52   : > { %616 = vmatpush1.bf16.msra.mxu0 %v978_v50 }
  0x53   : > { %617 = vmatprep.subr.bf16.mxu0 %v982_v51 }
  0x56   : > { %618 = vmatpush1.bf16.msra.mxu0 %v984_v52 }
  0x59   : > { %620 = vmatmul.mubr.bf16.vlgmr.msra.gmra.mrb[0].mxu0 %v828_v53 }
 0x10f   : > { %v662_v54 = vpop.f32.mrb[0].mxu1 }
 0x110   : > { %v664_v55 = vpop.f32.mrb[1].mxu1 }
 0x111   : > { %v666_v56 = vpop.f32.mrb[2].mxu1 }
 0x112   : > { %v667_v57 = vpop.f32.mrb[3].mxu1 }
 0x12c   : > { %v621_v59 = vpop.f32.mrb[0].mxu0  ;;  %676 = sbr.rel (%p879_p7) target bundleno = 319 (0x13f), region = 40 }
 0x12d   : > { %v663_v60 = vadd.f32 %v662_v54, %v621_v59  ;;  %v623_v62 = vpop.f32.mrb[1].mxu0 }
 0x12e   : > { %v665_v63 = vadd.f32 %v664_v55, %v623_v62  ;;  %v625_v0 = vpop.f32.mrb[2].mxu0 }
 0x12f   : > { %v669_v1 = vadd.f32 %v663_v60, %v284_v58  ;;  %v626_v2 = vpop.f32.mrb[3].mxu0 }
 0x130   : > { %v670_v3 = vadd.f32 %v665_v63, %v285_v61 }
 0x131   : > { %671 = vst [vmem:[#allocation2] sm:$0xff] %v669_v1 }
 0x132   : > { %672 = vst [vmem:[#allocation2 + $0x8] sm:$0xff] %v670_v3 }
 0x138   : > { %v677_v9 = vld [vmem:[#allocation2] sm:$0xff] }
 0x139   : > { %v678_v10 = vld [vmem:[#allocation2 + $0x8] sm:$0xff]  ;;  %v691_v13 = vadd.f32 %v684_v11, %v677_v9 }
 0x13a   : > { %v692_v14 = vadd.f32 %v688_v12, %v678_v10 }
 0x13c   : > { %v886_v15 = vpack.c.bf16 %v692_v14, %v691_v13 }
 0x13e   : > { %701 = vst [vmem:[%s1136_s3] sm:$0xff] %v886_v15 }
 0x13f PF: > { %s13_s14 = sadd.s32 1, %s1010_s14   ;;  %s1137_s12 = smov %s1006_s13 }
 0x140   : > { %p10_p8 = scmp.ge.s32.totalorder %s13_s14, 4   ;;  %s1138_s13 = smov %s1140_s15 }
 0x142   :  { %12 = sbr.rel (!%p10_p8) target bundleno = 2 (0x2), region = 76 }

// kernel: _forward.19
= control target key start
LH: loop header
LB: loop body
LE: loop exit
PB: predicated region body
PF: predicated region fallthrough
CT: control target
= control target key end

     0   :  { %s652_s12 = smov 0   ;;  %s654_s13 = smov 0   ;;  %s717_s0 = inlined_call_operand.vmem [shape: bf16[2,4,5,64], index: 0, kind: input, shape index: {}]   ;;  %s718_s1 = inlined_call_operand.vmem [shape: bf16[2,4,5,64], index: 1, kind: input, shape index: {}]   ;;  %s719_s2 = inlined_call_operand.vmem [shape: bf16[2,4,5,64], index: 2, kind: input, shape index: {}]   ;;  %s720_s3 = inlined_call_operand.vmem [shape: bf16[2,4,5,64], index: 3, kind: output, shape index: {}]  }
   0x1   :  { %s656_s14 = smov 0   ;;  %s658_s15 = smov 0  }
   0x2   :  { %s660_s16 = smov 0  }
   0x3 LB: > { %s22_s17 = sadd.s32 1, %s619_s14  ;;  %s25_s18 = sadd.s32 1, %s623_s15  ;;  %s627_s16 = sphi %s660_s16, %s13_s16   ;;  %s623_s15 = sphi %s658_s15, %s724_s15   ;;  %s619_s14 = sphi %s656_s14, %s723_s14   ;;  %s615_s13 = sphi %s654_s13, %s722_s13   ;;  %s611_s12 = sphi %s652_s12, %s721_s12  }
   0x4   : > { %p23_p0 = scmp.ge.s32.totalorder %s22_s17, 4  ;;  %p513_p1 = scmp.ge.s32.totalorder %s627_s16, 1 }
   0x5   : > { %p186_p2 = scmp.lt.s32.totalorder %s627_s16, 9 }
   0x6   : > { %s726_s17 = smov (%p23_p0, %s22_s17), 0  ;;  %s728_s18 = smov (!%p23_p0, %s25_s18), %s623_s15 }
   0x7   : > { %p187_p3 = pnand %p513_p1, %p186_p2  ;;  %p27_p4 = scmp.ge.s32.totalorder %s728_s18, 2 }
   0x8   : > { %p232_p5 = scmp.lt.s32.totalorder (!%p187_p3), %s615_s13, 1  ;;  %p234_p6 = scmp.lt.s32.totalorder (!%p187_p3), %s611_s12, 3  ;;  %v629_v0 = vmov (!%p187_p3), 0.0   ;;  %vm630_vm0 = vmmov (!%p187_p3), 0   ;;  %vm268_vm1 = vcmask (!%p187_p3), 523264   ;;  %vm316_vm2 = vcmask (!%p187_p3), 36864  }
   0x9   : > { %s730_s18 = smov (%p27_p4, %s728_s18), 0  ;;  %190 = sbr.rel (%p187_p3) target bundleno = 622 (0x26e), region = 32 }
   0xa   : > { %530 = vmatprep.subr.bf16.mxu0 (!%p187_p3), %v629_v0  ;;  %532 = vmatprep.mubr.msk.bf16.mxu0 (!%p187_p3), %vm630_vm0, %v629_v0  ;;  %vm331_vm3 = vcmask (!%p187_p3), 1041408   ;;  %vm332_vm4 = vcmask (!%p187_p3), 1042432   ;;  %v631_v11 = vmov (!%p187_p3), 65535   ;;  %vm327_vm5 = vcmask (!%p187_p3), 39936  }
   0xb   : > { %536 = vmatprep.subr.bf16.mxu1 (!%p187_p3), %v629_v0  ;;  %538 = vmatprep.mubr.msk.bf16.mxu1 (!%p187_p3), %vm630_vm0, %v629_v0  ;;  %v333_v12 = vsel (!%p187_p3), %vm331_vm3, 4294967295, %v631_v11  ;;  %vm381_vm6 = vcmask (!%p187_p3), 518144   ;;  %vm382_vm7 = vsmask.f32 (!%p187_p3), 2304 }
   0xc   : > { %v334_v13 = vsel (!%p187_p3), %vm332_vm4, %v333_v12, 0  ;;  %vm383_vm8 = vmand (!%p187_p3), %vm381_vm6, %vm382_vm7 }
  0x10   : > { %s732_s13 = smov (!%p232_p5, %s615_s13), 1  ;;  %s734_s12 = smov (!%p234_p6, %s611_s12), 3 }
  0x11   : > { %s514_s19 = sshll.u32 %s732_s13, 2 }
  0x12   : > { %s237_s20 = sadd.s32 %s514_s19, %s734_s12 }
  0x13   : > { %s682_s21 = sshll.u32 %s237_s20, 2 }
  0x14   : > { %s247_s24 = scalar_lea.vmem %s718_s1, %s682_s21  ;;  %s239_s27 = scalar_lea.vmem %s717_s0, %s682_s21 }
  0x15   : > { %v266_v1 = vld [vmem:[%s247_s24] sm:$0x7]  ;;  %s255_s30 = scalar_lea.vmem %s719_s2, %s682_s21  ;;  %s263_s6 = scalar_lea.vmem %s720_s3, %s682_s21 }
  0x16   : > { %v273_v2 = vsel %vm268_vm1, %v266_v1, 0  ;;  %v265_v3 = vld [vmem:[%s239_s27] sm:$0x7] }
  0x17   : > { %531 = vmatpush3.bf16.xpose.msra.mxu0 %v273_v2  ;;  %v267_v10 = vld [vmem:[%s255_s30] sm:$0x7] }
  0x18   : > { %v336_v14 = vand.u32 %v334_v13, %v267_v10  ;;  %v384_v26 = vld [vmem:[%s263_s6] sm:$0x7] }
  0x1a   : > { %537 = vmatpush3.bf16.msra.mxu1 %v336_v14 }
  0x1e   : > { %533 = vmatmul.mubr.msk.bf16.vlgmr.msra.gmra.mrb[0].mxu0 %vm268_vm1, %v265_v3 }
  0xf1   : > { %v309_v4 = vpop.f32.mrb[0].mxu0 }
  0xf2   : > { %v315_v5 = vmul.f32 0.125, %v309_v4  ;;  %v534_v6 = vpop.f32.mrb[1].mxu0 }
  0xf3   : > { %v312_v7 = vpop.f32.mrb[2].mxu0 }
  0xf4   : > { %v535_v8 = vpop.f32.mrb[3].mxu0  ;;  %v317_v9 = vsel %vm316_vm2, %v315_v5, -inf }
  0xf5   : > { %318 = vmax.xlane.f32.xlu0 %v317_v9 }
 0x182   : > { %v319_v15 = vpop.xlane.xlu0 %318 }
 0x183   : > { %v320_v16 = vsub.f32 %v315_v5, %v319_v15 }
 0x185   : > { %v321_v17 = vmul.f32 1.442695, %v320_v16 }
 0x187   : > { %585 = vpow2.f32 %v321_v17 }
 0x191   : > { %v586_v18 = vpop.eup %585 }
 0x192   : > { %v323_v19 = vsel %vm316_vm2, %v586_v18, 0.0  ;;  %v326_v20 = vpack.c.bf16 %v586_v18, %v586_v18 }
 0x193   : > { %324 = vadd.xlane.f32.xlu0 %v323_v19 }
 0x194   : > { %539 = vmatmul.mubr.msk.bf16.vlgmr.msra.gmra.mrb[0].mxu1 %vm327_vm5, %v326_v20 }
 0x220   : > { %v325_v21 = vpop.xlane.xlu0 %324 }
 0x221   : > { %587 = vrcp.f32 %v325_v21 }
 0x22b   : > { %v588_v22 = vpop.eup %587 }
 0x267   : > { %v372_v23 = vpop.f32.mrb[0].mxu1 }
 0x268   : > { %v379_v24 = vmul.f32 %v588_v22, %v372_v23  ;;  %v540_v25 = vpop.f32.mrb[1].mxu1 }
 0x269   : > { %v375_v27 = vpop.f32.mrb[2].mxu1 }
 0x26a   : > { %v380_v28 = vpack.c.bf16 %v379_v24, %v379_v24  ;;  %v541_v29 = vpop.f32.mrb[3].mxu1 }
 0x26c   : > { %v385_v30 = vsel %vm383_vm8, %v380_v28, %v384_v26 }
 0x26d   : > { %386 = vst [vmem:[%s263_s6] sm:$0x7] %v385_v30 }
 0x26e PF: > { %s13_s16 = sadd.s32 1, %s627_s16   ;;  %s721_s12 = smov %s619_s14 }
 0x26f   : > { %p10_p7 = scmp.ge.s32.totalorder %s13_s16, 10   ;;  %s722_s13 = smov %s623_s15 }
 0x270   : > { %s723_s14 = smov %s726_s17  ;;  %s724_s15 = smov %s730_s18 }
 0x271   :  { %12 = sbr.rel (!%p10_p7) target bundleno = 3 (0x3), region = 68 }

// kernel: _forward.18
= control target key start
LH: loop header
LB: loop body
LE: loop exit
PB: predicated region body
PF: predicated region fallthrough
CT: control target
= control target key end

     0   :  { %s1400_s12 = smov 0   ;;  %s1402_s13 = smov 0   ;;  %s1678_s0 = inlined_call_operand.vmem [shape: bf16[10,256], index: 0, kind: input, shape index: {}]   ;;  %s1679_s1 = inlined_call_operand.vmem [shape: bf16[256,768], index: 1, kind: input, shape index: {}]   ;;  %s1680_s2 = inlined_call_operand.vmem [shape: f32[1,768], index: 2, kind: input, shape index: {}]   ;;  %s1681_s3 = inlined_call_operand.vmem [shape: bf16[10,768], index: 3, kind: output, shape index: {}]  }
   0x1   :  { %s1404_s14 = smov 0   ;;  %s1406_s15 = smov 0  }
   0x2   :  { %s1408_s16 = smov 0  }
   0x3 LB: > { %s28_s17 = sadd.s32 1, %s1373_s15  ;;  %s1068_s18 = sadd.s32 4294967295, %s1377_s16   ;;  %s1377_s16 = sphi %s1408_s16, %s13_s16   ;;  %s1373_s15 = sphi %s1406_s15, %s1686_s15   ;;  %s1369_s14 = sphi %s1404_s14, %s1685_s14   ;;  %s1365_s13 = sphi %s1402_s13, %s1684_s13   ;;  %s1361_s12 = sphi %s1400_s12, %s1683_s12  }
   0x4   : > { %p30_p0 = scmp.ge.s32.totalorder %s28_s17, 2  ;;  %p76_p1 = scmp.ne.s32.totalorder %s1365_s13, %s1361_s12 }
   0x5   : > { %p77_p2 = scmp.eq.s32.totalorder %s1377_s16, 0  ;;  %p134_p4 = scmp.eq.s32.totalorder %s1068_s18, 1 }
   0x6   : > { %s1688_s17 = smov (%p30_p0, %s28_s17), 0  ;;  %s69_s20 = sadd.s32 1, %s1365_s13 }
   0x7   : > { %p78_p3 = por %p77_p2, %p76_p1  ;;  %s65_s19 = ssub.s32 %s1373_s15, %s1688_s17 }
   0x8   : > { %p67_p5 = scmp.eq.s32.totalorder %s65_s19, 0  ;;  %p1435_p6 = por %p134_p4, %p76_p1 }
   0x9   : > { %p1072_p7 = scmp.ge.s32.totalorder %s1377_s16, 2 }
   0xa   : > { %s1440_s22 = scalar_select %p67_p5, %s1365_s13, %s69_s20  }
   0xb   : > { %171 = sbr.rel (%p1072_p7) target bundleno = 60 (0x3c), region = 20 }
  0x12   : > { %174 = sbr.rel (!%p78_p3) target bundleno = 60 (0x3c), region = 24  ;;  %s176_s23 = sand.u32 (%p78_p3), 1, %s1365_s13  }
  0x13   : > { %s1200_s24 = smul.u32 (%p78_p3), 12, %s1373_s15 }
  0x14   : > { %s1228_s25 = smul.u32 (%p78_p3), 384, %s176_s23 }
  0x15   : > { %s1448_s28 = scalar_lea.vmem (%p78_p3), %s1679_s1, %s1200_s24 }
  0x16   : > { %v199_v0 = vld [vmem:[%s1448_s28] sm:$0xff] (%p78_p3)  ;;  %v201_v1 = vld [vmem:[%s1448_s28 + $0x18] sm:$0xff] (%p78_p3)  ;;  %v203_v2 = vld [vmem:[%s1448_s28 + $0x30] sm:$0xff] (%p78_p3)  ;;  %s1453_s29 = scalar_lea.vmem (%p78_p3), [#allocation3], %s1228_s25 }
  0x17   : > { %200 = vst [vmem:[%s1453_s29] sm:$0xff] (%p78_p3), %v199_v0  ;;  %202 = vst [vmem:[%s1453_s29 + $0xc] sm:$0xff] (%p78_p3), %v201_v1  ;;  %v205_v3 = vld [vmem:[%s1448_s28 + $0x48] sm:$0xff] (%p78_p3)  ;;  %v207_v4 = vld [vmem:[%s1448_s28 + $0x60] sm:$0xff] (%p78_p3) }
  0x18   : > { %204 = vst [vmem:[%s1453_s29 + $0x18] sm:$0xff] (%p78_p3), %v203_v2  ;;  %v209_v5 = vld [vmem:[%s1448_s28 + $0x78] sm:$0xff] (%p78_p3)  ;;  %206 = vst [vmem:[%s1453_s29 + $0x24] sm:$0xff] (%p78_p3), %v205_v3  ;;  %v211_v6 = vld [vmem:[%s1448_s28 + $0x90] sm:$0xff] (%p78_p3) }
  0x19   : > { %208 = vst [vmem:[%s1453_s29 + $0x30] sm:$0xff] %v207_v4  ;;  %210 = vst [vmem:[%s1453_s29 + $0x3c] sm:$0xff] %v209_v5  ;;  %v213_v7 = vld [vmem:[%s1448_s28 + $0xa8] sm:$0xff]  ;;  %v215_v8 = vld [vmem:[%s1448_s28 + $0xc0] sm:$0xff] }
  0x1a   : > { %212 = vst [vmem:[%s1453_s29 + $0x48] sm:$0xff] %v211_v6  ;;  %214 = vst [vmem:[%s1453_s29 + $0x54] sm:$0xff] %v213_v7  ;;  %v217_v9 = vld [vmem:[%s1448_s28 + $0xd8] sm:$0xff]  ;;  %v219_v10 = vld [vmem:[%s1448_s28 + $0xf0] sm:$0xff] }
  0x1b   : > { %216 = vst [vmem:[%s1453_s29 + $0x60] sm:$0xff] %v215_v8  ;;  %v221_v11 = vld [vmem:[%s1448_s28 + $0x108] sm:$0xff]  ;;  %218 = vst [vmem:[%s1453_s29 + $0x6c] sm:$0xff] %v217_v9  ;;  %v223_v12 = vld [vmem:[%s1448_s28 + $0x120] sm:$0xff] }
  0x1c   : > { %220 = vst [vmem:[%s1453_s29 + $0x78] sm:$0xff] %v219_v10  ;;  %222 = vst [vmem:[%s1453_s29 + $0x84] sm:$0xff] %v221_v11  ;;  %v225_v13 = vld [vmem:[%s1448_s28 + $0x138] sm:$0xff]  ;;  %v227_v14 = vld [vmem:[%s1448_s28 + $0x150] sm:$0xff] }
  0x1d   : > { %224 = vst [vmem:[%s1453_s29 + $0x90] sm:$0xff] %v223_v12  ;;  %226 = vst [vmem:[%s1453_s29 + $0x9c] sm:$0xff] %v225_v13  ;;  %v229_v15 = vld [vmem:[%s1448_s28 + $0x168] sm:$0xff]  ;;  %v231_v16 = vld [vmem:[%s1448_s28 + $0x180] sm:$0xff] }
  0x1e   : > { %228 = vst [vmem:[%s1453_s29 + $0xa8] sm:$0xff] %v227_v14  ;;  %v233_v17 = vld [vmem:[%s1448_s28 + $0x198] sm:$0xff]  ;;  %230 = vst [vmem:[%s1453_s29 + $0xb4] sm:$0xff] %v229_v15  ;;  %v235_v18 = vld [vmem:[%s1448_s28 + $0x1b0] sm:$0xff] }
  0x1f   : > { %232 = vst [vmem:[%s1453_s29 + $0xc0] sm:$0xff] %v231_v16  ;;  %234 = vst [vmem:[%s1453_s29 + $0xcc] sm:$0xff] %v233_v17  ;;  %v237_v19 = vld [vmem:[%s1448_s28 + $0x1c8] sm:$0xff]  ;;  %v239_v20 = vld [vmem:[%s1448_s28 + $0x1e0] sm:$0xff] }
  0x20   : > { %236 = vst [vmem:[%s1453_s29 + $0xd8] sm:$0xff] %v235_v18  ;;  %238 = vst [vmem:[%s1453_s29 + $0xe4] sm:$0xff] %v237_v19  ;;  %v241_v21 = vld [vmem:[%s1448_s28 + $0x1f8] sm:$0xff]  ;;  %v243_v22 = vld [vmem:[%s1448_s28 + $0x210] sm:$0xff] }
  0x21   : > { %240 = vst [vmem:[%s1453_s29 + $0xf0] sm:$0xff] %v239_v20  ;;  %v245_v23 = vld [vmem:[%s1448_s28 + $0x228] sm:$0xff]  ;;  %242 = vst [vmem:[%s1453_s29 + $0xfc] sm:$0xff] %v241_v21  ;;  %v247_v24 = vld [vmem:[%s1448_s28 + $0x240] sm:$0xff] }
  0x22   : > { %244 = vst [vmem:[%s1453_s29 + $0x108] sm:$0xff] %v243_v22  ;;  %246 = vst [vmem:[%s1453_s29 + $0x114] sm:$0xff] %v245_v23  ;;  %v249_v25 = vld [vmem:[%s1448_s28 + $0x258] sm:$0xff]  ;;  %v251_v26 = vld [vmem:[%s1448_s28 + $0x270] sm:$0xff] }
  0x23   : > { %248 = vst [vmem:[%s1453_s29 + $0x120] sm:$0xff] %v247_v24  ;;  %250 = vst [vmem:[%s1453_s29 + $0x12c] sm:$0xff] %v249_v25  ;;  %v253_v27 = vld [vmem:[%s1448_s28 + $0x288] sm:$0xff]  ;;  %v255_v28 = vld [vmem:[%s1448_s28 + $0x2a0] sm:$0xff] }
  0x24   : > { %252 = vst [vmem:[%s1453_s29 + $0x138] sm:$0xff] %v251_v26  ;;  %v257_v29 = vld [vmem:[%s1448_s28 + $0x2b8] sm:$0xff]  ;;  %254 = vst [vmem:[%s1453_s29 + $0x144] sm:$0xff] %v253_v27  ;;  %v259_v30 = vld [vmem:[%s1448_s28 + $0x2d0] sm:$0xff] }
  0x25   : > { %256 = vst [vmem:[%s1453_s29 + $0x150] sm:$0xff] %v255_v28  ;;  %258 = vst [vmem:[%s1453_s29 + $0x15c] sm:$0xff] %v257_v29  ;;  %v261_v31 = vld [vmem:[%s1448_s28 + $0x2e8] sm:$0xff]  ;;  %v1076_v33 = vld [vmem:[%s1448_s28 + $0x20] sm:$0xf] }
  0x26   : > { %v1074_v32 = vld [vmem:[%s1448_s28 + $0x8] sm:$0xf]  ;;  %260 = vst [vmem:[%s1453_s29 + $0x168] sm:$0xff] %v259_v30  ;;  %262 = vst [vmem:[%s1453_s29 + $0x174] sm:$0xff] %v261_v31  ;;  %v1078_v34 = vld [vmem:[%s1448_s28 + $0x38] sm:$0xf] }
  0x27   : > { %1075 = vst [vmem:[%s1453_s29 + $0x8] sm:$0xf] %v1074_v32  ;;  %v1080_v35 = vld [vmem:[%s1448_s28 + $0x50] sm:$0xf]  ;;  %1077 = vst [vmem:[%s1453_s29 + $0x14] sm:$0xf] %v1076_v33 }
  0x28   : > { %1079 = vst [vmem:[%s1453_s29 + $0x20] sm:$0xf] %v1078_v34  ;;  %1081 = vst [vmem:[%s1453_s29 + $0x2c] sm:$0xf] %v1080_v35  ;;  %v1082_v36 = vld [vmem:[%s1448_s28 + $0x68] sm:$0xf] }
  0x29   : > { %v1084_v37 = vld [vmem:[%s1448_s28 + $0x80] sm:$0xf]  ;;  %v1086_v38 = vld [vmem:[%s1448_s28 + $0x98] sm:$0xf]  ;;  %1083 = vst [vmem:[%s1453_s29 + $0x38] sm:$0xf] %v1082_v36 }
  0x2a   : > { %1085 = vst [vmem:[%s1453_s29 + $0x44] sm:$0xf] %v1084_v37  ;;  %1087 = vst [vmem:[%s1453_s29 + $0x50] sm:$0xf] %v1086_v38  ;;  %v1088_v39 = vld [vmem:[%s1448_s28 + $0xb0] sm:$0xf] }
  0x2b   : > { %v1090_v40 = vld [vmem:[%s1448_s28 + $0xc8] sm:$0xf]  ;;  %v1092_v41 = vld [vmem:[%s1448_s28 + $0xe0] sm:$0xf]  ;;  %1089 = vst [vmem:[%s1453_s29 + $0x5c] sm:$0xf] %v1088_v39 }
  0x2c   : > { %1091 = vst [vmem:[%s1453_s29 + $0x68] sm:$0xf] %v1090_v40  ;;  %1093 = vst [vmem:[%s1453_s29 + $0x74] sm:$0xf] %v1092_v41  ;;  %v1094_v42 = vld [vmem:[%s1448_s28 + $0xf8] sm:$0xf] }
  0x2d   : > { %v1096_v43 = vld [vmem:[%s1448_s28 + $0x110] sm:$0xf]  ;;  %v1098_v44 = vld [vmem:[%s1448_s28 + $0x128] sm:$0xf]  ;;  %1095 = vst [vmem:[%s1453_s29 + $0x80] sm:$0xf] %v1094_v42 }
  0x2e   : > { %1097 = vst [vmem:[%s1453_s29 + $0x8c] sm:$0xf] %v1096_v43  ;;  %1099 = vst [vmem:[%s1453_s29 + $0x98] sm:$0xf] %v1098_v44  ;;  %v1100_v45 = vld [vmem:[%s1448_s28 + $0x140] sm:$0xf] }
  0x2f   : > { %v1102_v46 = vld [vmem:[%s1448_s28 + $0x158] sm:$0xf]  ;;  %v1104_v47 = vld [vmem:[%s1448_s28 + $0x170] sm:$0xf]  ;;  %1101 = vst [vmem:[%s1453_s29 + $0xa4] sm:$0xf] %v1100_v45 }
  0x30   : > { %1103 = vst [vmem:[%s1453_s29 + $0xb0] sm:$0xf] %v1102_v46  ;;  %1105 = vst [vmem:[%s1453_s29 + $0xbc] sm:$0xf] %v1104_v47  ;;  %v1106_v48 = vld [vmem:[%s1448_s28 + $0x188] sm:$0xf] }
  0x31   : > { %v1108_v49 = vld [vmem:[%s1448_s28 + $0x1a0] sm:$0xf]  ;;  %v1110_v50 = vld [vmem:[%s1448_s28 + $0x1b8] sm:$0xf]  ;;  %1107 = vst [vmem:[%s1453_s29 + $0xc8] sm:$0xf] %v1106_v48 }
  0x32   : > { %1109 = vst [vmem:[%s1453_s29 + $0xd4] sm:$0xf] %v1108_v49  ;;  %1111 = vst [vmem:[%s1453_s29 + $0xe0] sm:$0xf] %v1110_v50  ;;  %v1112_v51 = vld [vmem:[%s1448_s28 + $0x1d0] sm:$0xf] }
  0x33   : > { %v1114_v52 = vld [vmem:[%s1448_s28 + $0x1e8] sm:$0xf]  ;;  %v1116_v53 = vld [vmem:[%s1448_s28 + $0x200] sm:$0xf]  ;;  %1113 = vst [vmem:[%s1453_s29 + $0xec] sm:$0xf] %v1112_v51 }
  0x34   : > { %1115 = vst [vmem:[%s1453_s29 + $0xf8] sm:$0xf] %v1114_v52  ;;  %1117 = vst [vmem:[%s1453_s29 + $0x104] sm:$0xf] %v1116_v53  ;;  %v1118_v54 = vld [vmem:[%s1448_s28 + $0x218] sm:$0xf] }
  0x35   : > { %v1120_v55 = vld [vmem:[%s1448_s28 + $0x230] sm:$0xf]  ;;  %v1122_v56 = vld [vmem:[%s1448_s28 + $0x248] sm:$0xf]  ;;  %1119 = vst [vmem:[%s1453_s29 + $0x110] sm:$0xf] %v1118_v54 }
  0x36   : > { %1121 = vst [vmem:[%s1453_s29 + $0x11c] sm:$0xf] %v1120_v55  ;;  %1123 = vst [vmem:[%s1453_s29 + $0x128] sm:$0xf] %v1122_v56  ;;  %v1124_v57 = vld [vmem:[%s1448_s28 + $0x260] sm:$0xf] }
  0x37   : > { %v1126_v58 = vld [vmem:[%s1448_s28 + $0x278] sm:$0xf]  ;;  %v1128_v59 = vld [vmem:[%s1448_s28 + $0x290] sm:$0xf]  ;;  %1125 = vst [vmem:[%s1453_s29 + $0x134] sm:$0xf] %v1124_v57 }
  0x38   : > { %1127 = vst [vmem:[%s1453_s29 + $0x140] sm:$0xf] %v1126_v58  ;;  %1129 = vst [vmem:[%s1453_s29 + $0x14c] sm:$0xf] %v1128_v59  ;;  %v1130_v60 = vld [vmem:[%s1448_s28 + $0x2a8] sm:$0xf] }
  0x39   : > { %v1132_v61 = vld [vmem:[%s1448_s28 + $0x2c0] sm:$0xf]  ;;  %v1134_v62 = vld [vmem:[%s1448_s28 + $0x2d8] sm:$0xf]  ;;  %1131 = vst [vmem:[%s1453_s29 + $0x158] sm:$0xf] %v1130_v60 }
  0x3a   : > { %1133 = vst [vmem:[%s1453_s29 + $0x164] sm:$0xf] %v1132_v61  ;;  %1135 = vst [vmem:[%s1453_s29 + $0x170] sm:$0xf] %v1134_v62  ;;  %v1136_v63 = vld [vmem:[%s1448_s28 + $0x2f0] sm:$0xf] }
  0x3b   : > { %1137 = vst [vmem:[%s1453_s29 + $0x17c] sm:$0xf] %v1136_v63 }
  0x3c PF: > { %p1138_p8 = scmp.ge.s32.totalorder %s1377_s16, 1  ;;  %p346_p9 = scmp.lt.s32.totalorder %s1377_s16, 3 }
  0x3e   : > { %p347_p10 = pnand %p1138_p8, %p346_p9 }
  0x3f   : > { %s353_s30 = sand.u32 (!%p347_p10), 1, %s1361_s12   ;;  %v1335_v0 = vld [vmem:[%s1678_s0 + $0x4] ss:$8 sps:$4 sm:$0x1f] (!%p347_p10)   ;;  %v1379_v50 = vmov (!%p347_p10), 0.0   ;;  %s403_s10 = smul.u32 (!%p347_p10), 3, %s1369_s14  ;;  %v866_v51 = vlaneseq (!%p347_p10) }
  0x40   : > { %350 = sbr.rel (%p347_p10) target bundleno = 371 (0x173), region = 54  ;;  %834 = vmatprep.mubr.bf16.mxu1 (!%p347_p10), %v1335_v0  ;;  %791 = vmatprep.mubr.bf16.mxu0 (!%p347_p10), %v1335_v0  ;;  %v1333_v40 = vld [vmem:[%s1678_s0] ss:$8 sps:$4 sm:$0x1f] (!%p347_p10)   ;;  %418 = vst [vmem:[#allocation2 + $0x18] sm:$0x3] (!%p347_p10), %v1379_v50 }
  0x41   : > { %s1229_s4 = smul.u32 (!%p347_p10), 384, %s353_s30  ;;  %419 = vst [vmem:[#allocation2 + $0x20] sm:$0x3] (!%p347_p10), %v1379_v50  ;;  %420 = vst [vmem:[#allocation2 + $0x28] sm:$0x3] (!%p347_p10), %v1379_v50  ;;  %p404_p11 = scmp.lt.s32.totalorder (!%p347_p10), %s403_s10, 5 }
  0x42   : > { %v867_v52 = vshrl.u32 (!%p347_p10), %v866_v51, 7  ;;  %s1230_s20 = smul.u32 (!%p347_p10), 24, %s353_s30 }
  0x43   : > { %s1588_s7 = scalar_lea.vmem (!%p347_p10), [#allocation3], %s1229_s4 }
  0x44   : > { %v1272_v1 = vld [vmem:[%s1588_s7 + $0x4] ss:$12 sps:$4 sm:$0xff] (!%p347_p10)   ;;  %v1274_v2 = vld [vmem:[%s1588_s7] ss:$12 sps:$4 sm:$0xff] (!%p347_p10)   ;;  %v1275_v3 = vld [vmem:[%s1588_s7 + $0x1c] ss:$12 sps:$4 sm:$0xff] (!%p347_p10)  }
  0x45   : > { %759 = vmatprep.subr.bf16.mxu0 (!%p347_p10), %v1272_v1  ;;  %v1277_v4 = vld [vmem:[%s1588_s7 + $0x18] ss:$12 sps:$4 sm:$0xff] (!%p347_p10)   ;;  %v1278_v5 = vld [vmem:[%s1588_s7 + $0x34] ss:$12 sps:$4 sm:$0xff] (!%p347_p10)   ;;  %v1280_v6 = vld [vmem:[%s1588_s7 + $0x30] ss:$12 sps:$4 sm:$0xff] (!%p347_p10)  }
  0x46   : > { %760 = vmatpush1.bf16.msra.mxu0 (!%p347_p10), %v1274_v2  ;;  %v1281_v7 = vld [vmem:[%s1588_s7 + $0x4c] ss:$12 sps:$4 sm:$0xff] (!%p347_p10)   ;;  %v1293_v8 = vld [vmem:[%s1588_s7 + $0xc8] ss:$12 sps:$4 sm:$0xff] (!%p347_p10)   ;;  %v1284_v10 = vld [vmem:[%s1588_s7 + $0x64] ss:$12 sps:$4 sm:$0xff] (!%p347_p10)  }
  0x47   : > { %761 = vmatprep.subr.bf16.mxu0 %v1275_v3  ;;  %v1283_v9 = vld [vmem:[%s1588_s7 + $0x48] ss:$12 sps:$4 sm:$0xff]   ;;  %1206 = vmatprep.subr.bf16.mxu1 %v1293_v8  ;;  %v1298_v12 = vld [vmem:[%s1588_s7 + $0xe0] ss:$12 sps:$4 sm:$0xff]   ;;  %v1303_v16 = vld [vmem:[%s1588_s7 + $0xf8] ss:$12 sps:$4 sm:$0xff]  }
  0x48   : > { %v1296_v11 = vld [vmem:[%s1588_s7 + $0x8] ss:$12 sps:$4 sm:$0xff]   ;;  %v1286_v13 = vld [vmem:[%s1588_s7 + $0x60] ss:$12 sps:$4 sm:$0xff]   ;;  %v1289_v17 = vld [vmem:[%s1588_s7 + $0x78] ss:$12 sps:$4 sm:$0xff]  }
  0x49   : > { %1207 = vmatpush3.bf16.msra.mxu1 %v1296_v11  ;;  %v1287_v14 = vld [vmem:[%s1588_s7 + $0x7c] ss:$12 sps:$4 sm:$0xff]   ;;  %v1301_v15 = vld [vmem:[%s1588_s7 + $0x20] ss:$12 sps:$4 sm:$0xff]   ;;  %v1306_v18 = vld [vmem:[%s1588_s7 + $0x38] ss:$12 sps:$4 sm:$0xff]  }
  0x4a   : > { %762 = vmatpush1.bf16.msra.mxu0 %v1277_v4  ;;  %1208 = vmatprep.subr.bf16.mxu1 %v1298_v12  ;;  %v1290_v19 = vld [vmem:[%s1588_s7 + $0x94] ss:$12 sps:$4 sm:$0xff]   ;;  %v1308_v20 = vld [vmem:[%s1588_s7 + $0x110] ss:$12 sps:$4 sm:$0xff]   ;;  %v1294_v24 = vld [vmem:[%s1588_s7 + $0xac] ss:$12 sps:$4 sm:$0xff]  }
  0x4b   : > { %763 = vmatprep.subr.bf16.mxu0 %v1278_v5  ;;  %v1292_v21 = vld [vmem:[%s1588_s7 + $0x90] ss:$12 sps:$4 sm:$0xff]   ;;  %v1313_v23 = vld [vmem:[%s1588_s7 + $0x128] ss:$12 sps:$4 sm:$0xff]   ;;  %v1318_v27 = vld [vmem:[%s1588_s7 + $0x140] ss:$12 sps:$4 sm:$0xff]  }
  0x4c   : > { %v1311_v22 = vld [vmem:[%s1588_s7 + $0x50] ss:$12 sps:$4 sm:$0xff]   ;;  %v1297_v25 = vld [vmem:[%s1588_s7 + $0xa8] ss:$12 sps:$4 sm:$0xff]   ;;  %v1302_v29 = vld [vmem:[%s1588_s7 + $0xc0] ss:$12 sps:$4 sm:$0xff]  }
  0x4d   : > { %1209 = vmatpush3.bf16.msra.mxu1 %v1301_v15  ;;  %v1316_v26 = vld [vmem:[%s1588_s7 + $0x68] ss:$12 sps:$4 sm:$0xff]   ;;  %v1299_v28 = vld [vmem:[%s1588_s7 + $0xc4] ss:$12 sps:$4 sm:$0xff]   ;;  %v1321_v30 = vld [vmem:[%s1588_s7 + $0x80] ss:$12 sps:$4 sm:$0xff]  }
  0x4e   : > { %764 = vmatpush1.bf16.msra.mxu0 %v1280_v6  ;;  %1210 = vmatprep.subr.bf16.mxu1 %v1303_v16  ;;  %v1323_v31 = vld [vmem:[%s1588_s7 + $0x158] ss:$12 sps:$4 sm:$0xff]   ;;  %v1304_v32 = vld [vmem:[%s1588_s7 + $0xdc] ss:$12 sps:$4 sm:$0xff]   ;;  %v1309_v36 = vld [vmem:[%s1588_s7 + $0xf4] ss:$12 sps:$4 sm:$0xff]  }
  0x4f   : > { %765 = vmatprep.subr.bf16.mxu0 %v1281_v7  ;;  %v1326_v33 = vld [vmem:[%s1588_s7 + $0x98] ss:$12 sps:$4 sm:$0xff]   ;;  %v1328_v35 = vld [vmem:[%s1588_s7 + $0x170] ss:$12 sps:$4 sm:$0xff]   ;;  %v1317_v41 = vld [vmem:[%s1588_s7 + $0x108] ss:$12 sps:$4 sm:$0xff]  }
  0x50   : > { %v1307_v34 = vld [vmem:[%s1588_s7 + $0xd8] ss:$12 sps:$4 sm:$0xff]   ;;  %v1331_v37 = vld [vmem:[%s1588_s7 + $0xb0] ss:$12 sps:$4 sm:$0xff]   ;;  %v1322_v43 = vld [vmem:[%s1588_s7 + $0x120] ss:$12 sps:$4 sm:$0xff]  }
  0x51   : > { %1211 = vmatpush3.bf16.msra.mxu1 %v1306_v18  ;;  %v1312_v38 = vld [vmem:[%s1588_s7 + $0xf0] ss:$12 sps:$4 sm:$0xff]   ;;  %v1314_v39 = vld [vmem:[%s1588_s7 + $0x10c] ss:$12 sps:$4 sm:$0xff]   ;;  %v1329_v46 = vld [vmem:[%s1588_s7 + $0x154] ss:$12 sps:$4 sm:$0xff]  }
  0x52   : > { %766 = vmatpush1.bf16.msra.mxu0 %v1283_v9  ;;  %1212 = vmatprep.subr.bf16.mxu1 %v1308_v20  ;;  %v1319_v42 = vld [vmem:[%s1588_s7 + $0x124] ss:$12 sps:$4 sm:$0xff]   ;;  %v1324_v44 = vld [vmem:[%s1588_s7 + $0x13c] ss:$12 sps:$4 sm:$0xff]   ;;  %v1336_v48 = vld [vmem:[%s1588_s7 + $0x16c] ss:$12 sps:$4 sm:$0xff]  }
  0x53   : > { %767 = vmatprep.subr.bf16.mxu0 %v1284_v10  ;;  %v1327_v45 = vld [vmem:[%s1588_s7 + $0x138] ss:$12 sps:$4 sm:$0xff]   ;;  %v1332_v47 = vld [vmem:[%s1588_s7 + $0x150] ss:$12 sps:$4 sm:$0xff]   ;;  %v1338_v49 = vld [vmem:[%s1588_s7 + $0x168] ss:$12 sps:$4 sm:$0xff]  }
  0x54   : > { %s1690_s10 = smov (!%p404_p11, %s403_s10), 5  ;;  %v876_v53 = vsub.s32 2, %v867_v52  ;;  %v426_v60 = vld [vmem:[#allocation2 + $0x28] sm:$0x3]  ;;  %s1647_s23 = scalar_lea.vmem [#allocation4], %s1230_s20  ;;  %v868_v4 = vsub.s32 0, %v867_v52 }
  0x55   : > { %1213 = vmatpush3.bf16.msra.mxu1 %v1311_v22  ;;  %s406_s19 = scalar_lea.vmem %s1680_s2, %s1690_s10  ;;  %v872_v5 = vsub.s32 1, %v867_v52  ;;  %v424_v10 = vld [vmem:[#allocation2 + $0x18] sm:$0x3]  ;;  %v425_v12 = vld [vmem:[#allocation2 + $0x20] sm:$0x3]  ;;  %s1205_s12 = smul.u32 (%p1435_p6), 12, %s1369_s14 }
  0x56   : > { %768 = vmatpush1.bf16.msra.mxu0 %v1286_v13  ;;  %1214 = vmatprep.subr.bf16.mxu1 %v1313_v23  ;;  %v864_v54 = vld [vmem:[%s406_s19] sm:$0x7] }
  0x57   : > { %769 = vmatprep.subr.bf16.mxu0 %v1287_v14  ;;  %v877_v58 = vrot.slane %v864_v54, %v876_v53  ;;  %v869_v7 = vrot.slane %v864_v54, %v868_v4  ;;  %v873_v9 = vrot.slane %v864_v54, %v872_v5  ;;  %s923_s26 = scalar_lea.vmem (%p1435_p6), %s1681_s3, %s1205_s12 }
  0x59   : > { %1215 = vmatpush3.bf16.msra.mxu1 %v1316_v26 }
  0x5a   : > { %770 = vmatpush1.bf16.msra.mxu0 %v1289_v17  ;;  %1216 = vmatprep.subr.bf16.mxu1 %v1318_v27 }
  0x5b   : > { %771 = vmatprep.subr.bf16.mxu0 %v1290_v19 }
  0x5d   : > { %1217 = vmatpush3.bf16.msra.mxu1 %v1321_v30 }
  0x5e   : > { %772 = vmatpush1.bf16.msra.mxu0 %v1292_v21  ;;  %1218 = vmatprep.subr.bf16.mxu1 %v1323_v31 }
  0x5f   : > { %773 = vmatprep.subr.bf16.mxu0 %v1294_v24 }
  0x61   : > { %1219 = vmatpush3.bf16.msra.mxu1 %v1326_v33 }
  0x62   : > { %774 = vmatpush1.bf16.msra.mxu0 %v1297_v25  ;;  %1220 = vmatprep.subr.bf16.mxu1 %v1328_v35 }
  0x63   : > { %775 = vmatprep.subr.bf16.mxu0 %v1299_v28 }
  0x65   : > { %1221 = vmatpush3.bf16.msra.mxu1 %v1331_v37 }
  0x66   : > { %776 = vmatpush1.bf16.msra.mxu0 %v1302_v29 }
  0x67   : > { %777 = vmatprep.subr.bf16.mxu0 %v1304_v32 }
  0x68   : > { %835 = vmatmul.mubr.bf16.vlgmr.msra.gmra.mrb[0].mxu1 %v1333_v40 }
  0x6a   : > { %778 = vmatpush1.bf16.msra.mxu0 %v1307_v34 }
  0x6b   : > { %779 = vmatprep.subr.bf16.mxu0 %v1309_v36 }
  0x6e   : > { %780 = vmatpush1.bf16.msra.mxu0 %v1312_v38 }
  0x6f   : > { %781 = vmatprep.subr.bf16.mxu0 %v1314_v39 }
  0x72   : > { %782 = vmatpush1.bf16.msra.mxu0 %v1317_v41 }
  0x73   : > { %783 = vmatprep.subr.bf16.mxu0 %v1319_v42 }
  0x76   : > { %784 = vmatpush1.bf16.msra.mxu0 %v1322_v43 }
  0x77   : > { %785 = vmatprep.subr.bf16.mxu0 %v1324_v44 }
  0x7a   : > { %786 = vmatpush1.bf16.msra.mxu0 %v1327_v45 }
  0x7b   : > { %787 = vmatprep.subr.bf16.mxu0 %v1329_v46 }
  0x7e   : > { %788 = vmatpush1.bf16.msra.mxu0 %v1332_v47 }
  0x7f   : > { %789 = vmatprep.subr.bf16.mxu0 %v1336_v48 }
  0x82   : > { %790 = vmatpush1.bf16.msra.mxu0 %v1338_v49 }
  0x85   : > { %792 = vmatmul.mubr.bf16.vlgmr.msra.gmra.mrb[0].mxu0 %v1333_v40 }
 0x13b   : > { %v1222_v55 = vpop.f32.mrb[0].mxu1 }
 0x13c   : > { %v1223_v56 = vpop.f32.mrb[1].mxu1 }
 0x13d   : > { %v1224_v57 = vadd.f32 %v1223_v56, %v1222_v55  ;;  %v1225_v59 = vpop.f32.mrb[2].mxu1 }
 0x13e   : > { %v1226_v61 = vpop.f32.mrb[3].mxu1 }
 0x13f   : > { %v1227_v62 = vadd.f32 %v1226_v61, %v1225_v59  ;;  %v883_v63 = vadd.f32 %v1224_v57, %v877_v58 }
 0x141   : > { %v848_v0 = vadd.f32 %v1227_v62, %v426_v60  ;;  %v1202_v1 = vpack.c.bf16 %v883_v63, %v883_v63 }
 0x143   : > { %854 = vst [vmem:[#allocation2 + $0x28] sm:$0x3] %v848_v0  ;;  %908 = vst [vmem:[%s1647_s23 + $0x8] sm:$0xf] %v1202_v1 }
 0x14a   : > { %v863_v2 = vld [vmem:[#allocation2 + $0x28] sm:$0x3]  ;;  %v1194_v27 = vld [vmem:[%s1647_s23 + $0x8] sm:$0xf] (%p1435_p6) }
 0x14b   : > { %v886_v3 = vadd.f32 %v877_v58, %v863_v2  ;;  %1195 = vst [vmem:[%s923_s26 + $0x8] sm:$0xf] (%p1435_p6), %v1194_v27 }
 0x14d   : > { %v1204_v6 = vpack.c.bf16 %v886_v3, %v886_v3 }
 0x14f   : > { %910 = vst [vmem:[%s1647_s23 + $0x14] sm:$0x1] %v1204_v6 }
 0x156   : > { %v1196_v28 = vld [vmem:[%s1647_s23 + $0x14] sm:$0xf] (%p1435_p6) }
 0x157   : > { %1197 = vst [vmem:[%s923_s26 + $0x20] sm:$0xf] (%p1435_p6), %v1196_v28 }
 0x158   : > { %v793_v8 = vpop.f32.mrb[0].mxu0 }
 0x159   : > { %v795_v11 = vpop.f32.mrb[1].mxu0  ;;  %v881_v14 = vadd.f32 %v869_v7, %v793_v8 }
 0x15a   : > { %v797_v13 = vpop.f32.mrb[2].mxu0  ;;  %v882_v17 = vadd.f32 %v873_v9, %v795_v11 }
 0x15b   : > { %v846_v15 = vadd.f32 %v797_v13, %v424_v10  ;;  %v799_v16 = vpop.f32.mrb[3].mxu0 }
 0x15c   : > { %v847_v18 = vadd.f32 %v799_v16, %v425_v12  ;;  %v1201_v19 = vpack.c.bf16 %v882_v17, %v881_v14 }
 0x15d   : > { %852 = vst [vmem:[#allocation2 + $0x18] sm:$0x3] %v846_v15 }
 0x15e   : > { %853 = vst [vmem:[#allocation2 + $0x20] sm:$0x3] %v847_v18  ;;  %907 = vst [vmem:[%s1647_s23] sm:$0xff] %v1201_v19 }
 0x164   : > { %v861_v20 = vld [vmem:[#allocation2 + $0x18] sm:$0x3]  ;;  %917 = sbr.rel (!%p1435_p6) target bundleno = 371 (0x173), region = 70 }
 0x165   : > { %v884_v21 = vadd.f32 %v869_v7, %v861_v20  ;;  %v862_v22 = vld [vmem:[#allocation2 + $0x20] sm:$0x3]  ;;  %v938_v25 = vld [vmem:[%s1647_s23] sm:$0xff] (%p1435_p6) }
 0x166   : > { %v885_v23 = vadd.f32 %v873_v9, %v862_v22  ;;  %939 = vst [vmem:[%s923_s26] sm:$0xff] (%p1435_p6), %v938_v25 }
 0x168   : > { %v1203_v24 = vpack.c.bf16 %v885_v23, %v884_v21 }
 0x16a   : > { %909 = vst [vmem:[%s1647_s23 + $0xc] sm:$0x11] %v1203_v24 }
 0x171   : > { %v940_v26 = vld [vmem:[%s1647_s23 + $0xc] sm:$0xff] }
 0x172   : > { %941 = vst [vmem:[%s923_s26 + $0x18] sm:$0xff] %v940_v26 }
 0x173 PF: > { %s13_s16 = sadd.s32 1, %s1377_s16   ;;  %s1683_s12 = smov %s1365_s13 }
 0x174   : > { %p10_p12 = scmp.ge.s32.totalorder %s13_s16, 4   ;;  %s1684_s13 = smov %s1440_s22 }
 0x175   : > { %s1685_s14 = smov %s1373_s15  ;;  %s1686_s15 = smov %s1688_s17 }
 0x176   :  { %12 = sbr.rel (!%p10_p12) target bundleno = 3 (0x3), region = 145 }

// kernel: _forward.20
= control target key start
LH: loop header
LB: loop body
LE: loop exit
PB: predicated region body
PF: predicated region fallthrough
CT: control target
= control target key end

     0   :  { %v425_v1 = vmov 0.0   ;;  %v293_v35 = vlaneseq  ;;  %s568_s1 = inlined_call_operand.vmem [shape: bf16[256,256], index: 1, kind: input, shape index: {}]   ;;  %s569_s0 = inlined_call_operand.vmem [shape: bf16[10,256], index: 0, kind: input, shape index: {}]   ;;  %s570_s2 = inlined_call_operand.vmem [shape: f32[1,256], index: 2, kind: input, shape index: {}]   ;;  %s571_s3 = inlined_call_operand.vmem [shape: bf16[10,256], index: 3, kind: input, shape index: {}]   ;;  %s572_s4 = inlined_call_operand.vmem [shape: bf16[10,256], index: 4, kind: output, shape index: {}]  }
   0x1   :  { %v374_v0 = vld [vmem:[%s568_s1 + $0x4] ss:$8 sps:$4 sm:$0xff]   ;;  %23 = vst [vmem:[#allocation2 + $0x10] sm:$0x3] %v425_v1  ;;  %24 = vst [vmem:[#allocation2 + $0x18] sm:$0x3] %v425_v1 }
   0x2   :  { %v376_v2 = vld [vmem:[%s568_s1] ss:$8 sps:$4 sm:$0xff]   ;;  %233 = vmatprep.subr.bf16.mxu0 %v374_v0  ;;  %v377_v3 = vld [vmem:[%s568_s1 + $0x14] ss:$8 sps:$4 sm:$0xff]   ;;  %v379_v4 = vld [vmem:[%s568_s1 + $0x10] ss:$8 sps:$4 sm:$0xff]  }
   0x3   :  { %234 = vmatpush1.bf16.msra.mxu0 %v376_v2  ;;  %v380_v5 = vld [vmem:[%s568_s1 + $0x24] ss:$8 sps:$4 sm:$0xff]   ;;  %v382_v6 = vld [vmem:[%s568_s1 + $0x20] ss:$8 sps:$4 sm:$0xff]   ;;  %v383_v7 = vld [vmem:[%s568_s1 + $0x34] ss:$8 sps:$4 sm:$0xff]  }
   0x4   :  { %235 = vmatprep.subr.bf16.mxu0 %v377_v3  ;;  %v385_v8 = vld [vmem:[%s568_s1 + $0x30] ss:$8 sps:$4 sm:$0xff]   ;;  %v386_v9 = vld [vmem:[%s568_s1 + $0x44] ss:$8 sps:$4 sm:$0xff]   ;;  %v388_v10 = vld [vmem:[%s568_s1 + $0x40] ss:$8 sps:$4 sm:$0xff]  }
   0x5   :  { %v389_v11 = vld [vmem:[%s568_s1 + $0x54] ss:$8 sps:$4 sm:$0xff]   ;;  %v391_v12 = vld [vmem:[%s568_s1 + $0x50] ss:$8 sps:$4 sm:$0xff]   ;;  %v392_v13 = vld [vmem:[%s568_s1 + $0x64] ss:$8 sps:$4 sm:$0xff]  }
   0x6   :  { %v424_v14 = vld [vmem:[%s569_s0 + $0x4] ss:$8 sps:$4 sm:$0x1f]   ;;  %v394_v15 = vld [vmem:[%s568_s1 + $0x60] ss:$8 sps:$4 sm:$0xff]   ;;  %v294_v36 = vshrl.u32 %v293_v35, 7 }
   0x7   :  { %236 = vmatpush1.bf16.msra.mxu0 %v379_v4  ;;  %v395_v16 = vld [vmem:[%s568_s1 + $0x74] ss:$8 sps:$4 sm:$0xff]   ;;  %265 = vmatprep.mubr.bf16.mxu0 %v424_v14  ;;  %v397_v17 = vld [vmem:[%s568_s1 + $0x70] ss:$8 sps:$4 sm:$0xff]   ;;  %v398_v18 = vld [vmem:[%s568_s1 + $0x84] ss:$8 sps:$4 sm:$0xff]  }
   0x8   :  { %237 = vmatprep.subr.bf16.mxu0 %v380_v5  ;;  %v400_v19 = vld [vmem:[%s568_s1 + $0x80] ss:$8 sps:$4 sm:$0xff]   ;;  %v401_v20 = vld [vmem:[%s568_s1 + $0x94] ss:$8 sps:$4 sm:$0xff]   ;;  %v403_v21 = vld [vmem:[%s568_s1 + $0x90] ss:$8 sps:$4 sm:$0xff]  }
   0x9   :  { %v404_v22 = vld [vmem:[%s568_s1 + $0xa4] ss:$8 sps:$4 sm:$0xff]   ;;  %v406_v23 = vld [vmem:[%s568_s1 + $0xa0] ss:$8 sps:$4 sm:$0xff]   ;;  %v407_v24 = vld [vmem:[%s568_s1 + $0xb4] ss:$8 sps:$4 sm:$0xff]  }
   0xa   :  { %v409_v25 = vld [vmem:[%s568_s1 + $0xb0] ss:$8 sps:$4 sm:$0xff]   ;;  %v410_v26 = vld [vmem:[%s568_s1 + $0xc4] ss:$8 sps:$4 sm:$0xff]   ;;  %v412_v27 = vld [vmem:[%s568_s1 + $0xc0] ss:$8 sps:$4 sm:$0xff]  }
   0xb   :  { %238 = vmatpush1.bf16.msra.mxu0 %v382_v6  ;;  %v413_v28 = vld [vmem:[%s568_s1 + $0xd4] ss:$8 sps:$4 sm:$0xff]   ;;  %v415_v29 = vld [vmem:[%s568_s1 + $0xd0] ss:$8 sps:$4 sm:$0xff]   ;;  %v416_v30 = vld [vmem:[%s568_s1 + $0xe4] ss:$8 sps:$4 sm:$0xff]  }
   0xc   :  { %239 = vmatprep.subr.bf16.mxu0 %v383_v7  ;;  %v418_v31 = vld [vmem:[%s568_s1 + $0xe0] ss:$8 sps:$4 sm:$0xff]   ;;  %v419_v32 = vld [vmem:[%s568_s1 + $0xf4] ss:$8 sps:$4 sm:$0xff]   ;;  %v421_v33 = vld [vmem:[%s568_s1 + $0xf0] ss:$8 sps:$4 sm:$0xff]  }
   0xd   :  { %v422_v34 = vld [vmem:[%s569_s0] ss:$8 sps:$4 sm:$0x1f]   ;;  %v295_v37 = vsub.s32 0, %v294_v36  ;;  %v299_v39 = vsub.s32 1, %v294_v36 }
   0xe   :  { %v291_v38 = vld [vmem:[%s570_s2] sm:$0x3]  ;;  %v27_v44 = vld [vmem:[#allocation2 + $0x10] sm:$0x3]  ;;  %v28_v47 = vld [vmem:[#allocation2 + $0x18] sm:$0x3] }
   0xf   :  { %240 = vmatpush1.bf16.msra.mxu0 %v385_v8  ;;  %v307_v40 = vld [vmem:[%s571_s3] sm:$0xff]  ;;  %v296_v41 = vrot.slane %v291_v38, %v295_v37  ;;  %v300_v43 = vrot.slane %v291_v38, %v299_v39  ;;  %v308_v58 = vld [vmem:[%s571_s3 + $0x8] sm:$0x11] }
  0x10   :  { %241 = vmatprep.subr.bf16.mxu0 %v386_v9  ;;  %v309_v45 = vunpack.c.l.bf16 %v307_v40  ;;  %v310_v48 = vunpack.c.h.bf16 %v307_v40  ;;  %v311_v59 = vunpack.c.l.bf16 %v308_v58  ;;  %v312_v61 = vunpack.c.h.bf16 %v308_v58 }
  0x13   :  { %242 = vmatpush1.bf16.msra.mxu0 %v388_v10 }
  0x14   :  { %243 = vmatprep.subr.bf16.mxu0 %v389_v11 }
  0x17   :  { %244 = vmatpush1.bf16.msra.mxu0 %v391_v12 }
  0x18   :  { %245 = vmatprep.subr.bf16.mxu0 %v392_v13 }
  0x1b   :  { %246 = vmatpush1.bf16.msra.mxu0 %v394_v15 }
  0x1c   :  { %247 = vmatprep.subr.bf16.mxu0 %v395_v16 }
  0x1f   :  { %248 = vmatpush1.bf16.msra.mxu0 %v397_v17 }
  0x20   :  { %249 = vmatprep.subr.bf16.mxu0 %v398_v18 }
  0x23   :  { %250 = vmatpush1.bf16.msra.mxu0 %v400_v19 }
  0x24   :  { %251 = vmatprep.subr.bf16.mxu0 %v401_v20 }
  0x27   :  { %252 = vmatpush1.bf16.msra.mxu0 %v403_v21 }
  0x28   :  { %253 = vmatprep.subr.bf16.mxu0 %v404_v22 }
  0x2b   :  { %254 = vmatpush1.bf16.msra.mxu0 %v406_v23 }
  0x2c   :  { %255 = vmatprep.subr.bf16.mxu0 %v407_v24 }
  0x2f   :  { %256 = vmatpush1.bf16.msra.mxu0 %v409_v25 }
  0x30   :  { %257 = vmatprep.subr.bf16.mxu0 %v410_v26 }
  0x33   :  { %258 = vmatpush1.bf16.msra.mxu0 %v412_v27 }
  0x34   :  { %259 = vmatprep.subr.bf16.mxu0 %v413_v28 }
  0x37   :  { %260 = vmatpush1.bf16.msra.mxu0 %v415_v29 }
  0x38   :  { %261 = vmatprep.subr.bf16.mxu0 %v416_v30 }
  0x3b   :  { %262 = vmatpush1.bf16.msra.mxu0 %v418_v31 }
  0x3c   :  { %263 = vmatprep.subr.bf16.mxu0 %v419_v32 }
  0x3f   :  { %264 = vmatpush1.bf16.msra.mxu0 %v421_v33 }
  0x42   :  { %266 = vmatmul.mubr.bf16.vlgmr.msra.gmra.mrb[0].mxu0 %v422_v34 }
 0x115   :  { %v267_v42 = vpop.f32.mrb[0].mxu0 }
 0x116   :  { %v269_v46 = vpop.f32.mrb[1].mxu0  ;;  %v303_v50 = vadd.f32 %v296_v41, %v267_v42 }
 0x117   :  { %v271_v49 = vpop.f32.mrb[2].mxu0  ;;  %v304_v53 = vadd.f32 %v300_v43, %v269_v46 }
 0x118   :  { %v278_v51 = vadd.f32 %v271_v49, %v27_v44  ;;  %v273_v52 = vpop.f32.mrb[3].mxu0  ;;  %v313_v55 = vadd.f32 %v309_v45, %v303_v50 }
 0x119   :  { %v279_v54 = vadd.f32 %v273_v52, %v28_v47  ;;  %v314_v56 = vadd.f32 %v310_v48, %v304_v53 }
 0x11a   :  { %282 = vst [vmem:[#allocation2 + $0x10] sm:$0x3] %v278_v51 }
 0x11b   :  { %283 = vst [vmem:[#allocation2 + $0x18] sm:$0x3] %v279_v54  ;;  %v371_v57 = vpack.c.bf16 %v314_v56, %v313_v55 }
 0x11d   :  { %329 = vst [vmem:[%s572_s4] sm:$0xff] %v371_v57 }
 0x121   :  { %v289_v60 = vld [vmem:[#allocation2 + $0x10] sm:$0x3] }
 0x122   :  { %v305_v62 = vadd.f32 %v296_v41, %v289_v60  ;;  %v290_v63 = vld [vmem:[#allocation2 + $0x18] sm:$0x3] }
 0x123   :  { %v306_v0 = vadd.f32 %v300_v43, %v290_v63 }
 0x124   :  { %v315_v1 = vadd.f32 %v311_v59, %v305_v62 }
 0x125   :  { %v316_v2 = vadd.f32 %v312_v61, %v306_v0 }
 0x127   :  { %v372_v3 = vpack.c.bf16 %v316_v2, %v315_v1 }
 0x129   :  { %330 = vst [vmem:[%s572_s4 + $0x8] sm:$0x11] %v372_v3 }

// kernel: _forward.22
= control target key start
LH: loop header
LB: loop body
LE: loop exit
PB: predicated region body
PF: predicated region fallthrough
CT: control target
= control target key end

     0   :  { %v867_v1 = vmov 0.0   ;;  %s1136_s1 = inlined_call_operand.vmem [shape: bf16[256,512], index: 1, kind: input, shape index: {}]   ;;  %s1137_s0 = inlined_call_operand.vmem [shape: bf16[10,256], index: 0, kind: input, shape index: {}]   ;;  %s1138_s2 = inlined_call_operand.vmem [shape: f32[1,512], index: 2, kind: input, shape index: {}]   ;;  %s1139_s3 = inlined_call_operand.vmem [shape: bf16[10,512], index: 3, kind: output, shape index: {}]  }
   0x1   :  { %v752_v0 = vld [vmem:[%s1136_s1 + $0x4] ss:$16 sps:$4 sm:$0xff]   ;;  %22 = vst [vmem:[#allocation2 + $0x20] sm:$0x3] %v867_v1  ;;  %23 = vst [vmem:[#allocation2 + $0x28] sm:$0x3] %v867_v1 }
   0x2   :  { %24 = vst [vmem:[#allocation2 + $0x30] sm:$0x3] %v867_v1  ;;  %25 = vst [vmem:[#allocation2 + $0x38] sm:$0x3] %v867_v1  ;;  %v754_v2 = vld [vmem:[%s1136_s1 + $0xc] ss:$16 sps:$4 sm:$0xff]   ;;  %430 = vmatprep.subr.bf16.mxu0 %v752_v0 }
   0x3   :  { %v756_v3 = vld [vmem:[%s1136_s1] ss:$16 sps:$4 sm:$0xff]   ;;  %v757_v4 = vld [vmem:[%s1136_s1 + $0x8] ss:$16 sps:$4 sm:$0xff]   ;;  %473 = vmatprep.subr.bf16.mxu1 %v754_v2  ;;  %v758_v5 = vld [vmem:[%s1136_s1 + $0x24] ss:$16 sps:$4 sm:$0xff]  }
   0x4   :  { %431 = vmatpush1.bf16.msra.mxu0 %v756_v3  ;;  %474 = vmatpush1.bf16.msra.mxu1 %v757_v4  ;;  %v760_v6 = vld [vmem:[%s1136_s1 + $0x2c] ss:$16 sps:$4 sm:$0xff]   ;;  %v762_v7 = vld [vmem:[%s1136_s1 + $0x20] ss:$16 sps:$4 sm:$0xff]   ;;  %v763_v8 = vld [vmem:[%s1136_s1 + $0x28] ss:$16 sps:$4 sm:$0xff]   ;;  %v545_v3 = vlaneseq }
   0x5   :  { %432 = vmatprep.subr.bf16.mxu0 %v758_v5  ;;  %475 = vmatprep.subr.bf16.mxu1 %v760_v6  ;;  %v764_v9 = vld [vmem:[%s1136_s1 + $0x44] ss:$16 sps:$4 sm:$0xff]   ;;  %v766_v10 = vld [vmem:[%s1136_s1 + $0x4c] ss:$16 sps:$4 sm:$0xff]   ;;  %v768_v11 = vld [vmem:[%s1136_s1 + $0x40] ss:$16 sps:$4 sm:$0xff]  }
   0x6   :  { %v769_v12 = vld [vmem:[%s1136_s1 + $0x48] ss:$16 sps:$4 sm:$0xff]   ;;  %v770_v13 = vld [vmem:[%s1136_s1 + $0x64] ss:$16 sps:$4 sm:$0xff]   ;;  %v772_v14 = vld [vmem:[%s1136_s1 + $0x6c] ss:$16 sps:$4 sm:$0xff]  }
   0x7   :  { %v774_v15 = vld [vmem:[%s1136_s1 + $0x60] ss:$16 sps:$4 sm:$0xff]   ;;  %v775_v16 = vld [vmem:[%s1136_s1 + $0x68] ss:$16 sps:$4 sm:$0xff]   ;;  %v776_v17 = vld [vmem:[%s1136_s1 + $0x84] ss:$16 sps:$4 sm:$0xff]  }
   0x8   :  { %433 = vmatpush1.bf16.msra.mxu0 %v762_v7  ;;  %476 = vmatpush1.bf16.msra.mxu1 %v763_v8  ;;  %v778_v18 = vld [vmem:[%s1136_s1 + $0x8c] ss:$16 sps:$4 sm:$0xff]   ;;  %v780_v19 = vld [vmem:[%s1136_s1 + $0x80] ss:$16 sps:$4 sm:$0xff]   ;;  %v781_v20 = vld [vmem:[%s1136_s1 + $0x88] ss:$16 sps:$4 sm:$0xff]  }
   0x9   :  { %434 = vmatprep.subr.bf16.mxu0 %v764_v9  ;;  %477 = vmatprep.subr.bf16.mxu1 %v766_v10  ;;  %v782_v21 = vld [vmem:[%s1136_s1 + $0xa4] ss:$16 sps:$4 sm:$0xff]   ;;  %v784_v22 = vld [vmem:[%s1136_s1 + $0xac] ss:$16 sps:$4 sm:$0xff]   ;;  %v786_v23 = vld [vmem:[%s1136_s1 + $0xa0] ss:$16 sps:$4 sm:$0xff]  }
   0xa   :  { %v787_v24 = vld [vmem:[%s1136_s1 + $0xa8] ss:$16 sps:$4 sm:$0xff]   ;;  %v788_v25 = vld [vmem:[%s1136_s1 + $0xc4] ss:$16 sps:$4 sm:$0xff]   ;;  %v790_v26 = vld [vmem:[%s1136_s1 + $0xcc] ss:$16 sps:$4 sm:$0xff]  }
   0xb   :  { %v792_v27 = vld [vmem:[%s1136_s1 + $0xc0] ss:$16 sps:$4 sm:$0xff]   ;;  %v793_v28 = vld [vmem:[%s1136_s1 + $0xc8] ss:$16 sps:$4 sm:$0xff]   ;;  %v794_v29 = vld [vmem:[%s1136_s1 + $0xe4] ss:$16 sps:$4 sm:$0xff]  }
   0xc   :  { %435 = vmatpush1.bf16.msra.mxu0 %v768_v11  ;;  %478 = vmatpush1.bf16.msra.mxu1 %v769_v12  ;;  %v796_v30 = vld [vmem:[%s1136_s1 + $0xec] ss:$16 sps:$4 sm:$0xff]   ;;  %v798_v31 = vld [vmem:[%s1136_s1 + $0xe0] ss:$16 sps:$4 sm:$0xff]   ;;  %v799_v32 = vld [vmem:[%s1136_s1 + $0xe8] ss:$16 sps:$4 sm:$0xff]  }
   0xd   :  { %436 = vmatprep.subr.bf16.mxu0 %v770_v13  ;;  %479 = vmatprep.subr.bf16.mxu1 %v772_v14  ;;  %v800_v33 = vld [vmem:[%s1136_s1 + $0x104] ss:$16 sps:$4 sm:$0xff]   ;;  %v802_v34 = vld [vmem:[%s1136_s1 + $0x10c] ss:$16 sps:$4 sm:$0xff]   ;;  %v804_v35 = vld [vmem:[%s1136_s1 + $0x100] ss:$16 sps:$4 sm:$0xff]  }
   0xe   :  { %v805_v36 = vld [vmem:[%s1136_s1 + $0x108] ss:$16 sps:$4 sm:$0xff]   ;;  %v806_v37 = vld [vmem:[%s1136_s1 + $0x124] ss:$16 sps:$4 sm:$0xff]   ;;  %v808_v38 = vld [vmem:[%s1136_s1 + $0x12c] ss:$16 sps:$4 sm:$0xff]  }
   0xf   :  { %v810_v39 = vld [vmem:[%s1136_s1 + $0x120] ss:$16 sps:$4 sm:$0xff]   ;;  %v811_v40 = vld [vmem:[%s1136_s1 + $0x128] ss:$16 sps:$4 sm:$0xff]   ;;  %v812_v41 = vld [vmem:[%s1136_s1 + $0x144] ss:$16 sps:$4 sm:$0xff]  }
  0x10   :  { %437 = vmatpush1.bf16.msra.mxu0 %v774_v15  ;;  %480 = vmatpush1.bf16.msra.mxu1 %v775_v16  ;;  %v814_v42 = vld [vmem:[%s1136_s1 + $0x14c] ss:$16 sps:$4 sm:$0xff]   ;;  %v816_v43 = vld [vmem:[%s1136_s1 + $0x140] ss:$16 sps:$4 sm:$0xff]   ;;  %v817_v44 = vld [vmem:[%s1136_s1 + $0x148] ss:$16 sps:$4 sm:$0xff]  }
  0x11   :  { %438 = vmatprep.subr.bf16.mxu0 %v776_v17  ;;  %481 = vmatprep.subr.bf16.mxu1 %v778_v18  ;;  %v818_v45 = vld [vmem:[%s1136_s1 + $0x164] ss:$16 sps:$4 sm:$0xff]   ;;  %v820_v46 = vld [vmem:[%s1136_s1 + $0x16c] ss:$16 sps:$4 sm:$0xff]   ;;  %v822_v47 = vld [vmem:[%s1136_s1 + $0x160] ss:$16 sps:$4 sm:$0xff]  }
  0x12   :  { %v823_v48 = vld [vmem:[%s1136_s1 + $0x168] ss:$16 sps:$4 sm:$0xff]   ;;  %v850_v49 = vld [vmem:[%s1137_s0 + $0x4] ss:$8 sps:$4 sm:$0x1f]   ;;  %v546_v4 = vshrl.u32 %v545_v3, 7 }
  0x13   :  { %v824_v50 = vld [vmem:[%s1136_s1 + $0x184] ss:$16 sps:$4 sm:$0xff]   ;;  %v826_v51 = vld [vmem:[%s1136_s1 + $0x18c] ss:$16 sps:$4 sm:$0xff]   ;;  %462 = vmatprep.mubr.bf16.mxu0 %v850_v49  ;;  %505 = vmatprep.mubr.bf16.mxu1 %v850_v49  ;;  %v828_v52 = vld [vmem:[%s1136_s1 + $0x180] ss:$16 sps:$4 sm:$0xff]  }
  0x14   :  { %439 = vmatpush1.bf16.msra.mxu0 %v780_v19  ;;  %482 = vmatpush1.bf16.msra.mxu1 %v781_v20  ;;  %v829_v53 = vld [vmem:[%s1136_s1 + $0x188] ss:$16 sps:$4 sm:$0xff]   ;;  %v830_v54 = vld [vmem:[%s1136_s1 + $0x1a4] ss:$16 sps:$4 sm:$0xff]   ;;  %v832_v55 = vld [vmem:[%s1136_s1 + $0x1ac] ss:$16 sps:$4 sm:$0xff]  }
  0x15   :  { %440 = vmatprep.subr.bf16.mxu0 %v782_v21  ;;  %483 = vmatprep.subr.bf16.mxu1 %v784_v22  ;;  %v834_v56 = vld [vmem:[%s1136_s1 + $0x1a0] ss:$16 sps:$4 sm:$0xff]   ;;  %v835_v57 = vld [vmem:[%s1136_s1 + $0x1a8] ss:$16 sps:$4 sm:$0xff]   ;;  %v836_v58 = vld [vmem:[%s1136_s1 + $0x1c4] ss:$16 sps:$4 sm:$0xff]  }
  0x16   :  { %v838_v59 = vld [vmem:[%s1136_s1 + $0x1cc] ss:$16 sps:$4 sm:$0xff]   ;;  %v840_v60 = vld [vmem:[%s1136_s1 + $0x1c0] ss:$16 sps:$4 sm:$0xff]   ;;  %v841_v61 = vld [vmem:[%s1136_s1 + $0x1c8] ss:$16 sps:$4 sm:$0xff]  }
  0x17   :  { %v842_v62 = vld [vmem:[%s1136_s1 + $0x1e4] ss:$16 sps:$4 sm:$0xff]   ;;  %v844_v63 = vld [vmem:[%s1136_s1 + $0x1ec] ss:$16 sps:$4 sm:$0xff]   ;;  %v846_v0 = vld [vmem:[%s1136_s1 + $0x1e0] ss:$16 sps:$4 sm:$0xff]  }
  0x18   :  { %441 = vmatpush1.bf16.msra.mxu0 %v786_v23  ;;  %484 = vmatpush1.bf16.msra.mxu1 %v787_v24  ;;  %v847_v1 = vld [vmem:[%s1136_s1 + $0x1e8] ss:$16 sps:$4 sm:$0xff]   ;;  %v547_v5 = vsub.s32 0, %v546_v4  ;;  %v555_v6 = vsub.s32 2, %v546_v4  ;;  %v543_v7 = vld [vmem:[%s1138_s2] sm:$0xf] }
  0x19   :  { %442 = vmatprep.subr.bf16.mxu0 %v788_v25  ;;  %485 = vmatprep.subr.bf16.mxu1 %v790_v26  ;;  %v848_v2 = vld [vmem:[%s1137_s0] ss:$8 sps:$4 sm:$0x1f]   ;;  %v551_v8 = vsub.s32 1, %v546_v4  ;;  %v559_v9 = vsub.s32 3, %v546_v4 }
  0x1a   :  { %v548_v10 = vrot.slane %v543_v7, %v547_v5  ;;  %v556_v11 = vrot.slane %v543_v7, %v555_v6  ;;  %v30_v16 = vld [vmem:[#allocation2 + $0x20] sm:$0x3]  ;;  %v32_v17 = vld [vmem:[#allocation2 + $0x30] sm:$0x3]  ;;  %v31_v20 = vld [vmem:[#allocation2 + $0x28] sm:$0x3] }
  0x1b   :  { %v552_v14 = vrot.slane %v543_v7, %v551_v8  ;;  %v560_v15 = vrot.slane %v543_v7, %v559_v9  ;;  %v33_v21 = vld [vmem:[#allocation2 + $0x38] sm:$0x3] }
  0x1c   :  { %443 = vmatpush1.bf16.msra.mxu0 %v792_v27  ;;  %486 = vmatpush1.bf16.msra.mxu1 %v793_v28 }
  0x1d   :  { %444 = vmatprep.subr.bf16.mxu0 %v794_v29  ;;  %487 = vmatprep.subr.bf16.mxu1 %v796_v30 }
  0x20   :  { %445 = vmatpush1.bf16.msra.mxu0 %v798_v31  ;;  %488 = vmatpush1.bf16.msra.mxu1 %v799_v32 }
  0x21   :  { %446 = vmatprep.subr.bf16.mxu0 %v800_v33  ;;  %489 = vmatprep.subr.bf16.mxu1 %v802_v34 }
  0x24   :  { %447 = vmatpush1.bf16.msra.mxu0 %v804_v35  ;;  %490 = vmatpush1.bf16.msra.mxu1 %v805_v36 }
  0x25   :  { %448 = vmatprep.subr.bf16.mxu0 %v806_v37  ;;  %491 = vmatprep.subr.bf16.mxu1 %v808_v38 }
  0x28   :  { %449 = vmatpush1.bf16.msra.mxu0 %v810_v39  ;;  %492 = vmatpush1.bf16.msra.mxu1 %v811_v40 }
  0x29   :  { %450 = vmatprep.subr.bf16.mxu0 %v812_v41  ;;  %493 = vmatprep.subr.bf16.mxu1 %v814_v42 }
  0x2c   :  { %451 = vmatpush1.bf16.msra.mxu0 %v816_v43  ;;  %494 = vmatpush1.bf16.msra.mxu1 %v817_v44 }
  0x2d   :  { %452 = vmatprep.subr.bf16.mxu0 %v818_v45  ;;  %495 = vmatprep.subr.bf16.mxu1 %v820_v46 }
  0x30   :  { %453 = vmatpush1.bf16.msra.mxu0 %v822_v47  ;;  %496 = vmatpush1.bf16.msra.mxu1 %v823_v48 }
  0x31   :  { %454 = vmatprep.subr.bf16.mxu0 %v824_v50  ;;  %497 = vmatprep.subr.bf16.mxu1 %v826_v51 }
  0x34   :  { %455 = vmatpush1.bf16.msra.mxu0 %v828_v52  ;;  %498 = vmatpush1.bf16.msra.mxu1 %v829_v53 }
  0x35   :  { %456 = vmatprep.subr.bf16.mxu0 %v830_v54  ;;  %499 = vmatprep.subr.bf16.mxu1 %v832_v55 }
  0x38   :  { %457 = vmatpush1.bf16.msra.mxu0 %v834_v56  ;;  %500 = vmatpush1.bf16.msra.mxu1 %v835_v57 }
  0x39   :  { %458 = vmatprep.subr.bf16.mxu0 %v836_v58  ;;  %501 = vmatprep.subr.bf16.mxu1 %v838_v59 }
  0x3c   :  { %459 = vmatpush1.bf16.msra.mxu0 %v840_v60  ;;  %502 = vmatpush1.bf16.msra.mxu1 %v841_v61 }
  0x3d   :  { %460 = vmatprep.subr.bf16.mxu0 %v842_v62  ;;  %503 = vmatprep.subr.bf16.mxu1 %v844_v63 }
  0x40   :  { %461 = vmatpush1.bf16.msra.mxu0 %v846_v0  ;;  %504 = vmatpush1.bf16.msra.mxu1 %v847_v1 }
  0x43   :  { %463 = vmatmul.mubr.bf16.vlgmr.msra.gmra.mrb[0].mxu0 %v848_v2  ;;  %506 = vmatmul.mubr.bf16.vlgmr.msra.gmra.mrb[0].mxu1 %v848_v2 }
 0x116   :  { %v464_v12 = vpop.f32.mrb[0].mxu0  ;;  %v507_v13 = vpop.f32.mrb[0].mxu1 }
 0x117   :  { %v466_v18 = vpop.f32.mrb[1].mxu0  ;;  %v509_v19 = vpop.f32.mrb[1].mxu1  ;;  %v1089_v24 = vadd.f32 %v548_v10, %v464_v12  ;;  %v1091_v25 = vadd.f32 %v556_v11, %v507_v13 }
 0x118   :  { %v468_v22 = vpop.f32.mrb[2].mxu0  ;;  %v511_v23 = vpop.f32.mrb[2].mxu1  ;;  %v1093_v30 = vadd.f32 %v552_v14, %v466_v18  ;;  %v1095_v31 = vadd.f32 %v560_v15, %v509_v19 }
 0x119   :  { %v520_v26 = vadd.f32 %v468_v22, %v30_v16  ;;  %v522_v27 = vadd.f32 %v511_v23, %v32_v17  ;;  %v470_v28 = vpop.f32.mrb[3].mxu0  ;;  %v513_v29 = vpop.f32.mrb[3].mxu1  ;;  %v581_v34 = vmul.f32 0.044715, %v1089_v24  ;;  %v583_v35 = vmul.f32 0.044715, %v1091_v25 }
 0x11a   :  { %v521_v32 = vadd.f32 %v470_v28, %v31_v20  ;;  %v523_v33 = vadd.f32 %v513_v29, %v33_v21  ;;  %v582_v36 = vmul.f32 0.044715, %v1093_v30  ;;  %v584_v37 = vmul.f32 0.044715, %v1095_v31 }
 0x11b   :  { %528 = vst [vmem:[#allocation2 + $0x20] sm:$0x3] %v520_v26  ;;  %530 = vst [vmem:[#allocation2 + $0x30] sm:$0x3] %v522_v27  ;;  %v589_v38 = vmul.f32 %v581_v34, %v1089_v24  ;;  %v591_v39 = vmul.f32 %v583_v35, %v1091_v25  ;;  %v573_v19 = vmul.f32 0.5, %v1089_v24  ;;  %v575_v22 = vmul.f32 0.5, %v1091_v25 }
 0x11c   :  { %529 = vst [vmem:[#allocation2 + $0x28] sm:$0x3] %v521_v32  ;;  %531 = vst [vmem:[#allocation2 + $0x38] sm:$0x3] %v523_v33  ;;  %v590_v40 = vmul.f32 %v582_v36, %v1093_v30  ;;  %v592_v41 = vmul.f32 %v584_v37, %v1095_v31  ;;  %v574_v29 = vmul.f32 0.5, %v1093_v30  ;;  %v576_v34 = vmul.f32 0.5, %v1095_v31 }
 0x11d   :  { %v597_v42 = vmul.f32 %v589_v38, %v1089_v24  ;;  %v599_v43 = vmul.f32 %v591_v39, %v1091_v25 }
 0x11e   :  { %v598_v44 = vmul.f32 %v590_v40, %v1093_v30  ;;  %v600_v45 = vmul.f32 %v592_v41, %v1095_v31 }
 0x11f   :  { %v605_v46 = vadd.f32 %v597_v42, %v1089_v24  ;;  %v607_v47 = vadd.f32 %v599_v43, %v1091_v25 }
 0x120   :  { %v606_v48 = vadd.f32 %v598_v44, %v1093_v30  ;;  %v608_v49 = vadd.f32 %v600_v45, %v1095_v31 }
 0x121   :  { %v613_v52 = vmul.f32 0.7978846, %v605_v46  ;;  %v615_v53 = vmul.f32 0.7978846, %v607_v47 }
 0x122   :  { %v539_v50 = vld [vmem:[#allocation2 + $0x20] sm:$0x3]  ;;  %v541_v51 = vld [vmem:[#allocation2 + $0x30] sm:$0x3]  ;;  %v614_v57 = vmul.f32 0.7978846, %v606_v48 }
 0x123   :  { %v569_v54 = vadd.f32 %v548_v10, %v539_v50  ;;  %v1113_v55 = vadd.f32 %v556_v11, %v541_v51  ;;  %v540_v56 = vld [vmem:[#allocation2 + $0x28] sm:$0x3]  ;;  %v616_v58 = vmul.f32 0.7978846, %v608_v49  ;;  %v542_v60 = vld [vmem:[#allocation2 + $0x38] sm:$0x3]  ;;  %851 = vtanh.f32 %v613_v52 }
 0x124   :  { %v570_v59 = vadd.f32 %v552_v14, %v540_v56  ;;  %853 = vtanh.f32 %v615_v53  ;;  %v572_v1 = vadd.f32 %v560_v15, %v542_v60 }
 0x125   :  { %v585_v61 = vmul.f32 0.044715, %v569_v54  ;;  %v587_v62 = vmul.f32 0.044715, %v1113_v55  ;;  %855 = vtanh.f32 %v614_v57  ;;  %v577_v39 = vmul.f32 0.5, %v569_v54 }
 0x126   :  { %v586_v63 = vmul.f32 0.044715, %v570_v59  ;;  %857 = vtanh.f32 %v616_v58  ;;  %v588_v5 = vmul.f32 0.044715, %v572_v1  ;;  %v579_v43 = vmul.f32 0.5, %v1113_v55 }
 0x127   :  { %v593_v0 = vmul.f32 %v585_v61, %v569_v54  ;;  %v595_v2 = vmul.f32 %v587_v62, %v1113_v55  ;;  %v578_v44 = vmul.f32 0.5, %v570_v59  ;;  %v580_v49 = vmul.f32 0.5, %v572_v1 }
 0x128   :  { %v594_v3 = vmul.f32 %v586_v63, %v570_v59  ;;  %v596_v9 = vmul.f32 %v588_v5, %v572_v1 }
 0x129   :  { %v601_v4 = vmul.f32 %v593_v0, %v569_v54  ;;  %v603_v6 = vmul.f32 %v595_v2, %v1113_v55 }
 0x12a   :  { %v602_v7 = vmul.f32 %v594_v3, %v570_v59  ;;  %v604_v13 = vmul.f32 %v596_v9, %v572_v1 }
 0x12b   :  { %v609_v8 = vadd.f32 %v601_v4, %v569_v54  ;;  %v611_v10 = vadd.f32 %v603_v6, %v1113_v55 }
 0x12c   :  { %v610_v11 = vadd.f32 %v602_v7, %v570_v59  ;;  %v612_v15 = vadd.f32 %v604_v13, %v572_v1 }
 0x12d   :  { %v617_v12 = vmul.f32 0.7978846, %v609_v8  ;;  %v619_v14 = vmul.f32 0.7978846, %v611_v10  ;;  %v852_v17 = vpop.eup %851 }
 0x12e   :  { %v618_v16 = vmul.f32 0.7978846, %v610_v11  ;;  %v854_v18 = vpop.eup %853  ;;  %v629_v20 = vadd.f32 1.0, %v852_v17  ;;  %v620_v26 = vmul.f32 0.7978846, %v612_v15 }
 0x12f   :  { %859 = vtanh.f32 %v617_v12  ;;  %v856_v21 = vpop.eup %855  ;;  %v631_v23 = vadd.f32 1.0, %v854_v18 }
 0x130   :  { %861 = vtanh.f32 %v619_v14  ;;  %v858_v27 = vpop.eup %857  ;;  %v637_v28 = vmul.f32 %v629_v20, %v573_v19  ;;  %v630_v32 = vadd.f32 1.0, %v856_v21 }
 0x131   :  { %863 = vtanh.f32 %v618_v16  ;;  %v639_v33 = vmul.f32 %v631_v23, %v575_v22  ;;  %v632_v35 = vadd.f32 1.0, %v858_v27 }
 0x132   :  { %865 = vtanh.f32 %v620_v26  ;;  %v638_v36 = vmul.f32 %v630_v32, %v574_v29 }
 0x133   :  { %v640_v24 = vmul.f32 %v632_v35, %v576_v34 }
 0x134   :  { %v747_v37 = vpack.c.bf16 %v638_v36, %v637_v28 }
 0x135   :  { %v748_v38 = vpack.c.bf16 %v640_v24, %v639_v33 }
 0x136   :  { %669 = vst [vmem:[%s1139_s3] sm:$0xff] %v747_v37 }
 0x137   :  { %670 = vst [vmem:[%s1139_s3 + $0x8] sm:$0xff] %v748_v38 }
 0x139   :  { %v860_v25 = vpop.eup %859 }
 0x13a   :  { %v862_v30 = vpop.eup %861  ;;  %v633_v40 = vadd.f32 1.0, %v860_v25 }
 0x13b   :  { %v864_v41 = vpop.eup %863  ;;  %v635_v31 = vadd.f32 1.0, %v862_v30 }
 0x13c   :  { %v641_v42 = vmul.f32 %v633_v40, %v577_v39  ;;  %v634_v45 = vadd.f32 1.0, %v864_v41  ;;  %v866_v46 = vpop.eup %865 }
 0x13d   :  { %v643_v47 = vmul.f32 %v635_v31, %v579_v43  ;;  %v636_v50 = vadd.f32 1.0, %v866_v46 }
 0x13e   :  { %v642_v48 = vmul.f32 %v634_v45, %v578_v44 }
 0x13f   :  { %v644_v52 = vmul.f32 %v636_v50, %v580_v49 }
 0x140   :  { %v749_v51 = vpack.c.bf16 %v642_v48, %v641_v42 }
 0x141   :  { %v750_v53 = vpack.c.bf16 %v644_v52, %v643_v47 }
 0x142   :  { %671 = vst [vmem:[%s1139_s3 + $0x10] sm:$0x11] %v749_v51 }
 0x143   :  { %672 = vst [vmem:[%s1139_s3 + $0x18] sm:$0x11] %v750_v53 }

// kernel: _forward.31
= control target key start
LH: loop header
LB: loop body
LE: loop exit
PB: predicated region body
PF: predicated region fallthrough
CT: control target
= control target key end

     0   :  { %vm23_vm0 = vcmask 1041408   ;;  %v60_v28 = vlaneseq  ;;  %s150_s0 = inlined_call_operand.vmem [shape: bf16[10,256], index: 0, kind: input, shape index: {}]   ;;  %s151_s1 = inlined_call_operand.vmem [shape: f32[1,256], index: 1, kind: input, shape index: {}]   ;;  %s152_s2 = inlined_call_operand.vmem [shape: f32[1,256], index: 2, kind: input, shape index: {}]   ;;  %s153_s3 = inlined_call_operand.vmem [shape: f32[10,256], index: 3, kind: output, shape index: {}]  }
   0x1   :  { %v15_v0 = vld [vmem:[%s150_s0 + $0x8] sm:$0x11]  ;;  %v14_v1 = vld [vmem:[%s150_s0] sm:$0xff] }
   0x2   :  { %v18_v2 = vunpack.c.l.bf16 %v15_v0  ;;  %v19_v3 = vunpack.c.h.bf16 %v15_v0  ;;  %v16_v4 = vunpack.c.l.bf16 %v14_v1  ;;  %v17_v5 = vunpack.c.h.bf16 %v14_v1  ;;  %v58_v36 = vld [vmem:[%s151_s1] sm:$0x3] }
   0x3   :  { %v61_v32 = vshrl.u32 %v60_v28, 7  ;;  %v74_v37 = vld [vmem:[%s152_s2] sm:$0x3] }
   0x4   :  { %v24_v6 = vsel %vm23_vm0, %v18_v2, 0.0  ;;  %v25_v7 = vsel %vm23_vm0, %v19_v3, 0.0  ;;  %v20_v9 = vadd.f32 %v17_v5, %v16_v4 }
   0x5   :  { %v26_v8 = vadd.f32 %v25_v7, %v24_v6  ;;  %v62_v34 = vsub.s32 0, %v61_v32  ;;  %v66_v35 = vsub.s32 1, %v61_v32 }
   0x7   :  { %27 = vadd.xlane.f32.xlu0 %v26_v8  ;;  %v63_v38 = vrot.slane %v58_v36, %v62_v34  ;;  %v67_v39 = vrot.slane %v58_v36, %v66_v35  ;;  %v79_v41 = vrot.slane %v74_v37, %v62_v34  ;;  %v83_v42 = vrot.slane %v74_v37, %v66_v35 }
   0xb   :  { %21 = vadd.xlane.f32.xlu0 %v20_v9 }
  0x94   :  { %v28_v10 = vpop.xlane.xlu0 %27 }
  0x95   :  { %v31_v11 = vmul.f32 0.00390625, %v28_v10 }
  0x97   :  { %v34_v12 = vsub.f32 %v18_v2, %v31_v11  ;;  %v35_v13 = vsub.f32 %v19_v3, %v31_v11 }
  0x98   :  { %v22_v14 = vpop.xlane.xlu0 %21 }
  0x99   :  { %v30_v15 = vmul.f32 0.00390625, %v22_v14  ;;  %v38_v18 = vmul.f32 %v34_v12, %v34_v12  ;;  %v39_v19 = vmul.f32 %v35_v13, %v35_v13 }
  0x9b   :  { %v32_v16 = vsub.f32 %v16_v4, %v30_v15  ;;  %v33_v17 = vsub.f32 %v17_v5, %v30_v15  ;;  %v43_v23 = vsel %vm23_vm0, %v38_v18, 0.0  ;;  %v44_v24 = vsel %vm23_vm0, %v39_v19, 0.0 }
  0x9c   :  { %v45_v25 = vadd.f32 %v44_v24, %v43_v23 }
  0x9d   :  { %v36_v20 = vmul.f32 %v32_v16, %v32_v16  ;;  %v37_v21 = vmul.f32 %v33_v17, %v33_v17 }
  0x9f   :  { %v40_v22 = vadd.f32 %v37_v21, %v36_v20 }
  0xa1   :  { %41 = vadd.xlane.f32.xlu1 %v40_v22 }
  0xa5   :  { %46 = vadd.xlane.f32.xlu1 %v45_v25 }
 0x12e   :  { %v42_v26 = vpop.xlane.xlu1 %41 }
 0x12f   :  { %v48_v27 = vmul.f32 0.00390625, %v42_v26 }
 0x131   :  { %v50_v29 = vadd.f32 1e-12, %v48_v27 }
 0x132   :  { %v47_v30 = vpop.xlane.xlu1 %46 }
 0x133   :  { %98 = vrsqrt.f32 %v50_v29  ;;  %v49_v31 = vmul.f32 0.00390625, %v47_v30 }
 0x135   :  { %v51_v33 = vadd.f32 1e-12, %v49_v31 }
 0x137   :  { %100 = vrsqrt.f32 %v51_v33 }
 0x13d   :  { %v99_v40 = vpop.eup %98 }
 0x13e   :  { %v54_v43 = vmul.f32 %v99_v40, %v32_v16  ;;  %v55_v44 = vmul.f32 %v99_v40, %v33_v17 }
 0x140   :  { %v70_v45 = vmul.f32 %v63_v38, %v54_v43  ;;  %v71_v46 = vmul.f32 %v67_v39, %v55_v44 }
 0x141   :  { %v101_v47 = vpop.eup %100 }
 0x142   :  { %v86_v48 = vadd.f32 %v79_v41, %v70_v45  ;;  %v87_v49 = vadd.f32 %v83_v42, %v71_v46  ;;  %v56_v50 = vmul.f32 %v101_v47, %v34_v12  ;;  %v57_v51 = vmul.f32 %v101_v47, %v35_v13 }
 0x144   :  { %90 = vst [vmem:[%s153_s3] sm:$0xff] %v86_v48  ;;  %91 = vst [vmem:[%s153_s3 + $0x8] sm:$0xff] %v87_v49  ;;  %v72_v52 = vmul.f32 %v63_v38, %v56_v50  ;;  %v73_v53 = vmul.f32 %v67_v39, %v57_v51 }
 0x146   :  { %v88_v54 = vadd.f32 %v79_v41, %v72_v52  ;;  %v89_v55 = vadd.f32 %v83_v42, %v73_v53 }
 0x148   :  { %92 = vst [vmem:[%s153_s3 + $0x10] sm:$0x3] %v88_v54  ;;  %93 = vst [vmem:[%s153_s3 + $0x18] sm:$0x3] %v89_v55 }

// kernel: _forward.23
= control target key start
LH: loop header
LB: loop body
LE: loop exit
PB: predicated region body
PF: predicated region fallthrough
CT: control target
= control target key end

     0   :  { %s1006_s1 = inlined_call_operand.vmem [shape: bf16[512,256], index: 1, kind: input, shape index: {}]   ;;  %s1007_s0 = inlined_call_operand.vmem [shape: bf16[10,512], index: 0, kind: input, shape index: {}]   ;;  %s1008_s2 = inlined_call_operand.vmem [shape: f32[1,256], index: 2, kind: input, shape index: {}]   ;;  %s1009_s3 = inlined_call_operand.vmem [shape: bf16[10,256], index: 3, kind: input, shape index: {}]   ;;  %s1010_s4 = inlined_call_operand.vmem [shape: bf16[10,256], index: 4, kind: output, shape index: {}]  }
   0x1   :  { %v659_v0 = vld [vmem:[%s1006_s1 + $0x4] ss:$8 sps:$4 sm:$0xff]   ;;  %v663_v2 = vld [vmem:[%s1006_s1] ss:$8 sps:$4 sm:$0xff]   ;;  %v665_v4 = vld [vmem:[%s1006_s1 + $0x14] ss:$8 sps:$4 sm:$0xff]  }
   0x2   :  { %v661_v1 = vld [vmem:[%s1006_s1 + $0x104] ss:$8 sps:$4 sm:$0xff]   ;;  %437 = vmatprep.subr.bf16.mxu1 %v659_v0  ;;  %v664_v3 = vld [vmem:[%s1006_s1 + $0x100] ss:$8 sps:$4 sm:$0xff]   ;;  %v667_v5 = vld [vmem:[%s1006_s1 + $0x114] ss:$8 sps:$4 sm:$0xff]  }
   0x3   :  { %480 = vmatprep.subr.bf16.mxu0 %v661_v1  ;;  %438 = vmatpush1.bf16.msra.mxu1 %v663_v2  ;;  %v669_v6 = vld [vmem:[%s1006_s1 + $0x10] ss:$8 sps:$4 sm:$0xff]   ;;  %v671_v8 = vld [vmem:[%s1006_s1 + $0x24] ss:$8 sps:$4 sm:$0xff]   ;;  %v675_v10 = vld [vmem:[%s1006_s1 + $0x20] ss:$8 sps:$4 sm:$0xff]  }
   0x4   :  { %481 = vmatpush1.bf16.msra.mxu0 %v664_v3  ;;  %439 = vmatprep.subr.bf16.mxu1 %v665_v4  ;;  %v670_v7 = vld [vmem:[%s1006_s1 + $0x110] ss:$8 sps:$4 sm:$0xff]   ;;  %v673_v9 = vld [vmem:[%s1006_s1 + $0x124] ss:$8 sps:$4 sm:$0xff]   ;;  %v676_v11 = vld [vmem:[%s1006_s1 + $0x120] ss:$8 sps:$4 sm:$0xff]  }
   0x5   :  { %482 = vmatprep.subr.bf16.mxu0 %v667_v5  ;;  %v677_v12 = vld [vmem:[%s1006_s1 + $0x34] ss:$8 sps:$4 sm:$0xff]   ;;  %v681_v14 = vld [vmem:[%s1006_s1 + $0x30] ss:$8 sps:$4 sm:$0xff]   ;;  %v683_v16 = vld [vmem:[%s1006_s1 + $0x44] ss:$8 sps:$4 sm:$0xff]   ;;  %v540_v5 = vlaneseq }
   0x6   :  { %v679_v13 = vld [vmem:[%s1006_s1 + $0x134] ss:$8 sps:$4 sm:$0xff]   ;;  %v682_v15 = vld [vmem:[%s1006_s1 + $0x130] ss:$8 sps:$4 sm:$0xff]   ;;  %v685_v17 = vld [vmem:[%s1006_s1 + $0x144] ss:$8 sps:$4 sm:$0xff]  }
   0x7   :  { %440 = vmatpush1.bf16.msra.mxu1 %v669_v6  ;;  %v687_v18 = vld [vmem:[%s1006_s1 + $0x40] ss:$8 sps:$4 sm:$0xff]   ;;  %v689_v20 = vld [vmem:[%s1006_s1 + $0x54] ss:$8 sps:$4 sm:$0xff]   ;;  %v693_v22 = vld [vmem:[%s1006_s1 + $0x50] ss:$8 sps:$4 sm:$0xff]  }
   0x8   :  { %483 = vmatpush1.bf16.msra.mxu0 %v670_v7  ;;  %441 = vmatprep.subr.bf16.mxu1 %v671_v8  ;;  %v688_v19 = vld [vmem:[%s1006_s1 + $0x140] ss:$8 sps:$4 sm:$0xff]   ;;  %v691_v21 = vld [vmem:[%s1006_s1 + $0x154] ss:$8 sps:$4 sm:$0xff]   ;;  %v694_v23 = vld [vmem:[%s1006_s1 + $0x150] ss:$8 sps:$4 sm:$0xff]  }
   0x9   :  { %484 = vmatprep.subr.bf16.mxu0 %v673_v9  ;;  %v695_v24 = vld [vmem:[%s1006_s1 + $0x64] ss:$8 sps:$4 sm:$0xff]   ;;  %v699_v26 = vld [vmem:[%s1006_s1 + $0x60] ss:$8 sps:$4 sm:$0xff]   ;;  %v701_v28 = vld [vmem:[%s1006_s1 + $0x74] ss:$8 sps:$4 sm:$0xff]  }
   0xa   :  { %v697_v25 = vld [vmem:[%s1006_s1 + $0x164] ss:$8 sps:$4 sm:$0xff]   ;;  %v700_v27 = vld [vmem:[%s1006_s1 + $0x160] ss:$8 sps:$4 sm:$0xff]   ;;  %v703_v29 = vld [vmem:[%s1006_s1 + $0x174] ss:$8 sps:$4 sm:$0xff]  }
   0xb   :  { %442 = vmatpush1.bf16.msra.mxu1 %v675_v10  ;;  %v705_v30 = vld [vmem:[%s1006_s1 + $0x70] ss:$8 sps:$4 sm:$0xff]   ;;  %v707_v32 = vld [vmem:[%s1006_s1 + $0x84] ss:$8 sps:$4 sm:$0xff]   ;;  %v711_v34 = vld [vmem:[%s1006_s1 + $0x80] ss:$8 sps:$4 sm:$0xff]  }
   0xc   :  { %485 = vmatpush1.bf16.msra.mxu0 %v676_v11  ;;  %443 = vmatprep.subr.bf16.mxu1 %v677_v12  ;;  %v706_v31 = vld [vmem:[%s1006_s1 + $0x170] ss:$8 sps:$4 sm:$0xff]   ;;  %v709_v33 = vld [vmem:[%s1006_s1 + $0x184] ss:$8 sps:$4 sm:$0xff]   ;;  %v712_v35 = vld [vmem:[%s1006_s1 + $0x180] ss:$8 sps:$4 sm:$0xff]  }
   0xd   :  { %486 = vmatprep.subr.bf16.mxu0 %v679_v13  ;;  %v713_v36 = vld [vmem:[%s1006_s1 + $0x94] ss:$8 sps:$4 sm:$0xff]   ;;  %v717_v38 = vld [vmem:[%s1006_s1 + $0x90] ss:$8 sps:$4 sm:$0xff]   ;;  %v719_v40 = vld [vmem:[%s1006_s1 + $0xa4] ss:$8 sps:$4 sm:$0xff]  }
   0xe   :  { %v715_v37 = vld [vmem:[%s1006_s1 + $0x194] ss:$8 sps:$4 sm:$0xff]   ;;  %v718_v39 = vld [vmem:[%s1006_s1 + $0x190] ss:$8 sps:$4 sm:$0xff]   ;;  %v721_v41 = vld [vmem:[%s1006_s1 + $0x1a4] ss:$8 sps:$4 sm:$0xff]  }
   0xf   :  { %444 = vmatpush1.bf16.msra.mxu1 %v681_v14  ;;  %v723_v42 = vld [vmem:[%s1006_s1 + $0xa0] ss:$8 sps:$4 sm:$0xff]   ;;  %v725_v44 = vld [vmem:[%s1006_s1 + $0xb4] ss:$8 sps:$4 sm:$0xff]   ;;  %v729_v46 = vld [vmem:[%s1006_s1 + $0xb0] ss:$8 sps:$4 sm:$0xff]  }
  0x10   :  { %487 = vmatpush1.bf16.msra.mxu0 %v682_v15  ;;  %445 = vmatprep.subr.bf16.mxu1 %v683_v16  ;;  %v724_v43 = vld [vmem:[%s1006_s1 + $0x1a0] ss:$8 sps:$4 sm:$0xff]   ;;  %v727_v45 = vld [vmem:[%s1006_s1 + $0x1b4] ss:$8 sps:$4 sm:$0xff]   ;;  %v730_v47 = vld [vmem:[%s1006_s1 + $0x1b0] ss:$8 sps:$4 sm:$0xff]  }
  0x11   :  { %488 = vmatprep.subr.bf16.mxu0 %v685_v17  ;;  %v731_v48 = vld [vmem:[%s1006_s1 + $0xc4] ss:$8 sps:$4 sm:$0xff]   ;;  %v735_v52 = vld [vmem:[%s1006_s1 + $0xc0] ss:$8 sps:$4 sm:$0xff]   ;;  %v737_v54 = vld [vmem:[%s1006_s1 + $0xd4] ss:$8 sps:$4 sm:$0xff]  }
  0x12   :  { %v757_v49 = vld [vmem:[%s1007_s0 + $0x4] ss:$16 sps:$4 sm:$0x1f]   ;;  %v760_v51 = vld [vmem:[%s1007_s0 + $0xc] ss:$16 sps:$4 sm:$0x1f]  }
  0x13   :  { %446 = vmatpush1.bf16.msra.mxu1 %v687_v18  ;;  %v733_v50 = vld [vmem:[%s1006_s1 + $0x1c4] ss:$8 sps:$4 sm:$0xff]   ;;  %469 = vmatprep.mubr.bf16.mxu1 %v757_v49  ;;  %v736_v53 = vld [vmem:[%s1006_s1 + $0x1c0] ss:$8 sps:$4 sm:$0xff]   ;;  %v739_v55 = vld [vmem:[%s1006_s1 + $0x1d4] ss:$8 sps:$4 sm:$0xff]  }
  0x14   :  { %489 = vmatpush1.bf16.msra.mxu0 %v688_v19  ;;  %447 = vmatprep.subr.bf16.mxu1 %v689_v20  ;;  %v741_v56 = vld [vmem:[%s1006_s1 + $0xd0] ss:$8 sps:$4 sm:$0xff]   ;;  %v743_v58 = vld [vmem:[%s1006_s1 + $0xe4] ss:$8 sps:$4 sm:$0xff]   ;;  %v747_v60 = vld [vmem:[%s1006_s1 + $0xe0] ss:$8 sps:$4 sm:$0xff]  }
  0x15   :  { %490 = vmatprep.subr.bf16.mxu0 %v691_v21  ;;  %512 = vmatprep.mubr.bf16.mxu0 %v760_v51  ;;  %v742_v57 = vld [vmem:[%s1006_s1 + $0x1d0] ss:$8 sps:$4 sm:$0xff]   ;;  %v745_v59 = vld [vmem:[%s1006_s1 + $0x1e4] ss:$8 sps:$4 sm:$0xff]   ;;  %v748_v61 = vld [vmem:[%s1006_s1 + $0x1e0] ss:$8 sps:$4 sm:$0xff]  }
  0x16   :  { %v749_v62 = vld [vmem:[%s1006_s1 + $0xf4] ss:$8 sps:$4 sm:$0xff]   ;;  %v753_v0 = vld [vmem:[%s1006_s1 + $0xf0] ss:$8 sps:$4 sm:$0xff]   ;;  %v761_v4 = vmov 0.0   ;;  %v541_v6 = vshrl.u32 %v540_v5, 7 }
  0x17   :  { %448 = vmatpush1.bf16.msra.mxu1 %v693_v22  ;;  %v751_v63 = vld [vmem:[%s1006_s1 + $0x1f4] ss:$8 sps:$4 sm:$0xff]   ;;  %v754_v1 = vld [vmem:[%s1006_s1 + $0x1f0] ss:$8 sps:$4 sm:$0xff]   ;;  %23 = vst [vmem:[#allocation2 + $0x10] sm:$0x3] %v761_v4 }
  0x18   :  { %491 = vmatpush1.bf16.msra.mxu0 %v694_v23  ;;  %449 = vmatprep.subr.bf16.mxu1 %v695_v24  ;;  %v755_v2 = vld [vmem:[%s1007_s0] ss:$16 sps:$4 sm:$0x1f]   ;;  %v758_v3 = vld [vmem:[%s1007_s0 + $0x8] ss:$16 sps:$4 sm:$0x1f]  }
  0x19   :  { %492 = vmatprep.subr.bf16.mxu0 %v697_v25  ;;  %24 = vst [vmem:[#allocation2 + $0x18] sm:$0x3] %v761_v4  ;;  %v542_v7 = vsub.s32 0, %v541_v6  ;;  %v538_v8 = vld [vmem:[%s1008_s2] sm:$0x3]  ;;  %v546_v9 = vsub.s32 1, %v541_v6 }
  0x1a   :  { %v554_v12 = vld [vmem:[%s1009_s3] sm:$0xff] }
  0x1b   :  { %450 = vmatpush1.bf16.msra.mxu1 %v699_v26  ;;  %v543_v14 = vrot.slane %v538_v8, %v542_v7  ;;  %v547_v18 = vrot.slane %v538_v8, %v546_v9  ;;  %v556_v22 = vunpack.c.l.bf16 %v554_v12 }
  0x1c   :  { %493 = vmatpush1.bf16.msra.mxu0 %v700_v27  ;;  %451 = vmatprep.subr.bf16.mxu1 %v701_v28  ;;  %v557_v27 = vunpack.c.h.bf16 %v554_v12 }
  0x1d   :  { %494 = vmatprep.subr.bf16.mxu0 %v703_v29 }
  0x1e   :  { %v27_v20 = vld [vmem:[#allocation2 + $0x10] sm:$0x3] }
  0x1f   :  { %452 = vmatpush1.bf16.msra.mxu1 %v705_v30 }
  0x20   :  { %495 = vmatpush1.bf16.msra.mxu0 %v706_v31  ;;  %453 = vmatprep.subr.bf16.mxu1 %v707_v32  ;;  %v28_v25 = vld [vmem:[#allocation2 + $0x18] sm:$0x3] }
  0x21   :  { %496 = vmatprep.subr.bf16.mxu0 %v709_v33 }
  0x23   :  { %454 = vmatpush1.bf16.msra.mxu1 %v711_v34 }
  0x24   :  { %497 = vmatpush1.bf16.msra.mxu0 %v712_v35  ;;  %455 = vmatprep.subr.bf16.mxu1 %v713_v36  ;;  %v555_v36 = vld [vmem:[%s1009_s3 + $0x8] sm:$0x11] }
  0x25   :  { %498 = vmatprep.subr.bf16.mxu0 %v715_v37  ;;  %v558_v37 = vunpack.c.l.bf16 %v555_v36 }
  0x27   :  { %456 = vmatpush1.bf16.msra.mxu1 %v717_v38 }
  0x28   :  { %499 = vmatpush1.bf16.msra.mxu0 %v718_v39  ;;  %457 = vmatprep.subr.bf16.mxu1 %v719_v40  ;;  %v559_v39 = vunpack.c.h.bf16 %v555_v36 }
  0x29   :  { %500 = vmatprep.subr.bf16.mxu0 %v721_v41 }
  0x2b   :  { %458 = vmatpush1.bf16.msra.mxu1 %v723_v42 }
  0x2c   :  { %501 = vmatpush1.bf16.msra.mxu0 %v724_v43  ;;  %459 = vmatprep.subr.bf16.mxu1 %v725_v44 }
  0x2d   :  { %502 = vmatprep.subr.bf16.mxu0 %v727_v45 }
  0x2f   :  { %460 = vmatpush1.bf16.msra.mxu1 %v729_v46 }
  0x30   :  { %503 = vmatpush1.bf16.msra.mxu0 %v730_v47  ;;  %461 = vmatprep.subr.bf16.mxu1 %v731_v48 }
  0x31   :  { %504 = vmatprep.subr.bf16.mxu0 %v733_v50 }
  0x33   :  { %462 = vmatpush1.bf16.msra.mxu1 %v735_v52 }
  0x34   :  { %505 = vmatpush1.bf16.msra.mxu0 %v736_v53  ;;  %463 = vmatprep.subr.bf16.mxu1 %v737_v54 }
  0x35   :  { %506 = vmatprep.subr.bf16.mxu0 %v739_v55 }
  0x37   :  { %464 = vmatpush1.bf16.msra.mxu1 %v741_v56 }
  0x38   :  { %507 = vmatpush1.bf16.msra.mxu0 %v742_v57  ;;  %465 = vmatprep.subr.bf16.mxu1 %v743_v58 }
  0x39   :  { %508 = vmatprep.subr.bf16.mxu0 %v745_v59 }
  0x3b   :  { %466 = vmatpush1.bf16.msra.mxu1 %v747_v60 }
  0x3c   :  { %509 = vmatpush1.bf16.msra.mxu0 %v748_v61  ;;  %467 = vmatprep.subr.bf16.mxu1 %v749_v62 }
  0x3d   :  { %510 = vmatprep.subr.bf16.mxu0 %v751_v63 }
  0x3f   :  { %468 = vmatpush1.bf16.msra.mxu1 %v753_v0 }
  0x40   :  { %511 = vmatpush1.bf16.msra.mxu0 %v754_v1 }
  0x42   :  { %470 = vmatmul.mubr.bf16.vlgmr.msra.gmra.mrb[0].mxu1 %v755_v2 }
  0x43   :  { %513 = vmatmul.mubr.bf16.vlgmr.msra.gmra.mrb[0].mxu0 %v758_v3 }
 0x115   :  { %v471_v10 = vpop.f32.mrb[0].mxu1 }
 0x116   :  { %v514_v11 = vpop.f32.mrb[0].mxu0  ;;  %v473_v15 = vpop.f32.mrb[1].mxu1 }
 0x117   :  { %v515_v13 = vadd.f32 %v514_v11, %v471_v10  ;;  %v516_v16 = vpop.f32.mrb[1].mxu0  ;;  %v475_v19 = vpop.f32.mrb[2].mxu1 }
 0x118   :  { %v517_v17 = vadd.f32 %v516_v16, %v473_v15  ;;  %v518_v21 = vpop.f32.mrb[2].mxu0  ;;  %v477_v24 = vpop.f32.mrb[3].mxu1 }
 0x119   :  { %v519_v23 = vadd.f32 %v518_v21, %v475_v19  ;;  %v520_v26 = vpop.f32.mrb[3].mxu0  ;;  %v550_v29 = vadd.f32 %v543_v14, %v515_v13 }
 0x11a   :  { %v521_v28 = vadd.f32 %v520_v26, %v477_v24  ;;  %v551_v31 = vadd.f32 %v547_v18, %v517_v17 }
 0x11b   :  { %v525_v30 = vadd.f32 %v519_v23, %v27_v20  ;;  %v560_v33 = vadd.f32 %v556_v22, %v550_v29 }
 0x11c   :  { %v526_v32 = vadd.f32 %v521_v28, %v28_v25  ;;  %v561_v34 = vadd.f32 %v557_v27, %v551_v31 }
 0x11d   :  { %529 = vst [vmem:[#allocation2 + $0x10] sm:$0x3] %v525_v30 }
 0x11e   :  { %530 = vst [vmem:[#allocation2 + $0x18] sm:$0x3] %v526_v32  ;;  %v652_v35 = vpack.c.bf16 %v561_v34, %v560_v33 }
 0x120   :  { %576 = vst [vmem:[%s1010_s4] sm:$0xff] %v652_v35 }
 0x124   :  { %v536_v38 = vld [vmem:[#allocation2 + $0x10] sm:$0x3] }
 0x125   :  { %v552_v40 = vadd.f32 %v543_v14, %v536_v38  ;;  %v537_v41 = vld [vmem:[#allocation2 + $0x18] sm:$0x3] }
 0x126   :  { %v553_v42 = vadd.f32 %v547_v18, %v537_v41 }
 0x127   :  { %v562_v43 = vadd.f32 %v558_v37, %v552_v40 }
 0x128   :  { %v563_v44 = vadd.f32 %v559_v39, %v553_v42 }
 0x12a   :  { %v653_v45 = vpack.c.bf16 %v563_v44, %v562_v43 }
 0x12c   :  { %577 = vst [vmem:[%s1010_s4 + $0x8] sm:$0x11] %v653_v45 }

</bundles_post_ra>
